<compile_context>
chip_gen: v7x
topology: tpu7x:2x2x1
jax: 0.10.0
libtpu: 0.0.40
codegen_flags: <defaults>
</compile_context>

<pallas_src>
import functools
import math

import jax
import jax.numpy as jnp
import numpy as np
from jax.experimental import pallas as pl
from jax.experimental.pallas import tpu as pltpu

# ----------------------------- configuration --------------------------------
CFG = dict(
    batch=2, tgt_len=8, src_len=16,
    hidden_dim=128, src_dim=64, filter_dim=256,
    head_num=8, num_classes=10, pad_id=0, st_id=1, layer_num=2,
)

_LAYER_W_ORDER = (
    "wq1", "bq1", "wk1", "bk1", "wv1", "bv1", "wo1", "bo1", "g1", "be1",
    "wq2", "bq2", "wk2", "bk2", "wv2", "bv2", "wo2", "bo2", "g2", "be2",
    "wf1", "bf1", "wf2", "bf2", "g3", "be3",
)


# ----------------------------- in-kernel helpers -----------------------------
def _layer_norm(x, gamma, beta, eps=1e-5):
    mu = jnp.mean(x, axis=-1, keepdims=True)
    xc = x - mu
    var = jnp.mean(xc * xc, axis=-1, keepdims=True)
    return xc * jax.lax.rsqrt(var + eps) * gamma + beta


def _mha_wide(x, kv, bias, kmask, vmask, seg_ones,
              wq, bq, wk, bk, wv, bv, wo, bo, *, head_num):
    """Multi-head attention with all heads packed along the lane axis.

    x: (Lq, C) queries, kv: (Lk, Ckv) keys/values, bias: (Lq, H*Lk) additive
    mask (0 / -1e9) or None.  kmask (C, H*Lk) / vmask (H*Lk, C) are 0/1
    head-structure masks, seg_ones (H*Lk, H*Lk) is block-diagonal ones used to
    broadcast each head's softmax denominator.  wq/bq are pre-scaled by 1/temp.
    """
    f32 = jnp.float32
    qp = jnp.dot(x, wq, preferred_element_type=f32) + bq      # (Lq, C)   (already /temperature)
    kp = jnp.dot(kv, wk, preferred_element_type=f32) + bk     # (Lk, C)
    vp = jnp.dot(kv, wv, preferred_element_type=f32) + bv     # (Lk, C)

    H = head_num
    # K_big[c, h*Lk+j] = kp[j, c] if channel c belongs to head h, else 0:
    # one MXU push computes every head's (Lq, Lk) score block side by side.
    k_big = jnp.concatenate([kp.T] * H, axis=1) * kmask       # (C, H*Lk)
    s = jnp.dot(qp, k_big, preferred_element_type=f32)        # (Lq, H*Lk)
    if bias is not None:
        s = s + bias

    # Per-head softmax.  Subtracting the global row max is mathematically exact
    # per head (same constant within each head's lane segment); masked (-1e9)
    # entries underflow to exactly 0 in exp.
    s = s - jnp.max(s, axis=-1, keepdims=True)
    p = jnp.exp(s)
    denom = jnp.dot(p, seg_ones, preferred_element_type=f32)  # per-head sums, lane-broadcast
    p = p * pl.reciprocal(denom, approx=False)                # approx=True possible; kept exact
    # TODO(synk): attention-prob dropout skipped (inference numerics).

    # V_big[h*Lk+j, c] = vp[j, c] if channel c belongs to head h, else 0, so
    # P @ V_big lands directly in the concatenated-head (Lq, C) layout.
    v_big = jnp.concatenate([vp] * H, axis=0) * vmask         # (H*Lk, C)
    ctx = jnp.dot(p, v_big, preferred_element_type=f32)       # (Lq, C)
    return jnp.dot(ctx, wo, preferred_element_type=f32) + bo


# ----------------------------- decoder layer kernel --------------------------
def _decoder_layer_kernel(tgt_ref, src_ref, sbias_ref,
                          kms_ref, vms_ref, segs_ref,
                          kmx_ref, vmx_ref, segx_ref,
                          wq1, bq1, wk1, bk1, wv1, bv1, wo1, bo1, g1, be1,
                          wq2, bq2, wk2, bk2, wv2, bv2, wo2, bo2, g2, be2,
                          wf1, bf1, wf2, bf2, g3, be3,
                          o_ref, *, head_num):
    tgt = tgt_ref[0]                                          # (Lt, C)
    src = src_ref[0]                                          # (Ls, Cs)

    # masked self-attention + residual + LayerNorm
    att = _mha_wide(tgt, tgt, sbias_ref[0],
                    kms_ref[...], vms_ref[...], segs_ref[...],
                    wq1[...], bq1[...], wk1[...], bk1[...], wv1[...], bv1[...],
                    wo1[...], bo1[...], head_num=head_num)
    out = _layer_norm(att + tgt, g1[...], be1[...])

    # cross-attention (query is the RAW self-attn output, as in the PyTorch code)
    att = _mha_wide(att, src, None,
                    kmx_ref[...], vmx_ref[...], segx_ref[...],
                    wq2[...], bq2[...], wk2[...], bk2[...], wv2[...], bv2[...],
                    wo2[...], bo2[...], head_num=head_num)
    out = _layer_norm(att + out, g2[...], be2[...])

    # feed-forward + residual + LayerNorm
    hid = jnp.maximum(
        jnp.dot(out, wf1[...], preferred_element_type=jnp.float32) + bf1[...], 0.0)
    ff = jnp.dot(hid, wf2[...], preferred_element_type=jnp.float32) + bf2[...]
    out = _layer_norm(ff + out, g3[...], be3[...])
    # TODO(synk): all nn.Dropout layers are identity here (inference numerics).

    o_ref[0] = out.astype(o_ref.dtype)


def _decoder_layer_pallas(tgt, src, self_bias, consts_self, consts_cross, w, *, head_num):
    B, Lt, C = tgt.shape
    _, Ls, Cs = src.shape
    consts = list(consts_self) + list(consts_cross)
    ws = [w[name] for name in _LAYER_W_ORDER]

    in_specs = (
        [pl.BlockSpec((1, Lt, C), lambda b: (b, 0, 0)),
         pl.BlockSpec((1, Ls, Cs), lambda b: (b, 0, 0)),
         pl.BlockSpec((1, Lt, head_num * Lt), lambda b: (b, 0, 0))]
        + [pl.BlockSpec(a.shape, lambda b: (0, 0)) for a in consts]
        + [pl.BlockSpec(a.shape, lambda b: (0, 0)) for a in ws]
    )

    return pl.pallas_call(
        functools.partial(_decoder_layer_kernel, head_num=head_num),
        out_shape=jax.ShapeDtypeStruct((B, Lt, C), jnp.float32),
        grid_spec=pltpu.PrefetchScalarGridSpec(
            num_scalar_prefetch=0,
            grid=(B,),
            in_specs=in_specs,
            out_specs=pl.BlockSpec((1, Lt, C), lambda b: (b, 0, 0)),
        ),
        compiler_params=pltpu.CompilerParams(dimension_semantics=("parallel",)),
    )(tgt, src, self_bias, *consts, *ws)


# ----------------------------- generator kernel ------------------------------
def _generator_kernel(x_ref, w_ref, b_ref, o_ref):
    o_ref[0] = (jnp.dot(x_ref[0], w_ref[...], preferred_element_type=jnp.float32)
                + b_ref[...]).astype(o_ref.dtype)


def _generator_pallas(x, w_t, b_row):
    B, Lt, C = x.shape
    N = w_t.shape[1]
    return pl.pallas_call(
        _generator_kernel,
        out_shape=jax.ShapeDtypeStruct((B, Lt, N), jnp.float32),
        grid_spec=pltpu.PrefetchScalarGridSpec(
            num_scalar_prefetch=0,
            grid=(B,),
            in_specs=[pl.BlockSpec((1, Lt, C), lambda b: (b, 0, 0)),
                      pl.BlockSpec(w_t.shape, lambda b: (0, 0)),
                      pl.BlockSpec(b_row.shape, lambda b: (0, 0))],
            out_specs=pl.BlockSpec((1, Lt, N), lambda b: (b, 0, 0)),
        ),
        compiler_params=pltpu.CompilerParams(dimension_semantics=("parallel",)),
    )(x, w_t, b_row)


# ----------------------------- wrapper-side helpers --------------------------
def _head_constants(C, D, H, Lk):
    """0/1 head-structure masks + block-diagonal ones for the wide layout."""
    head_of_channel = np.arange(C)[:, None] // D              # (C, 1)
    head_of_column = np.arange(H * Lk)[None, :] // Lk          # (1, H*Lk)
    kmask = (head_of_channel == head_of_column).astype(np.float32)   # (C, H*Lk)
    col = np.arange(H * Lk) // Lk
    seg = (col[:, None] == col[None, :]).astype(np.float32)          # (H*Lk, H*Lk)
    return jnp.asarray(kmask), jnp.asarray(kmask.T), jnp.asarray(seg)


def _prep_layer_weights(lp, temperature):
    """Pre-transpose nn.Linear weights to (in, out) and fold 1/temp into Q."""
    s, x = lp["self"], lp["cross"]
    row = lambda v: v[None, :].astype(jnp.float32)
    t = lambda wmat: wmat.T.astype(jnp.float32)
    return dict(
        wq1=t(s["wq"]) / temperature, bq1=row(s["bq"]) / temperature,
        wk1=t(s["wk"]), bk1=row(s["bk"]),
        wv1=t(s["wv"]), bv1=row(s["bv"]),
        wo1=t(s["wo"]), bo1=row(s["bo"]),
        g1=row(lp["ln1_g"]), be1=row(lp["ln1_b"]),
        wq2=t(x["wq"]) / temperature, bq2=row(x["bq"]) / temperature,
        wk2=t(x["wk"]), bk2=row(x["bk"]),
        wv2=t(x["wv"]), bv2=row(x["bv"]),
        wo2=t(x["wo"]), bo2=row(x["bo"]),
        g2=row(lp["ln2_g"]), be2=row(lp["ln2_b"]),
        wf1=t(lp["w1"]), bf1=row(lp["b1"]),
        wf2=t(lp["w2"]), bf2=row(lp["b2"]),
        g3=row(lp["ln3_g"]), be3=row(lp["ln3_b"]),
    )


@jax.jit
def transformer_decoder_forward(params, src, text):
    """Teacher-forcing (is_train=True) forward of TransformerDecoder."""
    C, H = CFG["hidden_dim"], CFG["head_num"]
    D = C // H
    B, Lt = text.shape
    Ls = src.shape[1]
    temperature = C ** 0.5

    # Embedding + positional encoding (plain JAX: data-dependent gather).
    tgt = params["embedding"][text] * math.sqrt(C)
    tgt = tgt + params["pos_enc"][None, :Lt, :]

    # pad + causal mask, pre-tiled to the wide (Lq, H*Lk) score layout.
    pad = (text == CFG["pad_id"])
    pad = pad.at[:, 0].set(False)
    order = jnp.triu(jnp.ones((Lt, Lt), jnp.float32), k=1) > 0
    mask = pad[:, None, :] | order[None, :, :]                       # (B, Lt, Lt)
    bias = jnp.where(mask, jnp.float32(-1e9), jnp.float32(0.0))
    self_bias = jnp.tile(bias, (1, 1, H))                            # (B, Lt, H*Lt)

    consts_self = _head_constants(C, D, H, Lt)
    consts_cross = _head_constants(C, D, H, Ls)

    out = tgt
    for lp in params["layers"]:
        w = _prep_layer_weights(lp, temperature)
        out = _decoder_layer_pallas(out, src, self_bias,
                                    consts_self, consts_cross, w, head_num=H)

    # TODO(synk): is_train=False autoregressive greedy-decode loop not implemented.
    return _generator_pallas(out, params["wg"].T, params["bg"][None, :])


# ----------------------------- plain-JAX reference ---------------------------
def _ln_ref(x, g, b, eps=1e-5):
    mu = jnp.mean(x, axis=-1, keepdims=True)
    var = jnp.mean((x - mu) ** 2, axis=-1, keepdims=True)
    return (x - mu) * jax.lax.rsqrt(var + eps) * g + b


def _mha_ref(q, k, v, p, mask, C, H):
    D = C // H
    temp = C ** 0.5
    B, Lq, Lk = q.shape[0], q.shape[1], k.shape[1]
    qp = (q @ p["wq"].T + p["bq"]).reshape(B, Lq, H, D).transpose(0, 2, 1, 3)
    kp = (k @ p["wk"].T + p["bk"]).reshape(B, Lk, H, D).transpose(0, 2, 1, 3)
    vp = (v @ p["wv"].T + p["bv"]).reshape(B, Lk, H, D).transpose(0, 2, 1, 3)
    attn = jnp.einsum("bhqd,bhkd->bhqk", qp, kp) / temp
    if mask is not None:
        attn = jnp.where(mask[:, None, :, :], -jnp.inf, attn)
    attn = jax.nn.softmax(attn, axis=-1)
    out = jnp.einsum("bhqk,bhkd->bhqd", attn, vp)
    out = out.transpose(0, 2, 1, 3).reshape(B, Lq, C)
    return out @ p["wo"].T + p["bo"]


def _reference_forward(params, src, text):
    C, H = CFG["hidden_dim"], CFG["head_num"]
    B, Lt = text.shape
    tgt = params["embedding"][text] * math.sqrt(C)
    tgt = tgt + params["pos_enc"][None, :Lt, :]
    pad = (text == CFG["pad_id"])
    pad = pad.at[:, 0].set(False)
    order = jnp.triu(jnp.ones((Lt, Lt), jnp.float32), k=1) > 0
    mask = pad[:, None, :] | order[None, :, :]
    for lp in params["layers"]:
        att = _mha_ref(tgt, tgt, tgt, lp["self"], mask, C, H)
        out = _ln_ref(att + tgt, lp["ln1_g"], lp["ln1_b"])
        att = _mha_ref(att, src, src, lp["cross"], None, C, H)
        out = _ln_ref(att + out, lp["ln2_g"], lp["ln2_b"])
        ff = jnp.maximum(out @ lp["w1"].T + lp["b1"], 0.0) @ lp["w2"].T + lp["b2"]
        out = _ln_ref(ff + out, lp["ln3_g"], lp["ln3_b"])
        tgt = out
    return tgt @ params["wg"].T + params["bg"]


# ----------------------------- init ------------------------------------------
def _init_linear(key, out_features, in_features):
    kw, kb = jax.random.split(key)
    bound = 1.0 / math.sqrt(in_features)
    w = jax.random.uniform(kw, (out_features, in_features), jnp.float32, -bound, bound)
    b = jax.random.uniform(kb, (out_features,), jnp.float32, -bound, bound)
    return w, b


def _init_mha(key, q_channels, k_channels):
    ks = jax.random.split(key, 4)
    wq, bq = _init_linear(ks[0], q_channels, q_channels)
    wk, bk = _init_linear(ks[1], q_channels, k_channels)
    wv, bv = _init_linear(ks[2], q_channels, k_channels)
    wo, bo = _init_linear(ks[3], q_channels, q_channels)
    return dict(wq=wq, bq=bq, wk=wk, bk=bk, wv=wv, bv=bv, wo=wo, bo=bo)


def _init_decoder_layer(key, C, Cs, F):
    ks = jax.random.split(key, 4)
    w1, b1 = _init_linear(ks[2], F, C)
    w2, b2 = _init_linear(ks[3], C, F)
    ones, zeros = jnp.ones((C,), jnp.float32), jnp.zeros((C,), jnp.float32)
    return dict(
        self=_init_mha(ks[0], C, C), cross=_init_mha(ks[1], C, Cs),
        w1=w1, b1=b1, w2=w2, b2=b2,
        ln1_g=ones, ln1_b=zeros, ln2_g=ones, ln2_b=zeros, ln3_g=ones, ln3_b=zeros,
    )


def _positional_encoding(C, max_len=500):
    pos = np.arange(max_len, dtype=np.float32)[:, None]
    i = np.arange(C, dtype=np.float32)[None, :]
    angle = pos / np.power(10000.0, (2.0 * np.floor(i / 2.0)) / C)
    pe = np.zeros((max_len, C), dtype=np.float32)
    pe[:, 0::2] = np.sin(angle[:, 0::2])
    pe[:, 1::2] = np.cos(angle[:, 1::2])
    return jnp.asarray(pe)


# ----------------------------- demo / test -----------------------------------
if __name__ == "__main__":
    C, Cs, F = CFG["hidden_dim"], CFG["src_dim"], CFG["filter_dim"]
    B, Lt, Ls = CFG["batch"], CFG["tgt_len"], CFG["src_len"]
    NC = CFG["num_classes"]

    root = jax.random.PRNGKey(0)
    k_emb, k_src, k_gen, k_layers = jax.random.split(root, 4)
    layer_keys = jax.random.split(k_layers, CFG["layer_num"])

    wg, bg = _init_linear(k_gen, NC, C)
    params = dict(
        embedding=jax.random.normal(k_emb, (NC + 1, C), jnp.float32),
        pos_enc=_positional_encoding(C),
        layers=[_init_decoder_layer(k, C, Cs, F) for k in layer_keys],
        wg=wg, bg=bg,
    )

    # Encoder features and teacher-forcing token ids (trailing pads exercise
    # the pad mask; each sequence starts with st_id = 1).
    src = jax.random.normal(k_src, (B, Ls, Cs), jnp.float32)
    text = jnp.array([[1, 5, 7, 3, 2, 4, 0, 0],
                      [1, 6, 2, 8, 9, 0, 0, 0]], dtype=jnp.int32)

    out = transformer_decoder_forward(params, src, text)
    out = jax.block_until_ready(out)

    ref = _reference_forward(params, src, text)
    np.testing.assert_allclose(np.asarray(out), np.asarray(ref), rtol=1e-3, atol=1e-3)

    print("KERNEL_OK")
</pallas_src>

<mosaic_0001>
module attributes {stable_mosaic.version = 11 : i64} {
  func.func @_generator_kernel(%arg0: i32, %arg1: memref<1x8x128xf32, #tpu.memory_space<vmem>>, %arg2: memref<128x10xf32, #tpu.memory_space<vmem>>, %arg3: memref<1x10xf32, #tpu.memory_space<vmem>>, %arg4: memref<1x8x10xf32, #tpu.memory_space<vmem>>) attributes {dimension_semantics = [#tpu.dimension_semantics<parallel>], iteration_bounds = array<i64: 2>, scalar_prefetch = 0 : i64, scratch_operands = 0 : i64, tpu.core_type = #tpu.core_type<tc>, window_params = [{transform_indices = @transform_0, window_bounds = array<i64: 1, 8, 128>}, {pipeline_mode = #tpu.pipeline_mode<synchronous>, transform_indices = @transform_1, window_bounds = array<i64: 128, 10>}, {pipeline_mode = #tpu.pipeline_mode<synchronous>, transform_indices = @transform_2, window_bounds = array<i64: 1, 10>}, {transform_indices = @transform_3, window_bounds = array<i64: 1, 8, 10>}]} {
    %c0 = arith.constant 0 : index
    %c0_0 = arith.constant 0 : index
    %c0_1 = arith.constant 0 : index
    %0 = vector.load %arg1[%c0, %c0_0, %c0_1] : memref<1x8x128xf32, #tpu.memory_space<vmem>>, vector<1x8x128xf32>
    %1 = vector.shape_cast %0 : vector<1x8x128xf32> to vector<8x128xf32>
    %c0_2 = arith.constant 0 : index
    %c0_3 = arith.constant 0 : index
    %2 = vector.load %arg2[%c0_2, %c0_3] : memref<128x10xf32, #tpu.memory_space<vmem>>, vector<128x10xf32>
    %cst = arith.constant dense<0.000000e+00> : vector<8x10xf32>
    %3 = tpu.matmul %1, %2, %cst {dimension_numbers = #tpu.dot_dimension_numbers<[1], [0], [0], [1], [0, 0, 1, 1], [], []>} : vector<8x128xf32>, vector<128x10xf32>, vector<8x10xf32> -> vector<8x10xf32>
    %c0_4 = arith.constant 0 : index
    %c0_5 = arith.constant 0 : index
    %4 = vector.load %arg3[%c0_4, %c0_5] : memref<1x10xf32, #tpu.memory_space<vmem>>, vector<1x10xf32>
    %5 = vector.broadcast %4 : vector<1x10xf32> to vector<8x10xf32>
    %6 = arith.addf %3, %5 : vector<8x10xf32>
    %c0_6 = arith.constant 0 : index
    %c0_7 = arith.constant 0 : index
    %c0_8 = arith.constant 0 : index
    %7 = vector.load %arg4[%c0_6, %c0_7, %c0_8] : memref<1x8x10xf32, #tpu.memory_space<vmem>>, vector<1x8x10xf32>
    %8 = vector.shape_cast %7 : vector<1x8x10xf32> to vector<8x10xf32>
    %9 = vector.shape_cast %6 : vector<8x10xf32> to vector<1x8x10xf32>
    tpu.vector_store %arg4[%c0_6, %c0_7, %c0_8], %9 {strides = array<i32>} : memref<1x8x10xf32, #tpu.memory_space<vmem>>, vector<1x8x10xf32>,
    return
  }
  func.func @transform_0(%arg0: i32) -> (i32, i32, i32) {
    %c0_i32 = arith.constant 0 : i32
    %c0_i32_0 = arith.constant 0 : i32
    %c0_i32_1 = arith.constant 0 : i32
    return %arg0, %c0_i32, %c0_i32_0 : i32, i32, i32
  }
  func.func @transform_1(%arg0: i32) -> (i32, i32) {
    %c0_i32 = arith.constant 0 : i32
    %c0_i32_0 = arith.constant 0 : i32
    %c0_i32_1 = arith.constant 0 : i32
    return %c0_i32, %c0_i32_0 : i32, i32
  }
  func.func @transform_2(%arg0: i32) -> (i32, i32) {
    %c0_i32 = arith.constant 0 : i32
    %c0_i32_0 = arith.constant 0 : i32
    %c0_i32_1 = arith.constant 0 : i32
    return %c0_i32, %c0_i32_0 : i32, i32
  }
  func.func @transform_3(%arg0: i32) -> (i32, i32, i32) {
    %c0_i32 = arith.constant 0 : i32
    %c0_i32_0 = arith.constant 0 : i32
    %c0_i32_1 = arith.constant 0 : i32
    return %arg0, %c0_i32, %c0_i32_0 : i32, i32, i32
  }
}

module attributes {stable_mosaic.version = 11 : i64} {
  func.func @_decoder_layer_kernel(%arg0: i32, %arg1: memref<1x8x128xf32, #tpu.memory_space<vmem>>, %arg2: memref<1x16x64xf32, #tpu.memory_space<vmem>>, %arg3: memref<1x8x64xf32, #tpu.memory_space<vmem>>, %arg4: memref<128x64xf32, #tpu.memory_space<vmem>>, %arg5: memref<64x128xf32, #tpu.memory_space<vmem>>, %arg6: memref<64x64xf32, #tpu.memory_space<vmem>>, %arg7: memref<128x128xf32, #tpu.memory_space<vmem>>, %arg8: memref<128x128xf32, #tpu.memory_space<vmem>>, %arg9: memref<128x128xf32, #tpu.memory_space<vmem>>, %arg10: memref<128x128xf32, #tpu.memory_space<vmem>>, %arg11: memref<1x128xf32, #tpu.memory_space<vmem>>, %arg12: memref<128x128xf32, #tpu.memory_space<vmem>>, %arg13: memref<1x128xf32, #tpu.memory_space<vmem>>, %arg14: memref<128x128xf32, #tpu.memory_space<vmem>>, %arg15: memref<1x128xf32, #tpu.memory_space<vmem>>, %arg16: memref<128x128xf32, #tpu.memory_space<vmem>>, %arg17: memref<1x128xf32, #tpu.memory_space<vmem>>, %arg18: memref<1x128xf32, #tpu.memory_space<vmem>>, %arg19: memref<1x128xf32, #tpu.memory_space<vmem>>, %arg20: memref<128x128xf32, #tpu.memory_space<vmem>>, %arg21: memref<1x128xf32, #tpu.memory_space<vmem>>, %arg22: memref<64x128xf32, #tpu.memory_space<vmem>>, %arg23: memref<1x128xf32, #tpu.memory_space<vmem>>, %arg24: memref<64x128xf32, #tpu.memory_space<vmem>>, %arg25: memref<1x128xf32, #tpu.memory_space<vmem>>, %arg26: memref<128x128xf32, #tpu.memory_space<vmem>>, %arg27: memref<1x128xf32, #tpu.memory_space<vmem>>, %arg28: memref<1x128xf32, #tpu.memory_space<vmem>>, %arg29: memref<1x128xf32, #tpu.memory_space<vmem>>, %arg30: memref<128x256xf32, #tpu.memory_space<vmem>>, %arg31: memref<1x256xf32, #tpu.memory_space<vmem>>, %arg32: memref<256x128xf32, #tpu.memory_space<vmem>>, %arg33: memref<1x128xf32, #tpu.memory_space<vmem>>, %arg34: memref<1x128xf32, #tpu.memory_space<vmem>>, %arg35: memref<1x128xf32, #tpu.memory_space<vmem>>, %arg36: memref<1x8x128xf32, #tpu.memory_space<vmem>>) attributes {dimension_semantics = [#tpu.dimension_semantics<parallel>], iteration_bounds = array<i64: 2>, scalar_prefetch = 0 : i64, scratch_operands = 0 : i64, tpu.core_type = #tpu.core_type<tc>, window_params = [{transform_indices = @transform_0, window_bounds = array<i64: 1, 8, 128>}, {transform_indices = @transform_1, window_bounds = array<i64: 1, 16, 64>}, {transform_indices = @transform_2, window_bounds = array<i64: 1, 8, 64>}, {pipeline_mode = #tpu.pipeline_mode<synchronous>, transform_indices = @transform_3, window_bounds = array<i64: 128, 64>}, {pipeline_mode = #tpu.pipeline_mode<synchronous>, transform_indices = @transform_4, window_bounds = array<i64: 64, 128>}, {pipeline_mode = #tpu.pipeline_mode<synchronous>, transform_indices = @transform_5, window_bounds = array<i64: 64, 64>}, {pipeline_mode = #tpu.pipeline_mode<synchronous>, transform_indices = @transform_6, window_bounds = array<i64: 128, 128>}, {pipeline_mode = #tpu.pipeline_mode<synchronous>, transform_indices = @transform_7, window_bounds = array<i64: 128, 128>}, {pipeline_mode = #tpu.pipeline_mode<synchronous>, transform_indices = @transform_8, window_bounds = array<i64: 128, 128>}, {pipeline_mode = #tpu.pipeline_mode<synchronous>, transform_indices = @transform_9, window_bounds = array<i64: 128, 128>}, {pipeline_mode = #tpu.pipeline_mode<synchronous>, transform_indices = @transform_10, window_bounds = array<i64: 1, 128>}, {pipeline_mode = #tpu.pipeline_mode<synchronous>, transform_indices = @transform_11, window_bounds = array<i64: 128, 128>}, {pipeline_mode = #tpu.pipeline_mode<synchronous>, transform_indices = @transform_12, window_bounds = array<i64: 1, 128>}, {pipeline_mode = #tpu.pipeline_mode<synchronous>, transform_indices = @transform_13, window_bounds = array<i64: 128, 128>}, {pipeline_mode = #tpu.pipeline_mode<synchronous>, transform_indices = @transform_14, window_bounds = array<i64: 1, 128>}, {pipeline_mode = #tpu.pipeline_mode<synchronous>, transform_indices = @transform_15, window_bounds = array<i64: 128, 128>}, {pipeline_mode = #tpu.pipeline_mode<synchronous>, transform_indices = @transform_16, window_bounds = array<i64: 1, 128>}, {pipeline_mode = #tpu.pipeline_mode<synchronous>, transform_indices = @transform_17, window_bounds = array<i64: 1, 128>}, {pipeline_mode = #tpu.pipeline_mode<synchronous>, transform_indices = @transform_18, window_bounds = array<i64: 1, 128>}, {pipeline_mode = #tpu.pipeline_mode<synchronous>, transform_indices = @transform_19, window_bounds = array<i64: 128, 128>}, {pipeline_mode = #tpu.pipeline_mode<synchronous>, transform_indices = @transform_20, window_bounds = array<i64: 1, 128>}, {pipeline_mode = #tpu.pipeline_mode<synchronous>, transform_indices = @transform_21, window_bounds = array<i64: 64, 128>}, {pipeline_mode = #tpu.pipeline_mode<synchronous>, transform_indices = @transform_22, window_bounds = array<i64: 1, 128>}, {pipeline_mode = #tpu.pipeline_mode<synchronous>, transform_indices = @transform_23, window_bounds = array<i64: 64, 128>}, {pipeline_mode = #tpu.pipeline_mode<synchronous>, transform_indices = @transform_24, window_bounds = array<i64: 1, 128>}, {pipeline_mode = #tpu.pipeline_mode<synchronous>, transform_indices = @transform_25, window_bounds = array<i64: 128, 128>}, {pipeline_mode = #tpu.pipeline_mode<synchronous>, transform_indices = @transform_26, window_bounds = array<i64: 1, 128>}, {pipeline_mode = #tpu.pipeline_mode<synchronous>, transform_indices = @transform_27, window_bounds = array<i64: 1, 128>}, {pipeline_mode = #tpu.pipeline_mode<synchronous>, transform_indices = @transform_28, window_bounds = array<i64: 1, 128>}, {pipeline_mode = #tpu.pipeline_mode<synchronous>, transform_indices = @transform_29, window_bounds = array<i64: 128, 256>}, {pipeline_mode = #tpu.pipeline_mode<synchronous>, transform_indices = @transform_30, window_bounds = array<i64: 1, 256>}, {pipeline_mode = #tpu.pipeline_mode<synchronous>, transform_indices = @transform_31, window_bounds = array<i64: 256, 128>}, {pipeline_mode = #tpu.pipeline_mode<synchronous>, transform_indices = @transform_32, window_bounds = array<i64: 1, 128>}, {pipeline_mode = #tpu.pipeline_mode<synchronous>, transform_indices = @transform_33, window_bounds = array<i64: 1, 128>}, {pipeline_mode = #tpu.pipeline_mode<synchronous>, transform_indices = @transform_34, window_bounds = array<i64: 1, 128>}, {transform_indices = @transform_35, window_bounds = array<i64: 1, 8, 128>}]} {
    %c0 = arith.constant 0 : index
    %c0_0 = arith.constant 0 : index
    %c0_1 = arith.constant 0 : index
    %0 = vector.load %arg1[%c0, %c0_0, %c0_1] : memref<1x8x128xf32, #tpu.memory_space<vmem>>, vector<1x8x128xf32>
    %1 = vector.shape_cast %0 : vector<1x8x128xf32> to vector<8x128xf32>
    %c0_2 = arith.constant 0 : index
    %c0_3 = arith.constant 0 : index
    %c0_4 = arith.constant 0 : index
    %2 = vector.load %arg2[%c0_2, %c0_3, %c0_4] : memref<1x16x64xf32, #tpu.memory_space<vmem>>, vector<1x16x64xf32>
    %3 = vector.shape_cast %2 : vector<1x16x64xf32> to vector<16x64xf32>
    %c0_5 = arith.constant 0 : index
    %c0_6 = arith.constant 0 : index
    %c0_7 = arith.constant 0 : index
    %4 = vector.load %arg3[%c0_5, %c0_6, %c0_7] : memref<1x8x64xf32, #tpu.memory_space<vmem>>, vector<1x8x64xf32>
    %5 = vector.shape_cast %4 : vector<1x8x64xf32> to vector<8x64xf32>
    %c0_8 = arith.constant 0 : index
    %c0_9 = arith.constant 0 : index
    %6 = vector.load %arg4[%c0_8, %c0_9] : memref<128x64xf32, #tpu.memory_space<vmem>>, vector<128x64xf32>
    %c0_10 = arith.constant 0 : index
    %c0_11 = arith.constant 0 : index
    %7 = vector.load %arg5[%c0_10, %c0_11] : memref<64x128xf32, #tpu.memory_space<vmem>>, vector<64x128xf32>
    %c0_12 = arith.constant 0 : index
    %c0_13 = arith.constant 0 : index
    %8 = vector.load %arg6[%c0_12, %c0_13] : memref<64x64xf32, #tpu.memory_space<vmem>>, vector<64x64xf32>
    %c0_14 = arith.constant 0 : index
    %c0_15 = arith.constant 0 : index
    %9 = vector.load %arg10[%c0_14, %c0_15] : memref<128x128xf32, #tpu.memory_space<vmem>>, vector<128x128xf32>
    %c0_16 = arith.constant 0 : index
    %c0_17 = arith.constant 0 : index
    %10 = vector.load %arg11[%c0_16, %c0_17] : memref<1x128xf32, #tpu.memory_space<vmem>>, vector<1x128xf32>
    %c0_18 = arith.constant 0 : index
    %c0_19 = arith.constant 0 : index
    %11 = vector.load %arg12[%c0_18, %c0_19] : memref<128x128xf32, #tpu.memory_space<vmem>>, vector<128x128xf32>
    %c0_20 = arith.constant 0 : index
    %c0_21 = arith.constant 0 : index
    %12 = vector.load %arg13[%c0_20, %c0_21] : memref<1x128xf32, #tpu.memory_space<vmem>>, vector<1x128xf32>
    %c0_22 = arith.constant 0 : index
    %c0_23 = arith.constant 0 : index
    %13 = vector.load %arg14[%c0_22, %c0_23] : memref<128x128xf32, #tpu.memory_space<vmem>>, vector<128x128xf32>
    %c0_24 = arith.constant 0 : index
    %c0_25 = arith.constant 0 : index
    %14 = vector.load %arg15[%c0_24, %c0_25] : memref<1x128xf32, #tpu.memory_space<vmem>>, vector<1x128xf32>
    %c0_26 = arith.constant 0 : index
    %c0_27 = arith.constant 0 : index
    %15 = vector.load %arg16[%c0_26, %c0_27] : memref<128x128xf32, #tpu.memory_space<vmem>>, vector<128x128xf32>
    %c0_28 = arith.constant 0 : index
    %c0_29 = arith.constant 0 : index
    %16 = vector.load %arg17[%c0_28, %c0_29] : memref<1x128xf32, #tpu.memory_space<vmem>>, vector<1x128xf32>
    %cst = arith.constant dense<0.000000e+00> : vector<8x128xf32>
    %17 = tpu.matmul %1, %9, %cst {dimension_numbers = #tpu.dot_dimension_numbers<[1], [0], [0], [1], [0, 0, 1, 1], [], []>} : vector<8x128xf32>, vector<128x128xf32>, vector<8x128xf32> -> vector<8x128xf32>
    %18 = vector.broadcast %10 : vector<1x128xf32> to vector<8x128xf32>
    %19 = arith.addf %17, %18 : vector<8x128xf32>
    %cst_30 = arith.constant dense<0.000000e+00> : vector<8x128xf32>
    %20 = tpu.matmul %1, %11, %cst_30 {dimension_numbers = #tpu.dot_dimension_numbers<[1], [0], [0], [1], [0, 0, 1, 1], [], []>} : vector<8x128xf32>, vector<128x128xf32>, vector<8x128xf32> -> vector<8x128xf32>
    %21 = vector.broadcast %12 : vector<1x128xf32> to vector<8x128xf32>
    %22 = arith.addf %20, %21 : vector<8x128xf32>
    %cst_31 = arith.constant dense<0.000000e+00> : vector<8x128xf32>
    %23 = tpu.matmul %1, %13, %cst_31 {dimension_numbers = #tpu.dot_dimension_numbers<[1], [0], [0], [1], [0, 0, 1, 1], [], []>} : vector<8x128xf32>, vector<128x128xf32>, vector<8x128xf32> -> vector<8x128xf32>
    %24 = vector.broadcast %14 : vector<1x128xf32> to vector<8x128xf32>
    %25 = arith.addf %23, %24 : vector<8x128xf32>
    %26 = tpu.transpose %22, [1, 0] : vector<8x128xf32> -> vector<128x8xf32>
    %27 = tpu.concatenate %26, %26, %26, %26, %26, %26, %26, %26 in 1 : vector<128x8xf32>, vector<128x8xf32>, vector<128x8xf32>, vector<128x8xf32>, vector<128x8xf32>, vector<128x8xf32>, vector<128x8xf32>, vector<128x8xf32> -> vector<128x64xf32>
    %28 = arith.mulf %27, %6 : vector<128x64xf32>
    %cst_32 = arith.constant dense<0.000000e+00> : vector<8x64xf32>
    %29 = tpu.matmul %19, %28, %cst_32 {dimension_numbers = #tpu.dot_dimension_numbers<[1], [0], [0], [1], [0, 0, 1, 1], [], []>} : vector<8x128xf32>, vector<128x64xf32>, vector<8x64xf32> -> vector<8x64xf32>
    %30 = arith.addf %29, %5 : vector<8x64xf32>
    %cst_33 = arith.constant dense<0xFF800000> : vector<8xf32>
    %31 = vector.multi_reduction <maximumf>, %30, %cst_33 [1] : vector<8x64xf32> to vector<8xf32>
    %32 = vector.shape_cast %31 : vector<8xf32> to vector<8x1xf32>
    %33 = vector.broadcast %32 : vector<8x1xf32> to vector<8x64xf32>
    %34 = arith.subf %30, %33 : vector<8x64xf32>
    %35 = math.exp %34 : vector<8x64xf32>
    %cst_34 = arith.constant dense<0.000000e+00> : vector<8x64xf32>
    %36 = tpu.matmul %35, %8, %cst_34 {dimension_numbers = #tpu.dot_dimension_numbers<[1], [0], [0], [1], [0, 0, 1, 1], [], []>} : vector<8x64xf32>, vector<64x64xf32>, vector<8x64xf32> -> vector<8x64xf32>
    %37 = tpu.reciprocal %36 : vector<8x64xf32> -> vector<8x64xf32>
    %38 = arith.mulf %35, %37 : vector<8x64xf32>
    %39 = tpu.concatenate %25, %25, %25, %25, %25, %25, %25, %25 in 0 : vector<8x128xf32>, vector<8x128xf32>, vector<8x128xf32>, vector<8x128xf32>, vector<8x128xf32>, vector<8x128xf32>, vector<8x128xf32>, vector<8x128xf32> -> vector<64x128xf32>
    %40 = arith.mulf %39, %7 : vector<64x128xf32>
    %cst_35 = arith.constant dense<0.000000e+00> : vector<8x128xf32>
    %41 = tpu.matmul %38, %40, %cst_35 {dimension_numbers = #tpu.dot_dimension_numbers<[1], [0], [0], [1], [0, 0, 1, 1], [], []>} : vector<8x64xf32>, vector<64x128xf32>, vector<8x128xf32> -> vector<8x128xf32>
    %cst_36 = arith.constant dense<0.000000e+00> : vector<8x128xf32>
    %42 = tpu.matmul %41, %15, %cst_36 {dimension_numbers = #tpu.dot_dimension_numbers<[1], [0], [0], [1], [0, 0, 1, 1], [], []>} : vector<8x128xf32>, vector<128x128xf32>, vector<8x128xf32> -> vector<8x128xf32>
    %43 = vector.broadcast %16 : vector<1x128xf32> to vector<8x128xf32>
    %44 = arith.addf %42, %43 : vector<8x128xf32>
    %45 = arith.addf %44, %1 : vector<8x128xf32>
    %c0_37 = arith.constant 0 : index
    %c0_38 = arith.constant 0 : index
    %46 = vector.load %arg18[%c0_37, %c0_38] : memref<1x128xf32, #tpu.memory_space<vmem>>, vector<1x128xf32>
    %c0_39 = arith.constant 0 : index
    %c0_40 = arith.constant 0 : index
    %47 = vector.load %arg19[%c0_39, %c0_40] : memref<1x128xf32, #tpu.memory_space<vmem>>, vector<1x128xf32>
    %cst_41 = arith.constant dense<0.000000e+00> : vector<8xf32>
    %48 = vector.multi_reduction <add>, %45, %cst_41 [1] : vector<8x128xf32> to vector<8xf32>
    %49 = vector.shape_cast %48 : vector<8xf32> to vector<8x1xf32>
    %cst_42 = arith.constant 1.280000e+02 : f32
    %50 = vector.broadcast %cst_42 : f32 to vector<8x1xf32>
    %51 = arith.divf %49, %50 : vector<8x1xf32>
    %52 = vector.broadcast %51 : vector<8x1xf32> to vector<8x128xf32>
    %53 = arith.subf %45, %52 : vector<8x128xf32>
    %54 = arith.mulf %53, %53 : vector<8x128xf32>
    %cst_43 = arith.constant dense<0.000000e+00> : vector<8xf32>
    %55 = vector.multi_reduction <add>, %54, %cst_43 [1] : vector<8x128xf32> to vector<8xf32>
    %56 = vector.shape_cast %55 : vector<8xf32> to vector<8x1xf32>
    %cst_44 = arith.constant 1.280000e+02 : f32
    %57 = vector.broadcast %cst_44 : f32 to vector<8x1xf32>
    %58 = arith.divf %56, %57 : vector<8x1xf32>
    %cst_45 = arith.constant 9.99999974E-6 : f32
    %59 = vector.broadcast %cst_45 : f32 to vector<8x1xf32>
    %60 = arith.addf %58, %59 : vector<8x1xf32>
    %61 = math.rsqrt %60 : vector<8x1xf32>
    %62 = vector.broadcast %61 : vector<8x1xf32> to vector<8x128xf32>
    %63 = arith.mulf %53, %62 : vector<8x128xf32>
    %64 = vector.broadcast %46 : vector<1x128xf32> to vector<8x128xf32>
    %65 = arith.mulf %63, %64 : vector<8x128xf32>
    %66 = vector.broadcast %47 : vector<1x128xf32> to vector<8x128xf32>
    %67 = arith.addf %65, %66 : vector<8x128xf32>
    %c0_46 = arith.constant 0 : index
    %c0_47 = arith.constant 0 : index
    %68 = vector.load %arg7[%c0_46, %c0_47] : memref<128x128xf32, #tpu.memory_space<vmem>>, vector<128x128xf32>
    %c0_48 = arith.constant 0 : index
    %c0_49 = arith.constant 0 : index
    %69 = vector.load %arg8[%c0_48, %c0_49] : memref<128x128xf32, #tpu.memory_space<vmem>>, vector<128x128xf32>
    %c0_50 = arith.constant 0 : index
    %c0_51 = arith.constant 0 : index
    %70 = vector.load %arg9[%c0_50, %c0_51] : memref<128x128xf32, #tpu.memory_space<vmem>>, vector<128x128xf32>
    %c0_52 = arith.constant 0 : index
    %c0_53 = arith.constant 0 : index
    %71 = vector.load %arg20[%c0_52, %c0_53] : memref<128x128xf32, #tpu.memory_space<vmem>>, vector<128x128xf32>
    %c0_54 = arith.constant 0 : index
    %c0_55 = arith.constant 0 : index
    %72 = vector.load %arg21[%c0_54, %c0_55] : memref<1x128xf32, #tpu.memory_space<vmem>>, vector<1x128xf32>
    %c0_56 = arith.constant 0 : index
    %c0_57 = arith.constant 0 : index
    %73 = vector.load %arg22[%c0_56, %c0_57] : memref<64x128xf32, #tpu.memory_space<vmem>>, vector<64x128xf32>
    %c0_58 = arith.constant 0 : index
    %c0_59 = arith.constant 0 : index
    %74 = vector.load %arg23[%c0_58, %c0_59] : memref<1x128xf32, #tpu.memory_space<vmem>>, vector<1x128xf32>
    %c0_60 = arith.constant 0 : index
    %c0_61 = arith.constant 0 : index
    %75 = vector.load %arg24[%c0_60, %c0_61] : memref<64x128xf32, #tpu.memory_space<vmem>>, vector<64x128xf32>
    %c0_62 = arith.constant 0 : index
    %c0_63 = arith.constant 0 : index
    %76 = vector.load %arg25[%c0_62, %c0_63] : memref<1x128xf32, #tpu.memory_space<vmem>>, vector<1x128xf32>
    %c0_64 = arith.constant 0 : index
    %c0_65 = arith.constant 0 : index
    %77 = vector.load %arg26[%c0_64, %c0_65] : memref<128x128xf32, #tpu.memory_space<vmem>>, vector<128x128xf32>
    %c0_66 = arith.constant 0 : index
    %c0_67 = arith.constant 0 : index
    %78 = vector.load %arg27[%c0_66, %c0_67] : memref<1x128xf32, #tpu.memory_space<vmem>>, vector<1x128xf32>
    %cst_68 = arith.constant dense<0.000000e+00> : vector<8x128xf32>
    %79 = tpu.matmul %44, %71, %cst_68 {dimension_numbers = #tpu.dot_dimension_numbers<[1], [0], [0], [1], [0, 0, 1, 1], [], []>} : vector<8x128xf32>, vector<128x128xf32>, vector<8x128xf32> -> vector<8x128xf32>
    %80 = vector.broadcast %72 : vector<1x128xf32> to vector<8x128xf32>
    %81 = arith.addf %79, %80 : vector<8x128xf32>
    %cst_69 = arith.constant dense<0.000000e+00> : vector<16x128xf32>
    %82 = tpu.matmul %3, %73, %cst_69 {dimension_numbers = #tpu.dot_dimension_numbers<[1], [0], [0], [1], [0, 0, 1, 1], [], []>} : vector<16x64xf32>, vector<64x128xf32>, vector<16x128xf32> -> vector<16x128xf32>
    %83 = vector.broadcast %74 : vector<1x128xf32> to vector<16x128xf32>
    %84 = arith.addf %82, %83 : vector<16x128xf32>
    %cst_70 = arith.constant dense<0.000000e+00> : vector<16x128xf32>
    %85 = tpu.matmul %3, %75, %cst_70 {dimension_numbers = #tpu.dot_dimension_numbers<[1], [0], [0], [1], [0, 0, 1, 1], [], []>} : vector<16x64xf32>, vector<64x128xf32>, vector<16x128xf32> -> vector<16x128xf32>
    %86 = vector.broadcast %76 : vector<1x128xf32> to vector<16x128xf32>
    %87 = arith.addf %85, %86 : vector<16x128xf32>
    %88 = tpu.transpose %84, [1, 0] : vector<16x128xf32> -> vector<128x16xf32>
    %89 = tpu.concatenate %88, %88, %88, %88, %88, %88, %88, %88 in 1 : vector<128x16xf32>, vector<128x16xf32>, vector<128x16xf32>, vector<128x16xf32>, vector<128x16xf32>, vector<128x16xf32>, vector<128x16xf32>, vector<128x16xf32> -> vector<128x128xf32>
    %90 = arith.mulf %89, %68 : vector<128x128xf32>
    %cst_71 = arith.constant dense<0.000000e+00> : vector<8x128xf32>
    %91 = tpu.matmul %81, %90, %cst_71 {dimension_numbers = #tpu.dot_dimension_numbers<[1], [0], [0], [1], [0, 0, 1, 1], [], []>} : vector<8x128xf32>, vector<128x128xf32>, vector<8x128xf32> -> vector<8x128xf32>
    %cst_72 = arith.constant dense<0xFF800000> : vector<8xf32>
    %92 = vector.multi_reduction <maximumf>, %91, %cst_72 [1] : vector<8x128xf32> to vector<8xf32>
    %93 = vector.shape_cast %92 : vector<8xf32> to vector<8x1xf32>
    %94 = vector.broadcast %93 : vector<8x1xf32> to vector<8x128xf32>
    %95 = arith.subf %91, %94 : vector<8x128xf32>
    %96 = math.exp %95 : vector<8x128xf32>
    %cst_73 = arith.constant dense<0.000000e+00> : vector<8x128xf32>
    %97 = tpu.matmul %96, %70, %cst_73 {dimension_numbers = #tpu.dot_dimension_numbers<[1], [0], [0], [1], [0, 0, 1, 1], [], []>} : vector<8x128xf32>, vector<128x128xf32>, vector<8x128xf32> -> vector<8x128xf32>
    %98 = tpu.reciprocal %97 : vector<8x128xf32> -> vector<8x128xf32>
    %99 = arith.mulf %96, %98 : vector<8x128xf32>
    %100 = tpu.concatenate %87, %87, %87, %87, %87, %87, %87, %87 in 0 : vector<16x128xf32>, vector<16x128xf32>, vector<16x128xf32>, vector<16x128xf32>, vector<16x128xf32>, vector<16x128xf32>, vector<16x128xf32>, vector<16x128xf32> -> vector<128x128xf32>
    %101 = arith.mulf %100, %69 : vector<128x128xf32>
    %cst_74 = arith.constant dense<0.000000e+00> : vector<8x128xf32>
    %102 = tpu.matmul %99, %101, %cst_74 {dimension_numbers = #tpu.dot_dimension_numbers<[1], [0], [0], [1], [0, 0, 1, 1], [], []>} : vector<8x128xf32>, vector<128x128xf32>, vector<8x128xf32> -> vector<8x128xf32>
    %cst_75 = arith.constant dense<0.000000e+00> : vector<8x128xf32>
    %103 = tpu.matmul %102, %77, %cst_75 {dimension_numbers = #tpu.dot_dimension_numbers<[1], [0], [0], [1], [0, 0, 1, 1], [], []>} : vector<8x128xf32>, vector<128x128xf32>, vector<8x128xf32> -> vector<8x128xf32>
    %104 = vector.broadcast %78 : vector<1x128xf32> to vector<8x128xf32>
    %105 = arith.addf %103, %104 : vector<8x128xf32>
    %106 = arith.addf %105, %67 : vector<8x128xf32>
    %c0_76 = arith.constant 0 : index
    %c0_77 = arith.constant 0 : index
    %107 = vector.load %arg28[%c0_76, %c0_77] : memref<1x128xf32, #tpu.memory_space<vmem>>, vector<1x128xf32>
    %c0_78 = arith.constant 0 : index
    %c0_79 = arith.constant 0 : index
    %108 = vector.load %arg29[%c0_78, %c0_79] : memref<1x128xf32, #tpu.memory_space<vmem>>, vector<1x128xf32>
    %cst_80 = arith.constant dense<0.000000e+00> : vector<8xf32>
    %109 = vector.multi_reduction <add>, %106, %cst_80 [1] : vector<8x128xf32> to vector<8xf32>
    %110 = vector.shape_cast %109 : vector<8xf32> to vector<8x1xf32>
    %cst_81 = arith.constant 1.280000e+02 : f32
    %111 = vector.broadcast %cst_81 : f32 to vector<8x1xf32>
    %112 = arith.divf %110, %111 : vector<8x1xf32>
    %113 = vector.broadcast %112 : vector<8x1xf32> to vector<8x128xf32>
    %114 = arith.subf %106, %113 : vector<8x128xf32>
    %115 = arith.mulf %114, %114 : vector<8x128xf32>
    %cst_82 = arith.constant dense<0.000000e+00> : vector<8xf32>
    %116 = vector.multi_reduction <add>, %115, %cst_82 [1] : vector<8x128xf32> to vector<8xf32>
    %117 = vector.shape_cast %116 : vector<8xf32> to vector<8x1xf32>
    %cst_83 = arith.constant 1.280000e+02 : f32
    %118 = vector.broadcast %cst_83 : f32 to vector<8x1xf32>
    %119 = arith.divf %117, %118 : vector<8x1xf32>
    %cst_84 = arith.constant 9.99999974E-6 : f32
    %120 = vector.broadcast %cst_84 : f32 to vector<8x1xf32>
    %121 = arith.addf %119, %120 : vector<8x1xf32>
    %122 = math.rsqrt %121 : vector<8x1xf32>
    %123 = vector.broadcast %122 : vector<8x1xf32> to vector<8x128xf32>
    %124 = arith.mulf %114, %123 : vector<8x128xf32>
    %125 = vector.broadcast %107 : vector<1x128xf32> to vector<8x128xf32>
    %126 = arith.mulf %124, %125 : vector<8x128xf32>
    %127 = vector.broadcast %108 : vector<1x128xf32> to vector<8x128xf32>
    %128 = arith.addf %126, %127 : vector<8x128xf32>
    %c0_85 = arith.constant 0 : index
    %c0_86 = arith.constant 0 : index
    %129 = vector.load %arg30[%c0_85, %c0_86] : memref<128x256xf32, #tpu.memory_space<vmem>>, vector<128x256xf32>
    %cst_87 = arith.constant dense<0.000000e+00> : vector<8x256xf32>
    %130 = tpu.matmul %128, %129, %cst_87 {dimension_numbers = #tpu.dot_dimension_numbers<[1], [0], [0], [1], [0, 0, 1, 1], [], []>} : vector<8x128xf32>, vector<128x256xf32>, vector<8x256xf32> -> vector<8x256xf32>
    %c0_88 = arith.constant 0 : index
    %c0_89 = arith.constant 0 : index
    %131 = vector.load %arg31[%c0_88, %c0_89] : memref<1x256xf32, #tpu.memory_space<vmem>>, vector<1x256xf32>
    %132 = vector.broadcast %131 : vector<1x256xf32> to vector<8x256xf32>
    %133 = arith.addf %130, %132 : vector<8x256xf32>
    %cst_90 = arith.constant 0.000000e+00 : f32
    %134 = vector.broadcast %cst_90 : f32 to vector<8x256xf32>
    %135 = arith.maximumf %133, %134 : vector<8x256xf32>
    %c0_91 = arith.constant 0 : index
    %c0_92 = arith.constant 0 : index
    %136 = vector.load %arg32[%c0_91, %c0_92] : memref<256x128xf32, #tpu.memory_space<vmem>>, vector<256x128xf32>
    %cst_93 = arith.constant dense<0.000000e+00> : vector<8x128xf32>
    %137 = tpu.matmul %135, %136, %cst_93 {dimension_numbers = #tpu.dot_dimension_numbers<[1], [0], [0], [1], [0, 0, 1, 1], [], []>} : vector<8x256xf32>, vector<256x128xf32>, vector<8x128xf32> -> vector<8x128xf32>
    %c0_94 = arith.constant 0 : index
    %c0_95 = arith.constant 0 : index
    %138 = vector.load %arg33[%c0_94, %c0_95] : memref<1x128xf32, #tpu.memory_space<vmem>>, vector<1x128xf32>
    %139 = vector.broadcast %138 : vector<1x128xf32> to vector<8x128xf32>
    %140 = arith.addf %137, %139 : vector<8x128xf32>
    %141 = arith.addf %140, %128 : vector<8x128xf32>
    %c0_96 = arith.constant 0 : index
    %c0_97 = arith.constant 0 : index
    %142 = vector.load %arg34[%c0_96, %c0_97] : memref<1x128xf32, #tpu.memory_space<vmem>>, vector<1x128xf32>
    %c0_98 = arith.constant 0 : index
    %c0_99 = arith.constant 0 : index
    %143 = vector.load %arg35[%c0_98, %c0_99] : memref<1x128xf32, #tpu.memory_space<vmem>>, vector<1x128xf32>
    %cst_100 = arith.constant dense<0.000000e+00> : vector<8xf32>
    %144 = vector.multi_reduction <add>, %141, %cst_100 [1] : vector<8x128xf32> to vector<8xf32>
    %145 = vector.shape_cast %144 : vector<8xf32> to vector<8x1xf32>
    %cst_101 = arith.constant 1.280000e+02 : f32
    %146 = vector.broadcast %cst_101 : f32 to vector<8x1xf32>
    %147 = arith.divf %145, %146 : vector<8x1xf32>
    %148 = vector.broadcast %147 : vector<8x1xf32> to vector<8x128xf32>
    %149 = arith.subf %141, %148 : vector<8x128xf32>
    %150 = arith.mulf %149, %149 : vector<8x128xf32>
    %cst_102 = arith.constant dense<0.000000e+00> : vector<8xf32>
    %151 = vector.multi_reduction <add>, %150, %cst_102 [1] : vector<8x128xf32> to vector<8xf32>
    %152 = vector.shape_cast %151 : vector<8xf32> to vector<8x1xf32>
    %cst_103 = arith.constant 1.280000e+02 : f32
    %153 = vector.broadcast %cst_103 : f32 to vector<8x1xf32>
    %154 = arith.divf %152, %153 : vector<8x1xf32>
    %cst_104 = arith.constant 9.99999974E-6 : f32
    %155 = vector.broadcast %cst_104 : f32 to vector<8x1xf32>
    %156 = arith.addf %154, %155 : vector<8x1xf32>
    %157 = math.rsqrt %156 : vector<8x1xf32>
    %158 = vector.broadcast %157 : vector<8x1xf32> to vector<8x128xf32>
    %159 = arith.mulf %149, %158 : vector<8x128xf32>
    %160 = vector.broadcast %142 : vector<1x128xf32> to vector<8x128xf32>
    %161 = arith.mulf %159, %160 : vector<8x128xf32>
    %162 = vector.broadcast %143 : vector<1x128xf32> to vector<8x128xf32>
    %163 = arith.addf %161, %162 : vector<8x128xf32>
    %c0_105 = arith.constant 0 : index
    %c0_106 = arith.constant 0 : index
    %c0_107 = arith.constant 0 : index
    %164 = vector.load %arg36[%c0_105, %c0_106, %c0_107] : memref<1x8x128xf32, #tpu.memory_space<vmem>>, vector<1x8x128xf32>
    %165 = vector.shape_cast %164 : vector<1x8x128xf32> to vector<8x128xf32>
    %166 = vector.shape_cast %163 : vector<8x128xf32> to vector<1x8x128xf32>
    tpu.vector_store %arg36[%c0_105, %c0_106, %c0_107], %166 {strides = array<i32>} : memref<1x8x128xf32, #tpu.memory_space<vmem>>, vector<1x8x128xf32>,
    return
  }
  func.func @transform_0(%arg0: i32) -> (i32, i32, i32) {
    %c0_i32 = arith.constant 0 : i32
    %c0_i32_0 = arith.constant 0 : i32
    %c0_i32_1 = arith.constant 0 : i32
    return %arg0, %c0_i32, %c0_i32_0 : i32, i32, i32
  }
  func.func @transform_1(%arg0: i32) -> (i32, i32, i32) {
    %c0_i32 = arith.constant 0 : i32
    %c0_i32_0 = arith.constant 0 : i32
    %c0_i32_1 = arith.constant 0 : i32
    return %arg0, %c0_i32, %c0_i32_0 : i32, i32, i32
  }
  func.func @transform_2(%arg0: i32) -> (i32, i32, i32) {
    %c0_i32 = arith.constant 0 : i32
    %c0_i32_0 = arith.constant 0 : i32
    %c0_i32_1 = arith.constant 0 : i32
    return %arg0, %c0_i32, %c0_i32_0 : i32, i32, i32
  }
  func.func @transform_3(%arg0: i32) -> (i32, i32) {
    %c0_i32 = arith.constant 0 : i32
    %c0_i32_0 = arith.constant 0 : i32
    %c0_i32_1 = arith.constant 0 : i32
    return %c0_i32, %c0_i32_0 : i32, i32
  }
  func.func @transform_4(%arg0: i32) -> (i32, i32) {
    %c0_i32 = arith.constant 0 : i32
    %c0_i32_0 = arith.constant 0 : i32
    %c0_i32_1 = arith.constant 0 : i32
    return %c0_i32, %c0_i32_0 : i32, i32
  }
  func.func @transform_5(%arg0: i32) -> (i32, i32) {
    %c0_i32 = arith.constant 0 : i32
    %c0_i32_0 = arith.constant 0 : i32
    %c0_i32_1 = arith.constant 0 : i32
    return %c0_i32, %c0_i32_0 : i32, i32
  }
  func.func @transform_6(%arg0: i32) -> (i32, i32) {
    %c0_i32 = arith.constant 0 : i32
    %c0_i32_0 = arith.constant 0 : i32
    %c0_i32_1 = arith.constant 0 : i32
    return %c0_i32, %c0_i32_0 : i32, i32
  }
  func.func @transform_7(%arg0: i32) -> (i32, i32) {
    %c0_i32 = arith.constant 0 : i32
    %c0_i32_0 = arith.constant 0 : i32
    %c0_i32_1 = arith.constant 0 : i32
    return %c0_i32, %c0_i32_0 : i32, i32
  }
  func.func @transform_8(%arg0: i32) -> (i32, i32) {
    %c0_i32 = arith.constant 0 : i32
    %c0_i32_0 = arith.constant 0 : i32
    %c0_i32_1 = arith.constant 0 : i32
    return %c0_i32, %c0_i32_0 : i32, i32
  }
  func.func @transform_9(%arg0: i32) -> (i32, i32) {
    %c0_i32 = arith.constant 0 : i32
    %c0_i32_0 = arith.constant 0 : i32
    %c0_i32_1 = arith.constant 0 : i32
    return %c0_i32, %c0_i32_0 : i32, i32
  }
  func.func @transform_10(%arg0: i32) -> (i32, i32) {
    %c0_i32 = arith.constant 0 : i32
    %c0_i32_0 = arith.constant 0 : i32
    %c0_i32_1 = arith.constant 0 : i32
    return %c0_i32, %c0_i32_0 : i32, i32
  }
  func.func @transform_11(%arg0: i32) -> (i32, i32) {
    %c0_i32 = arith.constant 0 : i32
    %c0_i32_0 = arith.constant 0 : i32
    %c0_i32_1 = arith.constant 0 : i32
    return %c0_i32, %c0_i32_0 : i32, i32
  }
  func.func @transform_12(%arg0: i32) -> (i32, i32) {
    %c0_i32 = arith.constant 0 : i32
    %c0_i32_0 = arith.constant 0 : i32
    %c0_i32_1 = arith.constant 0 : i32
    return %c0_i32, %c0_i32_0 : i32, i32
  }
  func.func @transform_13(%arg0: i32) -> (i32, i32) {
    %c0_i32 = arith.constant 0 : i32
    %c0_i32_0 = arith.constant 0 : i32
    %c0_i32_1 = arith.constant 0 : i32
    return %c0_i32, %c0_i32_0 : i32, i32
  }
  func.func @transform_14(%arg0: i32) -> (i32, i32) {
    %c0_i32 = arith.constant 0 : i32
    %c0_i32_0 = arith.constant 0 : i32
    %c0_i32_1 = arith.constant 0 : i32
    return %c0_i32, %c0_i32_0 : i32, i32
  }
  func.func @transform_15(%arg0: i32) -> (i32, i32) {
    %c0_i32 = arith.constant 0 : i32
    %c0_i32_0 = arith.constant 0 : i32
    %c0_i32_1 = arith.constant 0 : i32
    return %c0_i32, %c0_i32_0 : i32, i32
  }
  func.func @transform_16(%arg0: i32) -> (i32, i32) {
    %c0_i32 = arith.constant 0 : i32
    %c0_i32_0 = arith.constant 0 : i32
    %c0_i32_1 = arith.constant 0 : i32
    return %c0_i32, %c0_i32_0 : i32, i32
  }
  func.func @transform_17(%arg0: i32) -> (i32, i32) {
    %c0_i32 = arith.constant 0 : i32
    %c0_i32_0 = arith.constant 0 : i32
    %c0_i32_1 = arith.constant 0 : i32
    return %c0_i32, %c0_i32_0 : i32, i32
  }
  func.func @transform_18(%arg0: i32) -> (i32, i32) {
    %c0_i32 = arith.constant 0 : i32
    %c0_i32_0 = arith.constant 0 : i32
    %c0_i32_1 = arith.constant 0 : i32
    return %c0_i32, %c0_i32_0 : i32, i32
  }
  func.func @transform_19(%arg0: i32) -> (i32, i32) {
    %c0_i32 = arith.constant 0 : i32
    %c0_i32_0 = arith.constant 0 : i32
    %c0_i32_1 = arith.constant 0 : i32
    return %c0_i32, %c0_i32_0 : i32, i32
  }
  func.func @transform_20(%arg0: i32) -> (i32, i32) {
    %c0_i32 = arith.constant 0 : i32
    %c0_i32_0 = arith.constant 0 : i32
    %c0_i32_1 = arith.constant 0 : i32
    return %c0_i32, %c0_i32_0 : i32, i32
  }
  func.func @transform_21(%arg0: i32) -> (i32, i32) {
    %c0_i32 = arith.constant 0 : i32
    %c0_i32_0 = arith.constant 0 : i32
    %c0_i32_1 = arith.constant 0 : i32
    return %c0_i32, %c0_i32_0 : i32, i32
  }
  func.func @transform_22(%arg0: i32) -> (i32, i32) {
    %c0_i32 = arith.constant 0 : i32
    %c0_i32_0 = arith.constant 0 : i32
    %c0_i32_1 = arith.constant 0 : i32
    return %c0_i32, %c0_i32_0 : i32, i32
  }
  func.func @transform_23(%arg0: i32) -> (i32, i32) {
    %c0_i32 = arith.constant 0 : i32
    %c0_i32_0 = arith.constant 0 : i32
    %c0_i32_1 = arith.constant 0 : i32
    return %c0_i32, %c0_i32_0 : i32, i32
  }
  func.func @transform_24(%arg0: i32) -> (i32, i32) {
    %c0_i32 = arith.constant 0 : i32
    %c0_i32_0 = arith.constant 0 : i32
    %c0_i32_1 = arith.constant 0 : i32
    return %c0_i32, %c0_i32_0 : i32, i32
  }
  func.func @transform_25(%arg0: i32) -> (i32, i32) {
    %c0_i32 = arith.constant 0 : i32
    %c0_i32_0 = arith.constant 0 : i32
    %c0_i32_1 = arith.constant 0 : i32
    return %c0_i32, %c0_i32_0 : i32, i32
  }
  func.func @transform_26(%arg0: i32) -> (i32, i32) {
    %c0_i32 = arith.constant 0 : i32
    %c0_i32_0 = arith.constant 0 : i32
    %c0_i32_1 = arith.constant 0 : i32
    return %c0_i32, %c0_i32_0 : i32, i32
  }
  func.func @transform_27(%arg0: i32) -> (i32, i32) {
    %c0_i32 = arith.constant 0 : i32
    %c0_i32_0 = arith.constant 0 : i32
    %c0_i32_1 = arith.constant 0 : i32
    return %c0_i32, %c0_i32_0 : i32, i32
  }
  func.func @transform_28(%arg0: i32) -> (i32, i32) {
    %c0_i32 = arith.constant 0 : i32
    %c0_i32_0 = arith.constant 0 : i32
    %c0_i32_1 = arith.constant 0 : i32
    return %c0_i32, %c0_i32_0 : i32, i32
  }
  func.func @transform_29(%arg0: i32) -> (i32, i32) {
    %c0_i32 = arith.constant 0 : i32
    %c0_i32_0 = arith.constant 0 : i32
    %c0_i32_1 = arith.constant 0 : i32
    return %c0_i32, %c0_i32_0 : i32, i32
  }
  func.func @transform_30(%arg0: i32) -> (i32, i32) {
    %c0_i32 = arith.constant 0 : i32
    %c0_i32_0 = arith.constant 0 : i32
    %c0_i32_1 = arith.constant 0 : i32
    return %c0_i32, %c0_i32_0 : i32, i32
  }
  func.func @transform_31(%arg0: i32) -> (i32, i32) {
    %c0_i32 = arith.constant 0 : i32
    %c0_i32_0 = arith.constant 0 : i32
    %c0_i32_1 = arith.constant 0 : i32
    return %c0_i32, %c0_i32_0 : i32, i32
  }
  func.func @transform_32(%arg0: i32) -> (i32, i32) {
    %c0_i32 = arith.constant 0 : i32
    %c0_i32_0 = arith.constant 0 : i32
    %c0_i32_1 = arith.constant 0 : i32
    return %c0_i32, %c0_i32_0 : i32, i32
  }
  func.func @transform_33(%arg0: i32) -> (i32, i32) {
    %c0_i32 = arith.constant 0 : i32
    %c0_i32_0 = arith.constant 0 : i32
    %c0_i32_1 = arith.constant 0 : i32
    return %c0_i32, %c0_i32_0 : i32, i32
  }
  func.func @transform_34(%arg0: i32) -> (i32, i32) {
    %c0_i32 = arith.constant 0 : i32
    %c0_i32_0 = arith.constant 0 : i32
    %c0_i32_1 = arith.constant 0 : i32
    return %c0_i32, %c0_i32_0 : i32, i32
  }
  func.func @transform_35(%arg0: i32) -> (i32, i32, i32) {
    %c0_i32 = arith.constant 0 : i32
    %c0_i32_0 = arith.constant 0 : i32
    %c0_i32_1 = arith.constant 0 : i32
    return %arg0, %c0_i32, %c0_i32_0 : i32, i32, i32
  }
}

</mosaic_0001>

<bundles_post_ra>
// kernel: tile.9
= control target key start
LH: loop header
LB: loop body
LE: loop exit
PB: predicated region body
PF: predicated region fallthrough
CT: control target
= control target key end

     0   :  { %vm4_vm0 = vcmask 1047556   ;;  %s209_s14 = smov 48   ;;  %s210_s19 = smov 56   ;;  %vm6_vm1 = vcmask 64512   ;;  %vm25_vm2 = vcmask 523712   ;;  %vm46_vm3 = vcmask 458112   ;;  %s388_s0 = inlined_call_operand.vmem [shape: f32[2,8,8,8], index: 0, kind: input, shape index: {}]   ;;  %s389_s1 = inlined_call_operand.vmem [shape: f32[2,8,64], index: 1, kind: output, shape index: {}]  }
   0x1   :  { %v172_v0 = vld [vmem:[%s388_s0 + $0x6] ss:$8 sm:$0xf]   ;;  %v167_v3 = vld [vmem:[%s388_s0 + $0x7] ss:$8 sm:$0xf]  }
   0x2   :  { %v173_v1 = vld [vmem:[%s388_s0 + $0x6] ss:$8 sm:$0xf0]   ;;  %v168_v4 = vld [vmem:[%s388_s0 + $0x7] ss:$8 sm:$0xf0]  }
   0x3   :  { %v43_v2 = vsel %vm4_vm0, %v173_v1, %v172_v0  ;;  %v22_v5 = vsel %vm4_vm0, %v168_v4, %v167_v3  ;;  %v174_v6 = vld [vmem:[%s388_s0 + $0x46] ss:$8 sm:$0xf]   ;;  %v169_v9 = vld [vmem:[%s388_s0 + $0x47] ss:$8 sm:$0xf]  }
   0x4   :  { %44 = vrot.lane.b32.xlu1 %v43_v2, %s209_s14  ;;  %v175_v7 = vld [vmem:[%s388_s0 + $0x46] ss:$8 sm:$0xf0]   ;;  %23 = vrot.lane.b32.xlu0 %v22_v5, %s210_s19  ;;  %v170_v10 = vld [vmem:[%s388_s0 + $0x47] ss:$8 sm:$0xf0]  }
   0x5   :  { %v53_v8 = vsel %vm4_vm0, %v175_v7, %v174_v6  ;;  %v32_v11 = vsel %vm4_vm0, %v170_v10, %v169_v9  ;;  %v179_v12 = vld [vmem:[%s388_s0 + $0x45] ss:$8 sm:$0xf]   ;;  %v184_v18 = vld [vmem:[%s388_s0 + $0x44] ss:$8 sm:$0xf]  }
   0x6   :  { %v180_v13 = vld [vmem:[%s388_s0 + $0x45] ss:$8 sm:$0xf0]   ;;  %v185_v19 = vld [vmem:[%s388_s0 + $0x44] ss:$8 sm:$0xf0]  }
   0x7   :  { %v177_v14 = vld [vmem:[%s388_s0 + $0x5] ss:$8 sm:$0xf]   ;;  %v74_v16 = vsel %vm4_vm0, %v180_v13, %v179_v12  ;;  %v182_v20 = vld [vmem:[%s388_s0 + $0x4] ss:$8 sm:$0xf]   ;;  %v95_v22 = vsel %vm4_vm0, %v185_v19, %v184_v18 }
   0x8   :  { %54 = vrot.lane.b32.xlu1 %v53_v8, %s209_s14  ;;  %v178_v15 = vld [vmem:[%s388_s0 + $0x5] ss:$8 sm:$0xf0]   ;;  %33 = vrot.lane.b32.xlu0 %v32_v11, %s210_s19  ;;  %v183_v21 = vld [vmem:[%s388_s0 + $0x4] ss:$8 sm:$0xf0]  }
   0x9   :  { %v64_v17 = vsel %vm4_vm0, %v178_v15, %v177_v14  ;;  %s211_s11 = smov 40   ;;  %v85_v23 = vsel %vm4_vm0, %v183_v21, %v182_v20  ;;  %v189_v24 = vld [vmem:[%s388_s0 + $0x43] ss:$8 sm:$0xf]   ;;  %s212_s20 = smov 32   ;;  %vm67_vm4 = vcmask 392512  }
   0xa   :  { %v190_v25 = vld [vmem:[%s388_s0 + $0x43] ss:$8 sm:$0xf0]   ;;  %v194_v28 = vld [vmem:[%s388_s0 + $0x42] ss:$8 sm:$0xf]  }
   0xb   :  { %v187_v26 = vld [vmem:[%s388_s0 + $0x3] ss:$8 sm:$0xf]   ;;  %v195_v29 = vld [vmem:[%s388_s0 + $0x42] ss:$8 sm:$0xf0]   ;;  %v116_v30 = vsel %vm4_vm0, %v190_v25, %v189_v24 }
   0xc   :  { %75 = vrot.lane.b32.xlu1 %v74_v16, %s211_s11  ;;  %65 = vrot.lane.b32.xlu0 %v64_v17, %s211_s11  ;;  %v188_v27 = vld [vmem:[%s388_s0 + $0x3] ss:$8 sm:$0xf0]   ;;  %v192_v31 = vld [vmem:[%s388_s0 + $0x2] ss:$8 sm:$0xf]   ;;  %v137_v40 = vsel %vm4_vm0, %v195_v29, %v194_v28 }
   0xd   :  { %v2_v32 = vld [vmem:[%s388_s0] ss:$8 sm:$0xf]   ;;  %v106_v33 = vsel %vm4_vm0, %v188_v27, %v187_v26  ;;  %v193_v36 = vld [vmem:[%s388_s0 + $0x2] ss:$8 sm:$0xf0]  }
   0xe   :  { %v3_v34 = vld [vmem:[%s388_s0] ss:$8 sm:$0xf0]   ;;  %s213_s8 = smov 24   ;;  %v127_v41 = vsel %vm4_vm0, %v193_v36, %v192_v31  ;;  %s215_s21 = smov 8   ;;  %vm88_vm5 = vcmask 326912  }
   0xf   :  { %v164_v35 = vld [vmem:[%s388_s0 + $0x40] ss:$8 sm:$0xf]   ;;  %v5_v37 = vsel %vm4_vm0, %v3_v34, %v2_v32  ;;  %v199_v42 = vld [vmem:[%s388_s0 + $0x41] ss:$8 sm:$0xf]  }
  0x10   :  { %96 = vrot.lane.b32.xlu1 %v95_v22, %s212_s20  ;;  %86 = vrot.lane.b32.xlu0 %v85_v23, %s212_s20  ;;  %v165_v38 = vld [vmem:[%s388_s0 + $0x40] ss:$8 sm:$0xf0]   ;;  %7 = vst.msk [vmem:[%s389_s1] sm:$0xff] %vm6_vm1, %v5_v37   ;;  %vm109_vm6 = vcmask 261312   ;;  %vm130_vm7 = vcmask 195712  }
  0x11   :  { %v13_v39 = vsel %vm4_vm0, %v165_v38, %v164_v35  ;;  %v200_v43 = vld [vmem:[%s388_s0 + $0x41] ss:$8 sm:$0xf0]   ;;  %vm151_vm8 = vcmask 130112  }
  0x12   :  { %166 = vst.msk [vmem:[%s389_s1 + $0x8] sm:$0xff] %vm6_vm1, %v13_v39   ;;  %v197_v44 = vld [vmem:[%s388_s0 + $0x1] ss:$8 sm:$0xf]   ;;  %v158_v46 = vsel %vm4_vm0, %v200_v43, %v199_v42 }
  0x13   :  { %v198_v45 = vld [vmem:[%s388_s0 + $0x1] ss:$8 sm:$0xf0]   ;;  %s214_s0 = smov 16  }
  0x14   :  { %117 = vrot.lane.b32.xlu1 %v116_v30, %s213_s8  ;;  %107 = vrot.lane.b32.xlu0 %v106_v33, %s213_s8  ;;  %v148_v47 = vsel %vm4_vm0, %v198_v45, %v197_v44 }
  0x18   :  { %138 = vrot.lane.b32.xlu1 %v137_v40, %s214_s0  ;;  %128 = vrot.lane.b32.xlu0 %v127_v41, %s214_s0 }
  0x1c   :  { %159 = vrot.lane.b32.xlu1 %v158_v46, %s215_s21  ;;  %149 = vrot.lane.b32.xlu0 %v148_v47, %s215_s21 }
  0x76   :  { %v45_v48 = vpop.permute.xlu1 %44   ;;  %v24_v49 = vpop.permute.xlu0 %23  }
  0x77   :  { %26 = vst.msk [vmem:[%s389_s1] sm:$0xff] %vm25_vm2, %v24_v49  }
  0x78   :  { %47 = vst.msk [vmem:[%s389_s1] sm:$0xff] %vm46_vm3, %v45_v48  }
  0x7a   :  { %v55_v50 = vpop.permute.xlu1 %54   ;;  %v34_v51 = vpop.permute.xlu0 %33  }
  0x7b   :  { %171 = vst.msk [vmem:[%s389_s1 + $0x8] sm:$0xff] %vm25_vm2, %v34_v51  }
  0x7c   :  { %176 = vst.msk [vmem:[%s389_s1 + $0x8] sm:$0xff] %vm46_vm3, %v55_v50  }
  0x7e   :  { %v76_v52 = vpop.permute.xlu1 %75   ;;  %v66_v53 = vpop.permute.xlu0 %65  }
  0x7f   :  { %181 = vst.msk [vmem:[%s389_s1 + $0x8] sm:$0xff] %vm67_vm4, %v76_v52   ;;  %68 = vst.msk [vmem:[%s389_s1] sm:$0xff] %vm67_vm4, %v66_v53  }
  0x82   :  { %v97_v54 = vpop.permute.xlu1 %96   ;;  %v87_v55 = vpop.permute.xlu0 %86  }
  0x83   :  { %186 = vst.msk [vmem:[%s389_s1 + $0x8] sm:$0xff] %vm88_vm5, %v97_v54   ;;  %89 = vst.msk [vmem:[%s389_s1] sm:$0xff] %vm88_vm5, %v87_v55  }
  0x86   :  { %v118_v56 = vpop.permute.xlu1 %117   ;;  %v108_v57 = vpop.permute.xlu0 %107  }
  0x87   :  { %191 = vst.msk [vmem:[%s389_s1 + $0x8] sm:$0xff] %vm109_vm6, %v118_v56   ;;  %110 = vst.msk [vmem:[%s389_s1] sm:$0xff] %vm109_vm6, %v108_v57  }
  0x8a   :  { %v139_v58 = vpop.permute.xlu1 %138   ;;  %v129_v59 = vpop.permute.xlu0 %128  }
  0x8b   :  { %196 = vst.msk [vmem:[%s389_s1 + $0x8] sm:$0xff] %vm130_vm7, %v139_v58   ;;  %131 = vst.msk [vmem:[%s389_s1] sm:$0xff] %vm130_vm7, %v129_v59  }
  0x8e   :  { %v160_v60 = vpop.permute.xlu1 %159   ;;  %v150_v61 = vpop.permute.xlu0 %149  }
  0x8f   :  { %201 = vst.msk [vmem:[%s389_s1 + $0x8] sm:$0xff] %vm151_vm8, %v160_v60   ;;  %152 = vst.msk [vmem:[%s389_s1] sm:$0xff] %vm151_vm8, %v150_v61  }

// kernel: transformer_decoder_forward.5
= control target key start
LH: loop header
LB: loop body
LE: loop exit
PB: predicated region body
PF: predicated region fallthrough
CT: control target
= control target key end

     0   :  { %8 = vsyncpa [#allocation3], 0  ;;  %s703_s0 = inlined_call_operand.vmem [shape: f32[2,8,128], index: 0, kind: input, shape index: {}]   ;;  %s704_s1 = inlined_call_operand.vmem [shape: f32[128,10], index: 1, kind: input, shape index: {}]   ;;  %s705_s2 = inlined_call_operand.vmem [shape: f32[1,10], index: 2, kind: input, shape index: {}]   ;;  %s706_s3 = inlined_call_operand.hbm [shape: f32[2,8,10], index: 3, kind: output, shape index: {}]  }
   0x1   :  { %10 = vsyncpa [#allocation3 + $0x1], 0  ;;  %s552_s12 = smov 0   ;;  %s554_s13 = smov 0  }
   0x2   :  { %s556_s14 = smov 0   ;;  %s558_s15 = smov 0  }
   0x3 LB: > { %s573_s16 = sadd.s32 4294967295, %s526_s15   ;;  %s335_s17 = sadd.s32 4294967294, %s526_s15   ;;  %s526_s15 = sphi %s558_s15, %s712_s15   ;;  %s522_s14 = sphi %s556_s14, %s711_s14   ;;  %s518_s13 = sphi %s554_s13, %s710_s13   ;;  %s514_s12 = sphi %s552_s12, %s709_s12  }
   0x4   : > { %s577_s18 = sadd.s32 1, %s526_s15   ;;  %s91_s19 = sadd.s32 1, %s522_s14 }
   0x5   : > { %s88_s20 = ssub.s32 %s526_s15, %s577_s18  ;;  %p101_p0 = scmp.ne.s32.totalorder %s522_s14, %s518_s13 }
   0x6   : > { %p89_p1 = scmp.eq.s32.totalorder %s88_s20, 0  ;;  %p102_p2 = scmp.eq.s32.totalorder %s573_s16, 1 }
   0x7   : > { %p107_p3 = scmp.ne.s32.totalorder %s518_s13, %s514_s12  ;;  %p108_p4 = scmp.eq.s32.totalorder %s335_s17, 1 }
   0x8   : > { %s588_s21 = scalar_select %p89_p1, %s522_s14, %s91_s19  }
   0x9   : > { %p590_p5 = por %p102_p2, %p101_p0  ;;  %p594_p6 = por %p108_p4, %p107_p3 }
   0xa   : > { %p338_p7 = scmp.ge.s32.totalorder %s526_s15, 1  ;;  %p139_p8 = scmp.lt.s32.totalorder %s526_s15, 3 }
   0xc   : > { %p140_p9 = pnand %p338_p7, %p139_p8 }
   0xd   : > { %v167_v0 = vld [vmem:[%s704_s1] sm:$0xff] (!%p140_p9)  ;;  %v168_v1 = vld [vmem:[%s704_s1 + $0x8] sm:$0xff] (!%p140_p9)  ;;  %v169_v2 = vld [vmem:[%s704_s1 + $0x10] sm:$0xff] (!%p140_p9)  ;;  %v528_v3 = vmov (!%p140_p9), 0.0|0.0   ;;  %vm529_vm0 = vmmov (!%p140_p9), 0   ;;  %v530_v6 = vmov (!%p140_p9), 0.0  }
   0xe   : > { %143 = sbr.rel (%p140_p9) target bundleno = 275 (0x113), region = 32  ;;  %398 = vmatprep.subr.bf16.mxu0 (!%p140_p9), %v528_v3  ;;  %v399_v4 = vpack.c.bf16 (!%p140_p9), %v168_v1, %v167_v0  ;;  %v170_v5 = vld [vmem:[%s704_s1 + $0x18] sm:$0xff] (!%p140_p9)  ;;  %395 = vmatprep.mubr.msk.f32.mxu0 (!%p140_p9), %vm529_vm0, %v530_v6  ;;  %v171_v8 = vld [vmem:[%s704_s1 + $0x20] sm:$0xff] (!%p140_p9)  ;;  %v172_v9 = vld [vmem:[%s704_s1 + $0x28] sm:$0xff] (!%p140_p9)  ;;  %p162_p10 = scmp.lt.s32.totalorder (!%p140_p9), %s573_s16, 1  ;;  %vm260_vm1 = vcmask (!%p140_p9), 80896  }
   0xf   : > { %v402_v7 = vpack.c.bf16 (!%p140_p9), %v170_v5, %v169_v2  ;;  %v405_v10 = vpack.c.bf16 (!%p140_p9), %v172_v9, %v171_v8  ;;  %v173_v11 = vld [vmem:[%s704_s1 + $0x30] sm:$0xff] (!%p140_p9)  ;;  %v174_v12 = vld [vmem:[%s704_s1 + $0x38] sm:$0xff] (!%p140_p9)  ;;  %v175_v14 = vld [vmem:[%s704_s1 + $0x40] sm:$0xff] (!%p140_p9)  ;;  %s159_s25 = sand.u32 (!%p140_p9), 1, %s518_s13   ;;  %s343_s29 = sshll.u32 (!%p140_p9), %s573_s16, 7 }
  0x10   : > { %400 = vmatpush3.bf16.msra.mxu0 (!%p140_p9), %v399_v4  ;;  %v408_v13 = vpack.c.bf16 (!%p140_p9), %v174_v12, %v173_v11  ;;  %v176_v15 = vld [vmem:[%s704_s1 + $0x48] sm:$0xff] (!%p140_p9)  ;;  %v177_v17 = vld [vmem:[%s704_s1 + $0x50] sm:$0xff] (!%p140_p9)  ;;  %v178_v18 = vld [vmem:[%s704_s1 + $0x58] sm:$0xff] (!%p140_p9)  ;;  %s339_s26 = sshll.u32 (!%p140_p9), %s159_s25, 3  ;;  %s263_s8 = scalar_lea.sflag (!%p140_p9), [#allocation3], %s159_s25 }
  0x11   : > { %401 = vmatprep.subr.bf16.mxu0 (!%p140_p9), %v528_v3  ;;  %v411_v16 = vpack.c.bf16 (!%p140_p9), %v176_v15, %v175_v14  ;;  %v414_v19 = vpack.c.bf16 (!%p140_p9), %v178_v18, %v177_v17  ;;  %v179_v20 = vld [vmem:[%s704_s1 + $0x60] sm:$0xff] (!%p140_p9)  ;;  %v180_v21 = vld [vmem:[%s704_s1 + $0x68] sm:$0xff] (!%p140_p9)  ;;  %v181_v23 = vld [vmem:[%s704_s1 + $0x70] sm:$0xff] (!%p140_p9)  ;;  %s161_s30 = scalar_lea.vmem (!%p140_p9), [#allocation2], %s339_s26 }
  0x12   : > { %v417_v22 = vpack.c.bf16 (!%p140_p9), %v180_v21, %v179_v20  ;;  %v182_v24 = vld [vmem:[%s704_s1 + $0x78] sm:$0xff] (!%p140_p9)  ;;  %v341_v27 = vld [vmem:[%s705_s2] ss:$0 sm:$0xff] (!%p140_p9)  ;;  %s276_s4 = sshll.u32 (!%p140_p9), %s161_s30, 4  ;;  %s663_s4 = int_to_ptr.vmem [resolvable:$true] %s276_s4 }
  0x13   : > { %v420_v25 = vpack.c.bf16 (!%p140_p9), %v182_v24, %v181_v23  ;;  %s464_s9 = scalar_lea.vmem (!%p140_p9), %s663_s4, 128 }
  0x14   : > { %403 = vmatpush3.bf16.msra.mxu0 (!%p140_p9), %v402_v7  ;;  %p465_p11 = scmp.ne.s32.totalorder (!%p140_p9), %s663_s4, %s464_s9 }
  0x15   : > { %404 = vmatprep.subr.bf16.mxu0 %v528_v3  ;;  %s163_s7 = scalar_select %p162_p10, %s573_s16, 1 }
  0x16   : > { %p466_p12 = pnand %p465_p11, %p590_p5  ;;  %s531_s16 = smov [#allocation2]  }
  0x17   : > { %s340_s17 = sshll.u32 %s163_s7, 3  ;;  %s661_s7 = scalar_lea.hbm %s706_s3, %s343_s29 }
  0x18   : > { %406 = vmatpush3.bf16.msra.mxu0 %v405_v10  ;;  %s165_s24 = scalar_lea.vmem %s703_s0, %s340_s17  ;;  %p467_p13 = pneg %p466_p12 }
  0x19   : > { %407 = vmatprep.subr.bf16.mxu0 %v528_v3  ;;  %v166_v26 = vld [vmem:[%s165_s24] sm:$0xff]  ;;  %s468_s10 = sshll.u32 %s531_s16, 4  ;;  %s469_s10 = int_to_ptr.vmem [resolvable:$false] %s468_s10 }
  0x1a   : > { %s470_s11 = scalar_lea.vmem %s469_s10, 256  ;;  %p471_p0 = scmp.lt.s32.totalorder %s663_s4, %s469_s10 }
  0x1b   : > { %p472_p1 = scmp.lt.s32.totalorder %s470_s11, %s464_s9 }
  0x1c   : > { %409 = vmatpush3.bf16.msra.mxu0 %v408_v13 }
  0x1d   : > { %410 = vmatprep.subr.bf16.mxu0 %v528_v3  ;;  %p473_p2 = por %p472_p1, %p471_p0 }
  0x1f   : > { %p474_p3 = pnand %p473_p2, %p467_p13 }
  0x20   : > { %412 = vmatpush3.bf16.msra.mxu0 %v411_v16 }
  0x21   : > { %413 = vmatprep.subr.bf16.mxu0 %v528_v3 }
  0x24   : > { %415 = vmatpush3.bf16.msra.mxu0 %v414_v19 }
  0x25   : > { %416 = vmatprep.subr.bf16.mxu0 %v528_v3 }
  0x28   : > { %418 = vmatpush3.bf16.msra.mxu0 %v417_v22 }
  0x29   : > { %419 = vmatprep.subr.bf16.mxu0 %v528_v3 }
  0x2c   : > { %421 = vmatpush3.bf16.msra.mxu0 %v420_v25 }
  0x2f   : > { %396 = vmatmul.mubr.f32.vlgmr.msra.gmra.mrb[0].mxu0 %v166_v26 }
 0x102   : > { %v256_v28 = vpop.f32.mrb[0].mxu0 }
 0x103   : > { %v257_v29 = vadd.f32 %v341_v27, %v256_v28  ;;  %v397_v30 = vpop.f32.mrb[1].mxu0 }
 0x105   : > { %261 = vst.msk [vmem:[%s161_s30] sm:$0xff] %vm260_vm1, %v257_v29 }
 0x106   : > { %477 = shalt.err (!%p474_p3)
}
 0x107   : > { %s478_s17 = scalar_lea.hbm %s661_s7, 128  ;;  %s482_s24 = scalar_lea.hbm %s706_s3, 256 }
 0x108   : > { %p479_p4 = scmp.ne.s32.totalorder %s661_s7, %s478_s17  ;;  %p483_p9 = scmp.lt.u32.totalorder %s661_s7, %s706_s3 }
 0x109   : > { %p484_p10 = scmp.lt.u32.totalorder %s482_s24, %s478_s17  ;;  %p486_p12 = scmp.lt.u32.totalorder %s478_s17, %s661_s7 }
 0x10a   : > { %p480_p7 = pnand %p479_p4, %p590_p5 }
 0x10b   : > { %p485_p11 = por %p484_p10, %p483_p9 }
 0x10c   : > { %p481_p8 = pneg %p480_p7 }
 0x10d   : > { %p487_p13 = por %p486_p12, %p485_p11 }
 0x10f   : > { %p488_p0 = pnand %p487_p13, %p481_p8 }
 0x111   : > { %491 = shalt.err (!%p488_p0)
}
 0x112   : > { %422 = dma.vmem_to_hbm [thread:$0]  (%p590_p5), %s663_s4, 128, %s661_s7, %s263_s8  }
 0x113 PF: > { %p428_p1 = scmp.ge.s32.totalorder %s526_s15, 2  ;;  %s288_s27 = sand.u32 1, %s514_s12  }
 0x114   : > { %s289_s28 = scalar_lea.sflag [#allocation3], %s288_s27 }
 0x115   : > { %p425_p2 = pnand %p428_p1, %p594_p6 }
 0x117   : > { %509 = dma.done.wait (!%p425_p2), %s289_s28, 128  }
 0x118   : > { %511 = vsyncadd (!%p425_p2), %s289_s28, 4294967168  ;;  %p13_p3 = scmp.ge.s32.totalorder %s577_s18, 4   ;;  %s709_s12 = smov %s518_s13 }
 0x119   : > { %s710_s13 = smov %s522_s14  ;;  %s711_s14 = smov %s588_s21 }
 0x11a   : > { %s712_s15 = smov %s577_s18  ;;  %15 = sbr.rel (!%p13_p3) target bundleno = 3 (0x3), region = 67 }
 0x121   :  { %294 = vsyncpa [#allocation3], 1 }
 0x122   :  { %296 = vsyncpa [#allocation3 + $0x1], 1 }

// kernel: transformer_decoder_forward.3
= control target key start
LH: loop header
LB: loop body
LE: loop exit
PB: predicated region body
PF: predicated region fallthrough
CT: control target
= control target key end

     0   :  { %s4998_s6 = smov 1   ;;  %s4999_s10 = smov 2   ;;  %s6602_s0 = inlined_call_operand.smem [shape: u32[36], index: -1, kind: input, shape index: {}] }
   0x1   :  { %s5055_s5 = sld [smem:[%s6602_s0]]   ;;  %s5000_s14 = smov 3  }
   0x2   :  { %s5060_s9 = sld [smem:[%s6602_s0 + %s4998_s6]]   ;;  %s5001_s18 = smov 4  }
   0x3   :  { %s5065_s13 = sld [smem:[%s6602_s0 + %s4999_s10]]   ;;  %s5002_s22 = smov 5  }
   0x4   :  { %s5070_s17 = sld [smem:[%s6602_s0 + %s5000_s14]]   ;;  %s5003_s26 = smov 6  }
   0x5   :  { %s5075_s21 = sld [smem:[%s6602_s0 + %s5001_s18]]   ;;  %s5004_s30 = smov 7  }
   0x6   :  { %s5080_s25 = sld [smem:[%s6602_s0 + %s5002_s22]]   ;;  %s5005_s4 = smov 8  }
   0x7   :  { %s5085_s29 = sld [smem:[%s6602_s0 + %s5003_s26]]   ;;  %s5006_s10 = smov 9  }
   0x8   :  { %6610 = sst [smem:[#allocation2_spill]] %s5060_s9  ;;  %s5007_s15 = smov 10  }
   0x9   :  { %s5090_s3 = sld [smem:[%s6602_s0 + %s5004_s30]]   ;;  %s5008_s20 = smov 11  }
   0xa   :  { %s5095_s8 = sld [smem:[%s6602_s0 + %s5005_s4]]   ;;  %s5009_s26 = smov 12  }
   0xb   :  { %s5100_s14 = sld [smem:[%s6602_s0 + %s5006_s10]]   ;;  %s5010_s1 = smov 13  }
   0xc   :  { %s5105_s19 = sld [smem:[%s6602_s0 + %s5007_s15]]   ;;  %s5011_s7 = smov 14  }
   0xd   :  { %6611 = sst [smem:[#allocation3_spill]] %s5085_s29  ;;  %s5012_s15 = smov 15  }
   0xe   :  { %s5110_s24 = sld [smem:[%s6602_s0 + %s5008_s20]]   ;;  %s5013_s22 = smov 16  }
   0xf   :  { %6612 = sst [smem:[#allocation4_spill]] %s5090_s3  ;;  %s5014_s28 = smov 17  }
  0x10   :  { %6613 = sst [smem:[#allocation5_spill]] %s5095_s8 }
  0x11   :  { %s5115_s30 = sld [smem:[%s6602_s0 + %s5009_s26]]  }
  0x12   :  { %s5120_s6 = sld [smem:[%s6602_s0 + %s5010_s1]]  }
  0x13   :  { %s5125_s12 = sld [smem:[%s6602_s0 + %s5011_s7]]   ;;  %s5015_s7 = smov 18  }
  0x14   :  { %s5130_s20 = sld [smem:[%s6602_s0 + %s5012_s15]]   ;;  %s5016_s15 = smov 19  }
  0x15   :  { %s5135_s27 = sld [smem:[%s6602_s0 + %s5013_s22]]   ;;  %s5017_s22 = smov 20  }
  0x16   :  { %s5140_s4 = sld [smem:[%s6602_s0 + %s5014_s28]]   ;;  %s5018_s28 = smov 21  }
  0x17   :  { %s5145_s3 = sld [smem:[%s6602_s0 + %s5015_s7]]   ;;  %s5019_s7 = smov 22  }
  0x18   :  { %s5150_s8 = sld [smem:[%s6602_s0 + %s5016_s15]]   ;;  %s5020_s15 = smov 23  }
  0x19   :  { %s5155_s29 = sld [smem:[%s6602_s0 + %s5017_s22]]   ;;  %s5021_s22 = smov 24  }
  0x1b   :  { %6614 = sst [smem:[#allocation6_spill]] %s5135_s27 }
  0x1c   :  { %6615 = sst [smem:[#allocation7_spill]] %s5140_s4 }
  0x1d   :  { %6616 = sst [smem:[#allocation8_spill]] %s5145_s3 }
  0x1e   :  { %s5160_s4 = sld [smem:[%s6602_s0 + %s5018_s28]]   ;;  %s5022_s28 = smov 25  }
  0x1f   :  { %6617 = sst [smem:[#allocation9_spill]] %s5155_s29 }
  0x20   :  { %s5165_s3 = sld [smem:[%s6602_s0 + %s5019_s7]]   ;;  %s5023_s7 = smov 26  }
  0x21   :  { %s5170_s27 = sld [smem:[%s6602_s0 + %s5020_s15]]   ;;  %s5024_s15 = smov 27  }
  0x22   :  { %s5175_s29 = sld [smem:[%s6602_s0 + %s5021_s22]]   ;;  %s5025_s22 = smov 28  }
  0x23   :  { %s5180_s9 = sld [smem:[%s6602_s0 + %s5022_s28]]   ;;  %s5026_s28 = smov 29  }
  0x26   :  { %6618 = sst [smem:[#allocation10_spill]] %s5165_s3 }
  0x27   :  { %6619 = sst [smem:[#allocation11_spill]] %s5170_s27 }
  0x28   :  { %6620 = sst [smem:[#allocation12_spill]] %s5175_s29 }
  0x29   :  { %6621 = sst [smem:[#allocation13_spill]] %s5180_s9 }
  0x2a   :  { %s5185_s3 = sld [smem:[%s6602_s0 + %s5023_s7]]   ;;  %s5027_s7 = smov 30  }
  0x2b   :  { %s5190_s27 = sld [smem:[%s6602_s0 + %s5024_s15]]   ;;  %s5028_s15 = smov 31  }
  0x2c   :  { %s5195_s29 = sld [smem:[%s6602_s0 + %s5025_s22]]   ;;  %s5029_s22 = smov 32  }
  0x2d   :  { %s5200_s9 = sld [smem:[%s6602_s0 + %s5026_s28]]   ;;  %s5030_s28 = smov 33  }
  0x30   :  { %6622 = sst [smem:[#allocation14_spill]] %s5185_s3 }
  0x31   :  { %6623 = sst [smem:[#allocation15_spill]] %s5190_s27 }
  0x32   :  { %6624 = sst [smem:[#allocation16_spill]] %s5195_s29 }
  0x33   :  { %6625 = sst [smem:[#allocation17_spill]] %s5200_s9 }
  0x34   :  { %s5205_s3 = sld [smem:[%s6602_s0 + %s5027_s7]]   ;;  %s5031_s7 = smov 34  }
  0x35   :  { %s5210_s27 = sld [smem:[%s6602_s0 + %s5028_s15]]   ;;  %s5032_s15 = smov 35  }
  0x36   :  { %s5215_s29 = sld [smem:[%s6602_s0 + %s5029_s22]]   ;;  %s5232_s22 = smov 0  }
  0x37   :  { %s5220_s9 = sld [smem:[%s6602_s0 + %s5030_s28]]  }
  0x3a   :  { %6626 = sst [smem:[#allocation18_spill]] %s5205_s3 }
  0x3b   :  { %6627 = sst [smem:[#allocation19_spill]] %s5210_s27 }
  0x3c   :  { %s5225_s3 = sld [smem:[%s6602_s0 + %s5031_s7]]  }
  0x3d   :  { %s5230_s27 = sld [smem:[%s6602_s0 + %s5032_s15]]  }
  0x3e LB: > { %s3855_s23 = sadd.s32 4294967295, %s4996_s22   ;;  %p3859_p0 = scmp.ge.s32.totalorder %s4996_s22, 1  ;;  %s4996_s22 = sphi %s5232_s22, %s81_s22  }
  0x3f   : > { %p991_p1 = scmp.lt.s32.totalorder %s4996_s22, 3 }
  0x41   : > { %p992_p2 = pnand %p3859_p0, %p991_p1 }
  0x42   : > { %v1156_v0 = vld [vmem:[%s5110_s24] sm:$0xff] (!%p992_p2)  ;;  %v1157_v1 = vld [vmem:[%s5110_s24 + $0x8] sm:$0xff] (!%p992_p2)  ;;  %v1158_v2 = vld [vmem:[%s5110_s24 + $0x10] sm:$0xff] (!%p992_p2)  ;;  %v5033_v3 = vmov (!%p992_p2), 0.0|0.0   ;;  %vm5034_vm0 = vmmov (!%p992_p2), 0   ;;  %v5035_v6 = vmov (!%p992_p2), 0.0  }
  0x43   : > { %995 = sbr.rel (%p992_p2) target bundleno = 4472 (0x1178), region = 160  ;;  %4582 = vmatprep.subr.bf16.mxu1 (!%p992_p2), %v5033_v3  ;;  %v4583_v4 = vpack.c.bf16 (!%p992_p2), %v1157_v1, %v1156_v0  ;;  %v1159_v5 = vld [vmem:[%s5110_s24 + $0x18] sm:$0xff] (!%p992_p2)  ;;  %4199 = vmatprep.mubr.msk.f32.mxu1 (!%p992_p2), %vm5034_vm0, %v5035_v6  ;;  %v1160_v8 = vld [vmem:[%s5110_s24 + $0x20] sm:$0xff] (!%p992_p2)  ;;  %v1161_v9 = vld [vmem:[%s5110_s24 + $0x28] sm:$0xff] (!%p992_p2)  ;;  %p1086_p3 = scmp.lt.s32.totalorder (!%p992_p2), %s3855_s23, 1  ;;  %vm1819_vm1 = vcmask (!%p992_p2), 64512  }
  0x44   : > { %4558 = vmatprep.subr.bf16.mxu0 (!%p992_p2), %v5033_v3  ;;  %4164 = vmatprep.mubr.msk.f32.mxu0 (!%p992_p2), %vm5034_vm0, %v5035_v6  ;;  %v4586_v7 = vpack.c.bf16 (!%p992_p2), %v1159_v5, %v1158_v2  ;;  %v4589_v10 = vpack.c.bf16 (!%p992_p2), %v1161_v9, %v1160_v8  ;;  %v1162_v11 = vld [vmem:[%s5110_s24 + $0x30] sm:$0xff] (!%p992_p2)  ;;  %v1163_v12 = vld [vmem:[%s5110_s24 + $0x38] sm:$0xff] (!%p992_p2)  ;;  %v1164_v14 = vld [vmem:[%s5110_s24 + $0x40] sm:$0xff] (!%p992_p2)  ;;  %s5036_s28 = smov (!%p992_p2), 16   ;;  %s5037_s1 = smov (!%p992_p2), 8   ;;  %vm1836_vm2 = vcmask (!%p992_p2), 130048  }
  0x45   : > { %4584 = vmatpush3.bf16.msra.mxu1 (!%p992_p2), %v4583_v4  ;;  %v4592_v13 = vpack.c.bf16 (!%p992_p2), %v1163_v12, %v1162_v11  ;;  %v1165_v15 = vld [vmem:[%s5110_s24 + $0x48] sm:$0xff] (!%p992_p2)  ;;  %v1166_v17 = vld [vmem:[%s5110_s24 + $0x50] sm:$0xff] (!%p992_p2)  ;;  %v1167_v18 = vld [vmem:[%s5110_s24 + $0x58] sm:$0xff] (!%p992_p2)  ;;  %s5038_s2 = smov (!%p992_p2), 24   ;;  %s5039_s7 = smov (!%p992_p2), 32   ;;  %vm1853_vm3 = vcmask (!%p992_p2), 195584  }
  0x46   : > { %4585 = vmatprep.subr.bf16.mxu1 (!%p992_p2), %v5033_v3  ;;  %v4595_v16 = vpack.c.bf16 (!%p992_p2), %v1165_v15, %v1164_v14  ;;  %v4598_v19 = vpack.c.bf16 (!%p992_p2), %v1167_v18, %v1166_v17  ;;  %v1168_v20 = vld [vmem:[%s5110_s24 + $0x60] sm:$0xff] (!%p992_p2)  ;;  %v1169_v21 = vld [vmem:[%s5110_s24 + $0x68] sm:$0xff] (!%p992_p2)  ;;  %v1170_v23 = vld [vmem:[%s5110_s24 + $0x70] sm:$0xff] (!%p992_p2)  ;;  %s5040_s10 = smov (!%p992_p2), 48   ;;  %s5041_s11 = smov (!%p992_p2), 40   ;;  %vm1870_vm4 = vcmask (!%p992_p2), 261120  }
  0x47   : > { %v4601_v22 = vpack.c.bf16 (!%p992_p2), %v1169_v21, %v1168_v20  ;;  %v1171_v24 = vld [vmem:[%s5110_s24 + $0x78] sm:$0xff] (!%p992_p2)  ;;  %v3866_v27 = vld [vmem:[%s5115_s30] ss:$0 sm:$0xff] (!%p992_p2)  ;;  %s5042_s15 = smov (!%p992_p2), 56   ;;  %v1140_v37 = vld [vmem:[%s5100_s14 + $0x8] sm:$0xff] (!%p992_p2)  ;;  %vm1887_vm5 = vcmask (!%p992_p2), 326656  }
  0x48   : > { %v4604_v25 = vpack.c.bf16 (!%p992_p2), %v1171_v24, %v1170_v23  ;;  %v1139_v36 = vld [vmem:[%s5100_s14] sm:$0xff] (!%p992_p2)  ;;  %v1141_v39 = vld [vmem:[%s5100_s14 + $0x10] sm:$0xff] (!%p992_p2)  ;;  %v1142_v40 = vld [vmem:[%s5100_s14 + $0x18] sm:$0xff] (!%p992_p2)  ;;  %vm1904_vm6 = vcmask (!%p992_p2), 392192   ;;  %vm1921_vm7 = vcmask (!%p992_p2), 457728   ;;  %vm2024_vm8 = vcmask (!%p992_p2), 523264  }
  0x49   : > { %4587 = vmatpush3.bf16.msra.mxu1 (!%p992_p2), %v4586_v7  ;;  %v4559_v38 = vpack.c.bf16 (!%p992_p2), %v1140_v37, %v1139_v36  ;;  %v4562_v41 = vpack.c.bf16 (!%p992_p2), %v1142_v40, %v1141_v39  ;;  %v1143_v42 = vld [vmem:[%s5100_s14 + $0x20] sm:$0xff] (!%p992_p2)  ;;  %v1144_v43 = vld [vmem:[%s5100_s14 + $0x28] sm:$0xff] (!%p992_p2)  ;;  %v1145_v46 = vld [vmem:[%s5100_s14 + $0x30] sm:$0xff] (!%p992_p2)  ;;  %s6628_s18 = sld [smem:[#allocation2_spill]] (!%p992_p2)  ;;  %vm3084_vm9 = vcmask (!%p992_p2), 654336   ;;  %vm3101_vm10 = vcmask (!%p992_p2), 785408  }
  0x4a   : > { %4588 = vmatprep.subr.bf16.mxu1 %v5033_v3  ;;  %s6647_s23 = smov (!%p1086_p3, %s3855_s23), 1  ;;  %v4565_v45 = vpack.c.bf16 %v1144_v43, %v1143_v42  ;;  %v1146_v47 = vld [vmem:[%s5100_s14 + $0x38] sm:$0xff]  ;;  %v1147_v50 = vld [vmem:[%s5100_s14 + $0x40] sm:$0xff]  ;;  %v1148_v51 = vld [vmem:[%s5100_s14 + $0x48] sm:$0xff]  ;;  %vm3118_vm11 = vcmask 916480  }
  0x4b   : > { %s5275_s0 = sshll.u32 %s6647_s23, 3  ;;  %4560 = vmatpush3.bf16.msra.mxu0 %v4559_v38  ;;  %v4568_v48 = vpack.c.bf16 %v1146_v47, %v1145_v46  ;;  %v4571_v52 = vpack.c.bf16 %v1148_v51, %v1147_v50  ;;  %v1149_v53 = vld [vmem:[%s5100_s14 + $0x50] sm:$0xff]  ;;  %v1150_v54 = vld [vmem:[%s5100_s14 + $0x58] sm:$0xff]  ;;  %v1151_v56 = vld [vmem:[%s5100_s14 + $0x60] sm:$0xff] }
  0x4c   : > { %s5280_s26 = scalar_lea.vmem %s5055_s5, %s5275_s0  ;;  %4561 = vmatprep.subr.bf16.mxu0 %v5033_v3  ;;  %v4574_v55 = vpack.c.bf16 %v1150_v54, %v1149_v53  ;;  %v1152_v57 = vld [vmem:[%s5100_s14 + $0x68] sm:$0xff]  ;;  %v1153_v59 = vld [vmem:[%s5100_s14 + $0x70] sm:$0xff]  ;;  %v1154_v60 = vld [vmem:[%s5100_s14 + $0x78] sm:$0xff]  ;;  %s1098_s16 = scalar_lea.vmem %s5065_s13, %s5275_s0 }
  0x4d   : > { %4590 = vmatpush3.bf16.msra.mxu1 %v4589_v10  ;;  %v5283_v26 = vld [vmem:[%s5280_s26] sm:$0xff]  ;;  %v4577_v58 = vpack.c.bf16 %v1152_v57, %v1151_v56  ;;  %v4580_v61 = vpack.c.bf16 %v1154_v60, %v1153_v59  ;;  %v1108_v43 = vld [vmem:[%s5070_s17 + $0x8] sm:$0xff] }
  0x4e   : > { %4591 = vmatprep.subr.bf16.mxu1 %v5033_v3 }
  0x4f   : > { %4563 = vmatpush3.bf16.msra.mxu0 %v4562_v41 }
  0x50   : > { %4564 = vmatprep.subr.bf16.mxu0 %v5033_v3 }
  0x51   : > { %4593 = vmatpush3.bf16.msra.mxu1 %v4592_v13 }
  0x52   : > { %4594 = vmatprep.subr.bf16.mxu1 %v5033_v3 }
  0x53   : > { %4566 = vmatpush3.bf16.msra.mxu0 %v4565_v45 }
  0x54   : > { %4567 = vmatprep.subr.bf16.mxu0 %v5033_v3 }
  0x55   : > { %4596 = vmatpush3.bf16.msra.mxu1 %v4595_v16 }
  0x56   : > { %4597 = vmatprep.subr.bf16.mxu1 %v5033_v3 }
  0x57   : > { %4569 = vmatpush3.bf16.msra.mxu0 %v4568_v48 }
  0x58   : > { %4570 = vmatprep.subr.bf16.mxu0 %v5033_v3 }
  0x59   : > { %4599 = vmatpush3.bf16.msra.mxu1 %v4598_v19 }
  0x5a   : > { %4600 = vmatprep.subr.bf16.mxu1 %v5033_v3 }
  0x5b   : > { %4572 = vmatpush3.bf16.msra.mxu0 %v4571_v52 }
  0x5c   : > { %4573 = vmatprep.subr.bf16.mxu0 %v5033_v3 }
  0x5d   : > { %4602 = vmatpush3.bf16.msra.mxu1 %v4601_v22 }
  0x5e   : > { %4603 = vmatprep.subr.bf16.mxu1 %v5033_v3 }
  0x5f   : > { %4575 = vmatpush3.bf16.msra.mxu0 %v4574_v55 }
  0x60   : > { %4576 = vmatprep.subr.bf16.mxu0 %v5033_v3 }
  0x61   : > { %4605 = vmatpush3.bf16.msra.mxu1 %v4604_v25 }
  0x62   : > { %4630 = vmatprep.subr.bf16.mxu1 %v5033_v3 }
  0x63   : > { %4578 = vmatpush3.bf16.msra.mxu0 %v4577_v58 }
  0x64   : > { %4200 = vmatmul.mubr.f32.vlgmr.msra.gmra.mrb[0].mxu1 %v5283_v26  ;;  %4579 = vmatprep.subr.bf16.mxu0 %v5033_v3 }
  0x65   : > { %4269 = vmatprep.mubr.msk.f32.mxu1 %vm5034_vm0, %v5035_v6 }
  0x67   : > { %4581 = vmatpush3.bf16.msra.mxu0 %v4580_v61 }
  0x68   : > { %4606 = vmatprep.subr.bf16.mxu0 %v5033_v3 }
  0x6a   : > { %4165 = vmatmul.mubr.f32.vlgmr.msra.gmra.mrb[0].mxu0 %v5283_v26 }
  0x6b   : > { %4234 = vmatprep.mubr.msk.f32.mxu0 %vm5034_vm0, %v5035_v6 }
 0x137   : > { %v1355_v28 = vpop.f32.mrb[0].mxu1 }
 0x138   : > { %v4201_v29 = vpop.f32.mrb[1].mxu1  ;;  %v1356_v30 = vadd.f32 %v3866_v27, %v1355_v28 }
 0x13a   : > { %1435 = vxpose.xlu0.b32.start.end [1/1] (short) %v1356_v30, 128 }
 0x1ba   : > { %v5290_v31 = vpop.trf.xlu0 }
 0x1bb   : > { %1531 = vrot.lane.b32.xlu1 %v5290_v31, %s5036_s28  ;;  %1483 = vrot.lane.b32.xlu0 %v5290_v31, %s5037_s1 }
 0x1be   : > { %v5296_v32 = vpop.trf.xlu0 }
 0x1bf   : > { %1579 = vrot.lane.b32.xlu1 %v5290_v31, %s5038_s2 }
 0x1c2   : > { %v5300_v33 = vpop.trf.xlu0 }
 0x1c3   : > { %1627 = vrot.lane.b32.xlu1 %v5290_v31, %s5039_s7  ;;  %1727 = vrot.lane.b32.xlu0 %v5300_v33, %s5040_s10 }
 0x1c6   : > { %v5306_v34 = vpop.trf.xlu0 }
 0x1c7   : > { %1675 = vrot.lane.b32.xlu1 %v5290_v31, %s5041_s11  ;;  %1775 = vrot.lane.b32.xlu0 %v5300_v33, %s5042_s15 }
 0x1ca   : > { %v5312_v35 = vpop.trf.xlu0 }
 0x1cb   : > { %1723 = vrot.lane.b32.xlu1 %v5290_v31, %s5040_s10  ;;  %1587 = vrot.lane.b32.xlu0 %v5312_v35, %s5038_s2 }
 0x1ce   : > { %v5334_v44 = vpop.trf.xlu0 }
 0x1cf   : > { %1771 = vrot.lane.b32.xlu1 %v5290_v31, %s5042_s15  ;;  %1635 = vrot.lane.b32.xlu0 %v5312_v35, %s5039_s7 }
 0x1d2   : > { %v5347_v49 = vpop.trf.xlu0 }
 0x1d3   : > { %1485 = vrot.lane.b32.xlu1 %v5296_v32, %s5037_s1  ;;  %1683 = vrot.lane.b32.xlu0 %v5312_v35, %s5041_s11 }
 0x1d6   : > { %v5385_v62 = vpop.trf.xlu0 }
 0x1d7   : > { %1533 = vrot.lane.b32.xlu1 %v5296_v32, %s5036_s28  ;;  %1731 = vrot.lane.b32.xlu0 %v5312_v35, %s5040_s10 }
 0x1da   : > { %v5395_v63 = vpop.trf.xlu0 }
 0x1db   : > { %1581 = vrot.lane.b32.xlu1 %v5296_v32, %s5038_s2  ;;  %1779 = vrot.lane.b32.xlu0 %v5312_v35, %s5042_s15 }
 0x1de   : > { %v5417_v0 = vpop.trf.xlu0 }
 0x1df   : > { %1629 = vrot.lane.b32.xlu1 %v5296_v32, %s5039_s7  ;;  %1495 = vrot.lane.b32.xlu0 %v5347_v49, %s5037_s1 }
 0x1e2   : > { %v5427_v1 = vpop.trf.xlu0 }
 0x1e3   : > { %1677 = vrot.lane.b32.xlu1 %v5296_v32, %s5041_s11  ;;  %1543 = vrot.lane.b32.xlu0 %v5347_v49, %s5036_s28 }
 0x1e6   : > { %v5441_v2 = vpop.trf.xlu0 }
 0x1e7   : > { %1725 = vrot.lane.b32.xlu1 %v5296_v32, %s5040_s10  ;;  %1591 = vrot.lane.b32.xlu0 %v5347_v49, %s5038_s2 }
 0x1ea   : > { %v5447_v4 = vpop.trf.xlu0 }
 0x1eb   : > { %1773 = vrot.lane.b32.xlu1 %v5296_v32, %s5042_s15  ;;  %1639 = vrot.lane.b32.xlu0 %v5347_v49, %s5039_s7 }
 0x1ee   : > { %v5457_v5 = vpop.trf.xlu0 }
 0x1ef   : > { %1487 = vrot.lane.b32.xlu1 %v5300_v33, %s5037_s1  ;;  %1687 = vrot.lane.b32.xlu0 %v5347_v49, %s5041_s11 }
 0x1f2   : > { %v5463_v9 = vpop.trf.xlu0 }
 0x1f3   : > { %1535 = vrot.lane.b32.xlu1 %v5300_v33, %s5036_s28  ;;  %1735 = vrot.lane.b32.xlu0 %v5347_v49, %s5040_s10 }
 0x1f6   : > { %v5473_v11 = vpop.trf.xlu0 }
 0x1f7   : > { %1583 = vrot.lane.b32.xlu1 %v5300_v33, %s5038_s2  ;;  %1783 = vrot.lane.b32.xlu0 %v5347_v49, %s5042_s15 }
 0x1fb   : > { %1631 = vrot.lane.b32.xlu1 %v5300_v33, %s5039_s7  ;;  %1499 = vrot.lane.b32.xlu0 %v5395_v63, %s5037_s1 }
 0x1ff   : > { %1679 = vrot.lane.b32.xlu1 %v5300_v33, %s5041_s11  ;;  %1547 = vrot.lane.b32.xlu0 %v5395_v63, %s5036_s28 }
 0x203   : > { %1489 = vrot.lane.b32.xlu1 %v5306_v34, %s5037_s1  ;;  %1595 = vrot.lane.b32.xlu0 %v5395_v63, %s5038_s2 }
 0x207   : > { %1537 = vrot.lane.b32.xlu1 %v5306_v34, %s5036_s28  ;;  %1643 = vrot.lane.b32.xlu0 %v5395_v63, %s5039_s7 }
 0x20b   : > { %1585 = vrot.lane.b32.xlu1 %v5306_v34, %s5038_s2  ;;  %1691 = vrot.lane.b32.xlu0 %v5395_v63, %s5041_s11 }
 0x20f   : > { %1633 = vrot.lane.b32.xlu1 %v5306_v34, %s5039_s7  ;;  %1739 = vrot.lane.b32.xlu0 %v5395_v63, %s5040_s10 }
 0x213   : > { %1681 = vrot.lane.b32.xlu1 %v5306_v34, %s5041_s11  ;;  %1787 = vrot.lane.b32.xlu0 %v5395_v63, %s5042_s15 }
 0x217   : > { %1729 = vrot.lane.b32.xlu1 %v5306_v34, %s5040_s10  ;;  %1503 = vrot.lane.b32.xlu0 %v5427_v1, %s5037_s1 }
 0x21b   : > { %1777 = vrot.lane.b32.xlu1 %v5306_v34, %s5042_s15  ;;  %1551 = vrot.lane.b32.xlu0 %v5427_v1, %s5036_s28 }
 0x21f   : > { %1491 = vrot.lane.b32.xlu1 %v5312_v35, %s5037_s1  ;;  %1599 = vrot.lane.b32.xlu0 %v5427_v1, %s5038_s2 }
 0x223   : > { %1539 = vrot.lane.b32.xlu1 %v5312_v35, %s5036_s28  ;;  %1647 = vrot.lane.b32.xlu0 %v5427_v1, %s5039_s7 }
 0x227   : > { %1493 = vrot.lane.b32.xlu1 %v5334_v44, %s5037_s1  ;;  %1695 = vrot.lane.b32.xlu0 %v5427_v1, %s5041_s11 }
 0x22b   : > { %1541 = vrot.lane.b32.xlu1 %v5334_v44, %s5036_s28  ;;  %1743 = vrot.lane.b32.xlu0 %v5427_v1, %s5040_s10 }
 0x22d   : > { %v1532_v7 = vpop.permute.xlu1 %1531  ;;  %v1484_v14 = vpop.permute.xlu0 %1483 }
 0x22e   : > { %v1820_v23 = vsel %vm1819_vm1, %v5290_v31, %v1484_v14 }
 0x22f   : > { %1589 = vrot.lane.b32.xlu1 %v5334_v44, %s5038_s2  ;;  %1791 = vrot.lane.b32.xlu0 %v5427_v1, %s5042_s15  ;;  %v1837_v26 = vsel %vm1836_vm2, %v1820_v23, %v1532_v7 }
 0x231   : > { %v1580_v8 = vpop.permute.xlu1 %1579 }
 0x232   : > { %v1854_v27 = vsel %vm1853_vm3, %v1837_v26, %v1580_v8 }
 0x233   : > { %1637 = vrot.lane.b32.xlu1 %v5334_v44, %s5039_s7  ;;  %1507 = vrot.lane.b32.xlu0 %v5447_v4, %s5037_s1 }
 0x235   : > { %v1628_v10 = vpop.permute.xlu1 %1627  ;;  %v5483_v16 = vpop.permute.xlu0 %1727 }
 0x236   : > { %v1871_v29 = vsel %vm1870_vm4, %v1854_v27, %v1628_v10 }
 0x237   : > { %1685 = vrot.lane.b32.xlu1 %v5334_v44, %s5041_s11  ;;  %1555 = vrot.lane.b32.xlu0 %v5447_v4, %s5036_s28 }
 0x239   : > { %v1676_v12 = vpop.permute.xlu1 %1675  ;;  %v5493_v18 = vpop.permute.xlu0 %1775 }
 0x23a   : > { %v1888_v36 = vsel %vm1887_vm5, %v1871_v29, %v1676_v12 }
 0x23b   : > { %1733 = vrot.lane.b32.xlu1 %v5334_v44, %s5040_s10  ;;  %1603 = vrot.lane.b32.xlu0 %v5447_v4, %s5038_s2 }
 0x23d   : > { %v1724_v13 = vpop.permute.xlu1 %1723  ;;  %v5499_v21 = vpop.permute.xlu0 %1587 }
 0x23e   : > { %v1905_v38 = vsel %vm1904_vm6, %v1888_v36, %v1724_v13  ;;  %v1109_v36 = vld [vmem:[%s5070_s17 + $0x10] sm:$0xff] }
 0x23f   : > { %1781 = vrot.lane.b32.xlu1 %v5334_v44, %s5042_s15  ;;  %1651 = vrot.lane.b32.xlu0 %v5447_v4, %s5039_s7 }
 0x241   : > { %v1772_v15 = vpop.permute.xlu1 %1771  ;;  %v5511_v24 = vpop.permute.xlu0 %1635 }
 0x242   : > { %v1922_v41 = vsel %vm1921_vm7, %v1905_v38, %v1772_v15 }
 0x243   : > { %1497 = vrot.lane.b32.xlu1 %v5385_v62, %s5037_s1  ;;  %1699 = vrot.lane.b32.xlu0 %v5447_v4, %s5041_s11 }
 0x245   : > { %v1486_v17 = vpop.permute.xlu1 %1485  ;;  %v5526_v39 = vpop.permute.xlu0 %1683 }
 0x246   : > { %v1821_v28 = vsel %vm1819_vm1, %v5296_v32, %v1486_v17  ;;  %v1107_v32 = vld [vmem:[%s5070_s17] sm:$0xff] }
 0x247   : > { %1545 = vrot.lane.b32.xlu1 %v5385_v62, %s5036_s28  ;;  %1747 = vrot.lane.b32.xlu0 %v5447_v4, %s5040_s10  ;;  %v1938_v48 = vmul.f32 %v1922_v41, %v1107_v32 }
 0x249   : > { %v1534_v19 = vpop.permute.xlu1 %1533  ;;  %v5543_v51 = vpop.permute.xlu0 %1731 }
 0x24a   : > { %v1838_v30 = vsel %vm1836_vm2, %v1821_v28, %v1534_v19 }
 0x24b   : > { %1593 = vrot.lane.b32.xlu1 %v5385_v62, %s5038_s2  ;;  %1795 = vrot.lane.b32.xlu0 %v5447_v4, %s5042_s15 }
 0x24d   : > { %v1582_v20 = vpop.permute.xlu1 %1581  ;;  %v5550_v55 = vpop.permute.xlu0 %1779 }
 0x24e   : > { %v1855_v37 = vsel %vm1853_vm3, %v1838_v30, %v1582_v20 }
 0x24f   : > { %1641 = vrot.lane.b32.xlu1 %v5385_v62, %s5039_s7  ;;  %1511 = vrot.lane.b32.xlu0 %v5463_v9, %s5037_s1 }
 0x251   : > { %v1630_v22 = vpop.permute.xlu1 %1629  ;;  %v5558_v57 = vpop.permute.xlu0 %1495 }
 0x252   : > { %v1872_v40 = vsel %vm1870_vm4, %v1855_v37, %v1630_v22  ;;  %v1110_v37 = vld [vmem:[%s5070_s17 + $0x18] sm:$0xff] }
 0x253   : > { %1689 = vrot.lane.b32.xlu1 %v5385_v62, %s5041_s11  ;;  %1559 = vrot.lane.b32.xlu0 %v5463_v9, %s5036_s28 }
 0x255   : > { %v1678_v25 = vpop.permute.xlu1 %1677  ;;  %v5562_v60 = vpop.permute.xlu0 %1543 }
 0x256   : > { %v1889_v42 = vsel %vm1887_vm5, %v1872_v40, %v1678_v25 }
 0x257   : > { %1737 = vrot.lane.b32.xlu1 %v5385_v62, %s5040_s10  ;;  %1607 = vrot.lane.b32.xlu0 %v5463_v9, %s5038_s2 }
 0x259   : > { %v1726_v31 = vpop.permute.xlu1 %1725  ;;  %v5568_v7 = vpop.permute.xlu0 %1591 }
 0x25a   : > { %v1906_v45 = vsel %vm1904_vm6, %v1889_v42, %v1726_v31 }
 0x25b   : > { %1785 = vrot.lane.b32.xlu1 %v5385_v62, %s5042_s15  ;;  %1655 = vrot.lane.b32.xlu0 %v5463_v9, %s5039_s7 }
 0x25d   : > { %v1774_v46 = vpop.permute.xlu1 %1773  ;;  %v5572_v12 = vpop.permute.xlu0 %1639 }
 0x25e   : > { %v1923_v47 = vsel %vm1921_vm7, %v1906_v45, %v1774_v46 }
 0x25f   : > { %v1939_v50 = vmul.f32 %v1923_v47, %v1108_v43  ;;  %1501 = vrot.lane.b32.xlu1 %v5417_v0, %s5037_s1  ;;  %1703 = vrot.lane.b32.xlu0 %v5463_v9, %s5041_s11 }
 0x261   : > { %v4631_v52 = vpack.c.bf16 %v1939_v50, %v1938_v48  ;;  %v1488_v53 = vpop.permute.xlu1 %1487  ;;  %v5582_v19 = vpop.permute.xlu0 %1687 }
 0x262   : > { %v1822_v14 = vsel %vm1819_vm1, %v5300_v33, %v1488_v53 }
 0x263   : > { %1549 = vrot.lane.b32.xlu1 %v5417_v0, %s5036_s28  ;;  %1751 = vrot.lane.b32.xlu0 %v5463_v9, %s5040_s10 }
 0x264   : > { %4632 = vmatpush3.bf16.msra.mxu1 %v4631_v52 }
 0x265   : > { %v1536_v54 = vpop.permute.xlu1 %1535  ;;  %4633 = vmatprep.subr.bf16.mxu1 %v5033_v3  ;;  %v5594_v29 = vpop.permute.xlu0 %1735 }
 0x266   : > { %v1839_v15 = vsel %vm1836_vm2, %v1822_v14, %v1536_v54 }
 0x267   : > { %1597 = vrot.lane.b32.xlu1 %v5417_v0, %s5038_s2  ;;  %1799 = vrot.lane.b32.xlu0 %v5463_v9, %s5042_s15 }
 0x269   : > { %v1584_v56 = vpop.permute.xlu1 %1583  ;;  %v5608_v42 = vpop.permute.xlu0 %1783 }
 0x26a   : > { %v1856_v17 = vsel %vm1853_vm3, %v1839_v15, %v1584_v56 }
 0x26b   : > { %1645 = vrot.lane.b32.xlu1 %v5417_v0, %s5039_s7 }
 0x26d   : > { %v1632_v58 = vpop.permute.xlu1 %1631  ;;  %v5613_v46 = vpop.permute.xlu0 %1499 }
 0x26e   : > { %v1873_v20 = vsel %vm1870_vm4, %v1856_v17, %v1632_v58 }
 0x26f   : > { %1693 = vrot.lane.b32.xlu1 %v5417_v0, %s5041_s11 }
 0x271   : > { %v1680_v59 = vpop.permute.xlu1 %1679  ;;  %v5619_v48 = vpop.permute.xlu0 %1547 }
 0x272   : > { %v1890_v23 = vsel %vm1887_vm5, %v1873_v20, %v1680_v59 }
 0x273   : > { %1741 = vrot.lane.b32.xlu1 %v5417_v0, %s5040_s10  ;;  %v1907_v25 = vsel %vm1904_vm6, %v1890_v23, %v5483_v16  ;;  %v1112_v23 = vld [vmem:[%s5070_s17 + $0x28] sm:$0xff] }
 0x274   : > { %v1924_v31 = vsel %vm1921_vm7, %v1907_v25, %v5493_v18 }
 0x275   : > { %v1490_v61 = vpop.permute.xlu1 %1489  ;;  %v1940_v32 = vmul.f32 %v1924_v31, %v1109_v36  ;;  %v5626_v56 = vpop.permute.xlu0 %1595 }
 0x276   : > { %v1823_v33 = vsel %vm1819_vm1, %v5306_v34, %v1490_v61 }
 0x277   : > { %1789 = vrot.lane.b32.xlu1 %v5417_v0, %s5042_s15 }
 0x279   : > { %v1538_v8 = vpop.permute.xlu1 %1537 }
 0x27a   : > { %v1840_v26 = vsel %vm1836_vm2, %v1823_v33, %v1538_v8 }
 0x27b   : > { %1505 = vrot.lane.b32.xlu1 %v5441_v2, %s5037_s1 }
 0x27d   : > { %v1586_v10 = vpop.permute.xlu1 %1585 }
 0x27e   : > { %v1857_v28 = vsel %vm1853_vm3, %v1840_v26, %v1586_v10 }
 0x27f   : > { %1553 = vrot.lane.b32.xlu1 %v5441_v2, %s5036_s28 }
 0x281   : > { %v1634_v13 = vpop.permute.xlu1 %1633 }
 0x282   : > { %v1874_v30 = vsel %vm1870_vm4, %v1857_v28, %v1634_v13 }
 0x283   : > { %1601 = vrot.lane.b32.xlu1 %v5441_v2, %s5038_s2 }
 0x285   : > { %v1682_v22 = vpop.permute.xlu1 %1681 }
 0x286   : > { %v1891_v34 = vsel %vm1887_vm5, %v1874_v30, %v1682_v22  ;;  %v1111_v22 = vld [vmem:[%s5070_s17 + $0x20] sm:$0xff] }
 0x287   : > { %1649 = vrot.lane.b32.xlu1 %v5441_v2, %s5039_s7 }
 0x289   : > { %v1730_v27 = vpop.permute.xlu1 %1729 }
 0x28a   : > { %v1908_v16 = vsel %vm1904_vm6, %v1891_v34, %v1730_v27 }
 0x28b   : > { %1697 = vrot.lane.b32.xlu1 %v5441_v2, %s5041_s11 }
 0x28d   : > { %v1778_v38 = vpop.permute.xlu1 %1777 }
 0x28e   : > { %v1925_v40 = vsel %vm1921_vm7, %v1908_v16, %v1778_v38  ;;  %v5675_v38 = vpop.f32.mrb[0].mxu0 }
 0x28f   : > { %v1941_v41 = vmul.f32 %v1925_v40, %v1110_v37  ;;  %1745 = vrot.lane.b32.xlu1 %v5441_v2, %s5040_s10  ;;  %v4166_v40 = vpop.f32.mrb[1].mxu0 }
 0x291   : > { %v4634_v43 = vpack.c.bf16 %v1941_v41, %v1940_v32  ;;  %v1492_v45 = vpop.permute.xlu1 %1491  ;;  %v1826_v41 = vsel %vm1819_vm1, %v5347_v49, %v5558_v57 }
 0x292   : > { %v1824_v52 = vsel %vm1819_vm1, %v5312_v35, %v1492_v45  ;;  %v5636_v35 = vpop.permute.xlu0 %1643 }
 0x293   : > { %1793 = vrot.lane.b32.xlu1 %v5441_v2, %s5042_s15  ;;  %4635 = vmatpush3.bf16.msra.mxu1 %v4634_v43  ;;  %v1843_v43 = vsel %vm1836_vm2, %v1826_v41, %v5562_v60 }
 0x294   : > { %4636 = vmatprep.subr.bf16.mxu1 %v5033_v3 }
 0x295   : > { %v1540_v18 = vpop.permute.xlu1 %1539 }
 0x296   : > { %v1841_v53 = vsel %vm1836_vm2, %v1824_v52, %v1540_v18  ;;  %v5648_v17 = vpop.permute.xlu0 %1691  ;;  %v1860_v18 = vsel %vm1853_vm3, %v1843_v43, %v5568_v7 }
 0x297   : > { %1509 = vrot.lane.b32.xlu1 %v5457_v5, %s5037_s1  ;;  %v1858_v58 = vsel %vm1853_vm3, %v1841_v53, %v5499_v21 }
 0x298   : > { %v1875_v61 = vsel %vm1870_vm4, %v1858_v58, %v5511_v24  ;;  %v1114_v58 = vld [vmem:[%s5070_s17 + $0x38] sm:$0xff] }
 0x299   : > { %v1494_v47 = vpop.permute.xlu1 %1493  ;;  %v1892_v10 = vsel %vm1887_vm5, %v1875_v61, %v5526_v39 }
 0x29a   : > { %v1825_v21 = vsel %vm1819_vm1, %v5334_v44, %v1494_v47  ;;  %v1909_v24 = vsel %vm1904_vm6, %v1892_v10, %v5543_v51  ;;  %v5662_v28 = vpop.permute.xlu0 %1739 }
 0x29b   : > { %1557 = vrot.lane.b32.xlu1 %v5457_v5, %s5036_s28  ;;  %v1926_v44 = vsel %vm1921_vm7, %v1909_v24, %v5550_v55 }
 0x29c   : > { %v1942_v26 = vmul.f32 %v1926_v44, %v1111_v22 }
 0x29d   : > { %v1542_v50 = vpop.permute.xlu1 %1541 }
 0x29e   : > { %v1842_v13 = vsel %vm1836_vm2, %v1825_v21, %v1542_v50  ;;  %v1788_v34 = vpop.permute.xlu0 %1787  ;;  %v1877_v50 = vsel %vm1870_vm4, %v1860_v18, %v5572_v12 }
 0x29f   : > { %1605 = vrot.lane.b32.xlu1 %v5457_v5, %s5038_s2  ;;  %v1894_v60 = vsel %vm1887_vm5, %v1877_v50, %v5582_v19 }
 0x2a0   : > { %v1911_v53 = vsel %vm1904_vm6, %v1894_v60, %v5594_v29 }
 0x2a1   : > { %v1590_v54 = vpop.permute.xlu1 %1589  ;;  %v1928_v7 = vsel %vm1921_vm7, %v1911_v53, %v5608_v42 }
 0x2a2   : > { %v1859_v15 = vsel %vm1853_vm3, %v1842_v13, %v1590_v54  ;;  %v5671_v37 = vpop.permute.xlu0 %1503 }
 0x2a3   : > { %1653 = vrot.lane.b32.xlu1 %v5457_v5, %s5039_s7 }
 0x2a5   : > { %v1638_v59 = vpop.permute.xlu1 %1637 }
 0x2a6   : > { %v1876_v20 = vsel %vm1870_vm4, %v1859_v15, %v1638_v59  ;;  %v5682_v45 = vpop.permute.xlu0 %1551 }
 0x2a7   : > { %1701 = vrot.lane.b32.xlu1 %v5457_v5, %s5041_s11 }
 0x2a9   : > { %v1686_v8 = vpop.permute.xlu1 %1685 }
 0x2aa   : > { %v1893_v39 = vsel %vm1887_vm5, %v1876_v20, %v1686_v8  ;;  %v1600_v59 = vpop.permute.xlu0 %1599 }
 0x2ab   : > { %1749 = vrot.lane.b32.xlu1 %v5457_v5, %s5040_s10 }
 0x2ad   : > { %v1734_v14 = vpop.permute.xlu1 %1733 }
 0x2ae   : > { %v1910_v33 = vsel %vm1904_vm6, %v1893_v39, %v1734_v14  ;;  %v1648_v14 = vpop.permute.xlu0 %1647 }
 0x2af   : > { %1797 = vrot.lane.b32.xlu1 %v5457_v5, %s5042_s15 }
 0x2b1   : > { %v1782_v25 = vpop.permute.xlu1 %1781 }
 0x2b2   : > { %v1927_v51 = vsel %vm1921_vm7, %v1910_v33, %v1782_v25  ;;  %v1696_v15 = vpop.permute.xlu0 %1695 }
 0x2b3   : > { %v1943_v27 = vmul.f32 %v1927_v51, %v1112_v23  ;;  %1513 = vrot.lane.b32.xlu1 %v5473_v11, %s5037_s1  ;;  %v1828_v23 = vsel %vm1819_vm1, %v5395_v63, %v5613_v46 }
 0x2b4   : > { %v1845_v44 = vsel %vm1836_vm2, %v1828_v23, %v5619_v48 }
 0x2b5   : > { %v4637_v30 = vpack.c.bf16 %v1943_v27, %v1942_v26  ;;  %v1498_v31 = vpop.permute.xlu1 %1497  ;;  %v1862_v33 = vsel %vm1853_vm3, %v1845_v44, %v5626_v56  ;;  %v1115_v56 = vld [vmem:[%s5070_s17 + $0x40] sm:$0xff] }
 0x2b6   : > { %v1827_v47 = vsel %vm1819_vm1, %v5385_v62, %v1498_v31  ;;  %v1113_v62 = vld [vmem:[%s5070_s17 + $0x30] sm:$0xff]  ;;  %v1744_v39 = vpop.permute.xlu0 %1743  ;;  %v1879_v51 = vsel %vm1870_vm4, %v1862_v33, %v5636_v35  ;;  %v1116_v35 = vld [vmem:[%s5070_s17 + $0x48] sm:$0xff] }
 0x2b7   : > { %1561 = vrot.lane.b32.xlu1 %v5473_v11, %s5036_s28  ;;  %4638 = vmatpush3.bf16.msra.mxu1 %v4637_v30  ;;  %v1944_v10 = vmul.f32 %v1928_v7, %v1113_v62  ;;  %v1896_v31 = vsel %vm1887_vm5, %v1879_v51, %v5648_v17 }
 0x2b8   : > { %4639 = vmatprep.subr.bf16.mxu1 %v5033_v3  ;;  %v1913_v46 = vsel %vm1904_vm6, %v1896_v31, %v5662_v28 }
 0x2b9   : > { %v1546_v55 = vpop.permute.xlu1 %1545 }
 0x2ba   : > { %v1844_v49 = vsel %vm1836_vm2, %v1827_v47, %v1546_v55  ;;  %v1792_v26 = vpop.permute.xlu0 %1791 }
 0x2bb   : > { %1609 = vrot.lane.b32.xlu1 %v5473_v11, %s5038_s2  ;;  %s6630_s2 = sld [smem:[#allocation10_spill]] }
 0x2bd   : > { %v1594_v36 = vpop.permute.xlu1 %1593 }
 0x2be   : > { %v1861_v52 = vsel %vm1853_vm3, %v1844_v49, %v1594_v36  ;;  %v1508_v17 = vpop.permute.xlu0 %1507 }
 0x2bf   : > { %1657 = vrot.lane.b32.xlu1 %v5473_v11, %s5039_s7  ;;  %v1832_v51 = vsel %vm1819_vm1, %v5447_v4, %v1508_v17 }
 0x2c1   : > { %v1642_v16 = vpop.permute.xlu1 %1641 }
 0x2c2   : > { %v1878_v54 = vsel %vm1870_vm4, %v1861_v52, %v1642_v16  ;;  %v1556_v28 = vpop.permute.xlu0 %1555  ;;  %v1830_v52 = vsel %vm1819_vm1, %v5427_v1, %v5671_v37 }
 0x2c3   : > { %1705 = vrot.lane.b32.xlu1 %v5473_v11, %s5041_s11  ;;  %v1847_v53 = vsel %vm1836_vm2, %v1830_v52, %v5682_v45  ;;  %v1117_v45 = vld [vmem:[%s5070_s17 + $0x50] sm:$0xff]  ;;  %s5043_s11 = smov 64  }
 0x2c5   : > { %v1690_v32 = vpop.permute.xlu1 %1689 }
 0x2c6   : > { %v1895_v12 = vsel %vm1887_vm5, %v1878_v54, %v1690_v32  ;;  %v1864_v54 = vsel %vm1853_vm3, %v1847_v53, %v1600_v59 }
 0x2c7   : > { %1753 = vrot.lane.b32.xlu1 %v5473_v11, %s5040_s10  ;;  %v1881_v7 = vsel %vm1870_vm4, %v1864_v54, %v1648_v14 }
 0x2c9   : > { %v1738_v57 = vpop.permute.xlu1 %1737 }
 0x2ca   : > { %v1912_v19 = vsel %vm1904_vm6, %v1895_v12, %v1738_v57 }
 0x2cb   : > { %1801 = vrot.lane.b32.xlu1 %v5473_v11, %s5042_s15  ;;  %s5044_s15 = smov 80  }
 0x2cd   : > { %v1786_v61 = vpop.permute.xlu1 %1785 }
 0x2ce   : > { %v1929_v8 = vsel %vm1921_vm7, %v1912_v19, %v1786_v61  ;;  %v1898_v19 = vsel %vm1887_vm5, %v1881_v7, %v1696_v15 }
 0x2cf   : > { %v1945_v29 = vmul.f32 %v1929_v8, %v1114_v58  ;;  %v1915_v8 = vsel %vm1904_vm6, %v1898_v19, %v1744_v39 }
 0x2d0   : > { %v1932_v59 = vsel %vm1921_vm7, %v1915_v8, %v1792_v26  ;;  %v1849_v26 = vsel %vm1836_vm2, %v1832_v51, %v1556_v28  ;;  %v1178_v51 = vld [vmem:[%s5120_s6 + $0x28] sm:$0xff] }
 0x2d1   : > { %v4640_v21 = vpack.c.bf16 %v1945_v29, %v1944_v10  ;;  %v1502_v13 = vpop.permute.xlu1 %1501  ;;  %v1948_v14 = vmul.f32 %v1932_v59, %v1117_v45  ;;  %v1121_v59 = vld [vmem:[%s5070_s17 + $0x70] sm:$0xff] }
 0x2d2   : > { %v1829_v25 = vsel %vm1819_vm1, %v5417_v0, %v1502_v13  ;;  %v1930_v0 = vsel %vm1921_vm7, %v1913_v46, %v1788_v34  ;;  %v1604_v34 = vpop.permute.xlu0 %1603 }
 0x2d3   : > { %4641 = vmatpush3.bf16.msra.mxu1 %v4640_v21  ;;  %v1946_v32 = vmul.f32 %v1930_v0, %v1115_v56 }
 0x2d4   : > { %4642 = vmatprep.subr.bf16.mxu1 %v5033_v3 }
 0x2d5   : > { %v1550_v24 = vpop.permute.xlu1 %1549 }
 0x2d6   : > { %v1846_v27 = vsel %vm1836_vm2, %v1829_v25, %v1550_v24  ;;  %v1652_v57 = vpop.permute.xlu0 %1651 }
 0x2d9   : > { %v1598_v42 = vpop.permute.xlu1 %1597 }
 0x2da   : > { %v1863_v63 = vsel %vm1853_vm3, %v1846_v27, %v1598_v42  ;;  %v1700_v1 = vpop.permute.xlu0 %1699 }
 0x2dd   : > { %v1646_v20 = vpop.permute.xlu1 %1645 }
 0x2de   : > { %v1880_v48 = vsel %vm1870_vm4, %v1863_v63, %v1646_v20  ;;  %v1748_v15 = vpop.permute.xlu0 %1747 }
 0x2e1   : > { %v1694_v22 = vpop.permute.xlu1 %1693 }
 0x2e2   : > { %v1897_v55 = vsel %vm1887_vm5, %v1880_v48, %v1694_v22  ;;  %v1796_v22 = vpop.permute.xlu0 %1795 }
 0x2e5   : > { %v1742_v30 = vpop.permute.xlu1 %1741 }
 0x2e6   : > { %v1914_v36 = vsel %vm1904_vm6, %v1897_v55, %v1742_v30  ;;  %v1512_v44 = vpop.permute.xlu0 %1511  ;;  %v1866_v30 = vsel %vm1853_vm3, %v1849_v26, %v1604_v34 }
 0x2e7   : > { %v1883_v63 = vsel %vm1870_vm4, %v1866_v30, %v1652_v57  ;;  %v1834_v54 = vsel %vm1819_vm1, %v5463_v9, %v1512_v44  ;;  %v1180_v30 = vld [vmem:[%s5120_s6 + $0x38] sm:$0xff] }
 0x2e8   : > { %v1900_v56 = vsel %vm1887_vm5, %v1883_v63, %v1700_v1  ;;  %v1181_v63 = vld [vmem:[%s5120_s6 + $0x40] sm:$0xff] }
 0x2e9   : > { %v1790_v16 = vpop.permute.xlu1 %1789  ;;  %v1917_v55 = vsel %vm1904_vm6, %v1900_v56, %v1748_v15  ;;  %v3865_v15 = vld [vmem:[%s5105_s19] ss:$0 sm:$0xff]  ;;  %v1183_v56 = vld [vmem:[%s5120_s6 + $0x50] sm:$0xff] }
 0x2ea   : > { %v1931_v40 = vsel %vm1921_vm7, %v1914_v36, %v1790_v16  ;;  %v1560_v27 = vpop.permute.xlu0 %1559  ;;  %v1934_v36 = vsel %vm1921_vm7, %v1917_v55, %v1796_v22  ;;  %v1174_v22 = vld [vmem:[%s5120_s6 + $0x8] sm:$0xff] }
 0x2eb   : > { %v1947_v41 = vmul.f32 %v1931_v40, %v1116_v35  ;;  %v1119_v35 = vld [vmem:[%s5070_s17 + $0x60] sm:$0xff]  ;;  %v1120_v40 = vld [vmem:[%s5070_s17 + $0x68] sm:$0xff] }
 0x2ed   : > { %v4643_v43 = vpack.c.bf16 %v1947_v41, %v1946_v32  ;;  %v1506_v18 = vpop.permute.xlu1 %1505 }
 0x2ee   : > { %v1831_v62 = vsel %vm1819_vm1, %v5441_v2, %v1506_v18  ;;  %v1118_v2 = vld [vmem:[%s5070_s17 + $0x58] sm:$0xff] }
 0x2ef   : > { %4644 = vmatpush3.bf16.msra.mxu1 %v4643_v43  ;;  %v1950_v43 = vmul.f32 %v1934_v36, %v1119_v35  ;;  %v1186_v35 = vld [vmem:[%s5120_s6 + $0x68] sm:$0xff] }
 0x2f0   : > { %4645 = vmatprep.subr.bf16.mxu1 %v5033_v3 }
 0x2f1   : > { %v1554_v47 = vpop.permute.xlu1 %1553 }
 0x2f2   : > { %v1848_v12 = vsel %vm1836_vm2, %v1831_v62, %v1554_v47  ;;  %v1851_v62 = vsel %vm1836_vm2, %v1834_v54, %v1560_v27  ;;  %v1179_v27 = vld [vmem:[%s5120_s6 + $0x30] sm:$0xff] }
 0x2f5   : > { %v1602_v50 = vpop.permute.xlu1 %1601 }
 0x2f6   : > { %v1865_v61 = vsel %vm1853_vm3, %v1848_v12, %v1602_v50 }
 0x2f9   : > { %v1650_v49 = vpop.permute.xlu1 %1649 }
 0x2fa   : > { %v1882_v37 = vsel %vm1870_vm4, %v1865_v61, %v1650_v49 }
 0x2fd   : > { %v1698_v60 = vpop.permute.xlu1 %1697 }
 0x2fe   : > { %v1899_v10 = vsel %vm1887_vm5, %v1882_v37, %v1698_v60 }
 0x301   : > { %v1746_v58 = vpop.permute.xlu1 %1745 }
 0x302   : > { %v1916_v29 = vsel %vm1904_vm6, %v1899_v10, %v1746_v58 }
 0x305   : > { %v1794_v21 = vpop.permute.xlu1 %1793 }
 0x306   : > { %v1933_v13 = vsel %vm1921_vm7, %v1916_v29, %v1794_v21 }
 0x307   : > { %v1949_v24 = vmul.f32 %v1933_v13, %v1118_v2  ;;  %v1122_v2 = vld [vmem:[%s5070_s17 + $0x78] sm:$0xff] }
 0x309   : > { %v4646_v42 = vpack.c.bf16 %v1949_v24, %v1948_v14  ;;  %v1510_v20 = vpop.permute.xlu1 %1509 }
 0x30a   : > { %v1833_v31 = vsel %vm1819_vm1, %v5457_v5, %v1510_v20  ;;  %v1608_v5 = vpop.permute.xlu0 %1607  ;;  %v1280_v20 = vadd.f32 %v3865_v15, %v5675_v38  ;;  %v1177_v38 = vld [vmem:[%s5120_s6 + $0x20] sm:$0xff] }
 0x30b   : > { %4647 = vmatpush3.bf16.msra.mxu1 %v4646_v42  ;;  %v1868_v7 = vsel %vm1853_vm3, %v1851_v62, %v1608_v5  ;;  %v4613_v26 = vpack.c.bf16 %v1178_v51, %v1177_v38  ;;  %v1137_v62 = vld [vmem:[%s5080_s25 + $0x30] sm:$0xff] }
 0x30c   : > { %4648 = vmatprep.subr.bf16.mxu1 %v5033_v3 }
 0x30d   : > { %v1558_v39 = vpop.permute.xlu1 %1557 }
 0x30e   : > { %v1850_v46 = vsel %vm1836_vm2, %v1833_v31, %v1558_v39  ;;  %v1656_v50 = vpop.permute.xlu0 %1655  ;;  %v1173_v39 = vld [vmem:[%s5120_s6] sm:$0xff]  ;;  %v4616_v31 = vpack.c.bf16 %v1180_v30, %v1179_v27  ;;  %v1191_v27 = vld [vmem:[%s5130_s20 + $0x8] sm:$0xff]  ;;  %v1192_v30 = vld [vmem:[%s5130_s20 + $0x10] sm:$0xff] }
 0x30f   : > { %v1885_v58 = vsel %vm1870_vm4, %v1868_v7, %v1656_v50  ;;  %v4607_v44 = vpack.c.bf16 %v1174_v22, %v1173_v39  ;;  %v1132_v50 = vld [vmem:[%s5080_s25 + $0x8] sm:$0xff]  ;;  %v1138_v7 = vld [vmem:[%s5080_s25 + $0x38] sm:$0xff] }
 0x311   : > { %v1606_v23 = vpop.permute.xlu1 %1605  ;;  %4608 = vmatpush3.bf16.msra.mxu0 %v4607_v44 }
 0x312   : > { %v1867_v0 = vsel %vm1853_vm3, %v1850_v46, %v1606_v23  ;;  %v1704_v49 = vpop.permute.xlu0 %1703  ;;  %v1175_v23 = vld [vmem:[%s5120_s6 + $0x10] sm:$0xff]  ;;  %4609 = vmatprep.subr.bf16.mxu0 %v5033_v3  ;;  %v1182_v46 = vld [vmem:[%s5120_s6 + $0x48] sm:$0xff] }
 0x313   : > { %v1902_v1 = vsel %vm1887_vm5, %v1885_v58, %v1704_v49  ;;  %v1133_v49 = vld [vmem:[%s5080_s25 + $0x10] sm:$0xff]  ;;  %v3867_v58 = vld [vmem:[%s5125_s12] ss:$0 sm:$0xff] }
 0x315   : > { %v1654_v33 = vpop.permute.xlu1 %1653 }
 0x316   : > { %v1884_v4 = vsel %vm1870_vm4, %v1867_v0, %v1654_v33  ;;  %v1752_v52 = vpop.permute.xlu0 %1751  ;;  %v1176_v33 = vld [vmem:[%s5120_s6 + $0x18] sm:$0xff] }
 0x317   : > { %v1919_v9 = vsel %vm1904_vm6, %v1902_v1, %v1752_v52  ;;  %v1184_v0 = vld [vmem:[%s5120_s6 + $0x58] sm:$0xff]  ;;  %v1135_v52 = vld [vmem:[%s5080_s25 + $0x20] sm:$0xff]  ;;  %v1125_v1 = vld [vmem:[%s5075_s21 + $0x10] sm:$0xff] }
 0x318   : > { %v4622_v55 = vpack.c.bf16 %v1184_v0, %v1183_v56  ;;  %v1195_v56 = vld [vmem:[%s5130_s20 + $0x28] sm:$0xff] }
 0x319   : > { %v1702_v25 = vpop.permute.xlu1 %1701 }
 0x31a   : > { %v1901_v16 = vsel %vm1887_vm5, %v1884_v4, %v1702_v25  ;;  %v1800_v19 = vpop.permute.xlu0 %1799  ;;  %v4610_v25 = vpack.c.bf16 %v1176_v33, %v1175_v23  ;;  %v1185_v4 = vld [vmem:[%s5120_s6 + $0x60] sm:$0xff] }
 0x31b   : > { %v1936_v10 = vsel %vm1921_vm7, %v1919_v9, %v1800_v19  ;;  %v4625_v36 = vpack.c.bf16 %v1186_v35, %v1185_v4  ;;  %v1123_v19 = vld [vmem:[%s5075_s21] sm:$0xff]  ;;  %v1197_v4 = vld [vmem:[%s5130_s20 + $0x38] sm:$0xff] }
 0x31c   : > { %v1952_v14 = vmul.f32 %v1936_v10, %v1121_v59  ;;  %4611 = vmatpush3.bf16.msra.mxu0 %v4610_v25 }
 0x31d   : > { %v1750_v48 = vpop.permute.xlu1 %1749  ;;  %4612 = vmatprep.subr.bf16.mxu0 %v5033_v3 }
 0x31e   : > { %v1918_v32 = vsel %vm1904_vm6, %v1901_v16, %v1750_v48  ;;  %v4619_v48 = vpack.c.bf16 %v1182_v46, %v1181_v63  ;;  %v1187_v16 = vld [vmem:[%s5120_s6 + $0x70] sm:$0xff]  ;;  %v1193_v63 = vld [vmem:[%s5130_s20 + $0x18] sm:$0xff] }
 0x31f   : > { %v4682_v46 = vpack.c.bf16 %v1193_v63, %v1192_v30  ;;  %v2354_v63 = vld [vmem:[%s5150_s8 + $0x70] sm:$0xff] }
 0x320   : > { %4614 = vmatpush3.bf16.msra.mxu0 %v4613_v26  ;;  %v1190_v26 = vld [vmem:[%s5130_s20] sm:$0xff] }
 0x321   : > { %v1798_v17 = vpop.permute.xlu1 %1797  ;;  %4615 = vmatprep.subr.bf16.mxu0 %v5033_v3 }
 0x322   : > { %v1935_v41 = vsel %vm1921_vm7, %v1918_v32, %v1798_v17  ;;  %v5822_v32 = vld [vmem:[%s5280_s26] sm:$0xff]  ;;  %s3888_s26 = sshll.u32 %s6647_s23, 4  ;;  %s6629_s23 = sld [smem:[#allocation6_spill]] }
 0x323   : > { %v1951_v18 = vmul.f32 %v1935_v41, %v1120_v40  ;;  %v1188_v40 = vld [vmem:[%s5120_s6 + $0x78] sm:$0xff]  ;;  %v1106_v17 = vld [vmem:[%s1098_s16] sm:$0xff]  ;;  %s1094_s1 = scalar_lea.vmem %s6628_s18, %s3888_s26  ;;  %s5045_s16 = smov 96  }
 0x324   : > { %4617 = vmatpush3.bf16.msra.mxu0 %v4616_v31  ;;  %v4628_v5 = vpack.c.bf16 %v1188_v40, %v1187_v16  ;;  %v4679_v31 = vpack.c.bf16 %v1191_v27, %v1190_v26  ;;  %v1199_v16 = vld [vmem:[%s5130_s20 + $0x48] sm:$0xff]  ;;  %v2363_v26 = vld [vmem:[%s5160_s4 + $0x30] sm:$0xff]  ;;  %v2364_v27 = vld [vmem:[%s5160_s4 + $0x38] sm:$0xff]  ;;  %s5046_s18 = smov 112   ;;  %s6631_s26 = sld [smem:[#allocation3_spill]] }
 0x325   : > { %v4649_v28 = vpack.c.bf16 %v1951_v18, %v1950_v43  ;;  %v1514_v47 = vpop.permute.xlu1 %1513  ;;  %4618 = vmatprep.subr.bf16.mxu0 %v5033_v3  ;;  %v4738_v30 = vpack.c.bf16 %v2364_v27, %v2363_v26 }
 0x326   : > { %v1835_v12 = vsel %vm1819_vm1, %v5473_v11, %v1514_v47  ;;  %v1131_v47 = vld [vmem:[%s5080_s25] sm:$0xff] }
 0x327   : > { %4650 = vmatpush3.bf16.msra.mxu1 %v4649_v28 }
 0x328   : > { %4651 = vmatprep.subr.bf16.mxu1 %v5033_v3  ;;  %4620 = vmatpush3.bf16.msra.mxu0 %v4619_v48  ;;  %v1194_v48 = vld [vmem:[%s5130_s20 + $0x20] sm:$0xff] }
 0x329   : > { %v1562_v34 = vpop.permute.xlu1 %1561  ;;  %4621 = vmatprep.subr.bf16.mxu0 %v5033_v3  ;;  %v4685_v0 = vpack.c.bf16 %v1195_v56, %v1194_v48  ;;  %v3870_v56 = vld [vmem:[%s6629_s23] ss:$0 sm:$0xff]  ;;  %s6636_s23 = sld [smem:[#allocation4_spill]] }
 0x32a   : > { %v1852_v61 = vsel %vm1836_vm2, %v1835_v12, %v1562_v34  ;;  %v4655_v34 = vpack.c.bf16 %v1132_v50, %v1131_v47  ;;  %v4664_v12 = vpack.c.bf16 %v1138_v7, %v1137_v62  ;;  %v1204_v47 = vld [vmem:[%s5130_s20 + $0x70] sm:$0xff]  ;;  %v1205_v50 = vld [vmem:[%s5130_s20 + $0x78] sm:$0xff]  ;;  %v2340_v7 = vld [vmem:[%s5150_s8] sm:$0xff] }
 0x32c   : > { %4623 = vmatpush3.bf16.msra.mxu0 %v4622_v55  ;;  %v1196_v55 = vld [vmem:[%s5130_s20 + $0x30] sm:$0xff] }
 0x32d   : > { %v1610_v57 = vpop.permute.xlu1 %1609  ;;  %4624 = vmatprep.subr.bf16.mxu0 %v5033_v3  ;;  %v4688_v35 = vpack.c.bf16 %v1197_v4, %v1196_v55 }
 0x32e   : > { %v1869_v37 = vsel %vm1853_vm3, %v1852_v61, %v1610_v57  ;;  %v1134_v57 = vld [vmem:[%s5080_s25 + $0x18] sm:$0xff] }
 0x330   : > { %4626 = vmatpush3.bf16.msra.mxu0 %v4625_v36  ;;  %v1198_v36 = vld [vmem:[%s5130_s20 + $0x40] sm:$0xff] }
 0x331   : > { %v1658_v60 = vpop.permute.xlu1 %1657  ;;  %4627 = vmatprep.subr.bf16.mxu0 %v5033_v3  ;;  %v4691_v40 = vpack.c.bf16 %v1199_v16, %v1198_v36 }
 0x332   : > { %v1886_v45 = vsel %vm1870_vm4, %v1869_v37, %v1658_v60  ;;  %v4658_v60 = vpack.c.bf16 %v1134_v57, %v1133_v49  ;;  %v1126_v37 = vld [vmem:[%s5075_s21 + $0x18] sm:$0xff] }
 0x334   : > { %4629 = vmatpush3.bf16.msra.mxu0 %v4628_v5  ;;  %v1200_v5 = vld [vmem:[%s5130_s20 + $0x50] sm:$0xff] }
 0x335   : > { %v1706_v53 = vpop.permute.xlu1 %1705  ;;  %4654 = vmatprep.subr.bf16.mxu0 %v5033_v3 }
 0x336   : > { %v1903_v11 = vsel %vm1887_vm5, %v1886_v45, %v1706_v53  ;;  %v1136_v53 = vld [vmem:[%s5080_s25 + $0x28] sm:$0xff] }
 0x337   : > { %4235 = vmatmul.mubr.f32.vlgmr.msra.gmra.mrb[2].mxu0 %v5822_v32  ;;  %v4661_v54 = vpack.c.bf16 %v1136_v53, %v1135_v52  ;;  %v2357_v53 = vld [vmem:[%s5160_s4] sm:$0xff] }
 0x338   : > { %4288 = vmatprep.mubr.msk.f32.mxu0 %vm5034_vm0, %v5035_v6  ;;  %4656 = vmatpush3.bf16.msra.mxu0 %v4655_v34  ;;  %v4700_v34 = vpack.c.bf16 %v1205_v50, %v1204_v47 }
 0x339   : > { %v1754_v8 = vpop.permute.xlu1 %1753  ;;  %4657 = vmatprep.subr.bf16.mxu0 %v5033_v3 }
 0x33a   : > { %v1920_v29 = vsel %vm1904_vm6, %v1903_v11, %v1754_v8  ;;  %v1124_v8 = vld [vmem:[%s5075_s21 + $0x8] sm:$0xff] }
 0x33c   : > { %4659 = vmatpush3.bf16.msra.mxu0 %v4658_v60 }
 0x33d   : > { %v1802_v21 = vpop.permute.xlu1 %1801  ;;  %4660 = vmatprep.subr.bf16.mxu0 %v5033_v3 }
 0x33e   : > { %v1937_v13 = vsel %vm1921_vm7, %v1920_v29, %v1802_v21  ;;  %v1127_v29 = vld [vmem:[%s5075_s21 + $0x20] sm:$0xff]  ;;  %v1128_v21 = vld [vmem:[%s5075_s21 + $0x28] sm:$0xff] }
 0x33f   : > { %v1953_v24 = vmul.f32 %v1937_v13, %v1122_v2 }
 0x340   : > { %4662 = vmatpush3.bf16.msra.mxu0 %v4661_v54  ;;  %v2358_v54 = vld [vmem:[%s5160_s4 + $0x8] sm:$0xff] }
 0x341   : > { %v4652_v42 = vpack.c.bf16 %v1953_v24, %v1952_v14  ;;  %4663 = vmatprep.subr.bf16.mxu0 %v5033_v3  ;;  %v4726_v62 = vpack.c.bf16 %v2358_v54, %v2357_v53 }
 0x343   : > { %4653 = vmatpush3.bf16.msra.mxu1 %v4652_v42  ;;  %v1129_v42 = vld [vmem:[%s5075_s21 + $0x30] sm:$0xff] }
 0x344   : > { %4666 = vmatprep.subr.bf16.mxu1 %v5033_v3  ;;  %4665 = vmatpush3.bf16.msra.mxu0 %v4664_v12  ;;  %v2341_v12 = vld [vmem:[%s5150_s8 + $0x8] sm:$0xff] }
 0x345   : > { %4678 = vmatprep.subr.bf16.mxu0 %v5033_v3 }
 0x346   : > { %4270 = vmatmul.mubr.f32.vlgmr.msra.gmra.mrb[2].mxu1 %v1280_v20  ;;  %v1130_v20 = vld [vmem:[%s5075_s21 + $0x38] sm:$0xff] }
 0x347   : > { %4307 = vmatprep.mubr.msk.f32.mxu1 %vm5034_vm0, %v5035_v6 }
 0x40a   : > { %v1431_v61 = vpop.f32.mrb[2].mxu0 }
 0x40b   : > { %v1432_v9 = vadd.f32 %v3867_v58, %v1431_v61  ;;  %v4236_v45 = vpop.f32.mrb[3].mxu0  ;;  %v2342_v58 = vld [vmem:[%s5150_s8 + $0x10] sm:$0xff]  ;;  %v2343_v61 = vld [vmem:[%s5150_s8 + $0x18] sm:$0xff] }
 0x40c   : > { %v2346_v45 = vld [vmem:[%s5150_s8 + $0x30] sm:$0xff] }
 0x40d   : > { %v2106_v59 = vmul.f32 %v1432_v9, %v1123_v19  ;;  %v2107_v10 = vmul.f32 %v1432_v9, %v1124_v8  ;;  %v2108_v11 = vmul.f32 %v1432_v9, %v1125_v1  ;;  %v2109_v2 = vmul.f32 %v1432_v9, %v1126_v37  ;;  %v2344_v1 = vld [vmem:[%s5150_s8 + $0x20] sm:$0xff]  ;;  %v2345_v37 = vld [vmem:[%s5150_s8 + $0x28] sm:$0xff] }
 0x40e   : > { %v2110_v24 = vmul.f32 %v1432_v9, %v1127_v29  ;;  %v2111_v15 = vmul.f32 %v1432_v9, %v1128_v21  ;;  %v2112_v22 = vmul.f32 %v1432_v9, %v1129_v42  ;;  %v2113_v23 = vmul.f32 %v1432_v9, %v1130_v20  ;;  %v2350_v21 = vld [vmem:[%s5150_s8 + $0x50] sm:$0xff] }
 0x40f   : > { %v4667_v13 = vpack.c.bf16 %v2107_v10, %v2106_v59  ;;  %v4670_v14 = vpack.c.bf16 %v2109_v2, %v2108_v11  ;;  %v4703_v19 = vpack.c.bf16 %v2341_v12, %v2340_v7  ;;  %v4706_v8 = vpack.c.bf16 %v2343_v61, %v2342_v58  ;;  %v2347_v59 = vld [vmem:[%s5150_s8 + $0x38] sm:$0xff]  ;;  %v2348_v11 = vld [vmem:[%s5150_s8 + $0x40] sm:$0xff]  ;;  %v2349_v2 = vld [vmem:[%s5150_s8 + $0x48] sm:$0xff] }
 0x410   : > { %v4673_v39 = vpack.c.bf16 %v2111_v15, %v2110_v24  ;;  %v4676_v44 = vpack.c.bf16 %v2113_v23, %v2112_v22  ;;  %v4709_v9 = vpack.c.bf16 %v2345_v37, %v2344_v1  ;;  %v4712_v10 = vpack.c.bf16 %v2347_v59, %v2346_v45  ;;  %v2352_v24 = vld [vmem:[%s5150_s8 + $0x60] sm:$0xff]  ;;  %v2353_v15 = vld [vmem:[%s5150_s8 + $0x68] sm:$0xff]  ;;  %v2359_v20 = vld [vmem:[%s5160_s4 + $0x10] sm:$0xff] }
 0x411   : > { %4668 = vmatpush3.bf16.msra.mxu1 %v4667_v13  ;;  %v4715_v29 = vpack.c.bf16 %v2349_v2, %v2348_v11  ;;  %v2351_v13 = vld [vmem:[%s5150_s8 + $0x58] sm:$0xff]  ;;  %v4721_v42 = vpack.c.bf16 %v2353_v15, %v2352_v24  ;;  %v1104_v23 = vld [vmem:[%s1094_s1] sm:$0xff] }
 0x412   : > { %4669 = vmatprep.subr.bf16.mxu1 %v5033_v3 }
 0x415   : > { %4671 = vmatpush3.bf16.msra.mxu1 %v4670_v14  ;;  %v4718_v14 = vpack.c.bf16 %v2351_v13, %v2350_v21 }
 0x416   : > { %4672 = vmatprep.subr.bf16.mxu1 %v5033_v3 }
 0x419   : > { %v2020_v41 = vpop.f32.mrb[2].mxu1  ;;  %4674 = vmatpush3.bf16.msra.mxu1 %v4673_v39  ;;  %v2360_v39 = vld [vmem:[%s5160_s4 + $0x18] sm:$0xff] }
 0x41a   : > { %v2021_v43 = vadd.f32 %v2020_v41, %v1106_v17  ;;  %v4271_v18 = vpop.f32.mrb[3].mxu1  ;;  %4675 = vmatprep.subr.bf16.mxu1 %v5033_v3  ;;  %v1201_v17 = vld [vmem:[%s5130_s20 + $0x58] sm:$0xff]  ;;  %v4730_v22 = vpack.c.bf16 %v2360_v39, %v2359_v20 }
 0x41b   : > { %v4694_v41 = vpack.c.bf16 %v1201_v17, %v1200_v5  ;;  %v1203_v18 = vld [vmem:[%s5130_s20 + $0x68] sm:$0xff] }
 0x41c   : > { %v2025_v28 = vsel %vm2024_vm8, %v2021_v43, -inf }
 0x41d   : > { %2026 = vmax.xlane.f32.xlu0 %v2025_v28  ;;  %4677 = vmatpush3.bf16.msra.mxu1 %v4676_v44 }
 0x41e   : > { %4702 = vmatprep.subr.bf16.mxu1 %v5033_v3 }
 0x4aa   : > { %v2027_v33 = vpop.xlane.xlu0 %2026 }
 0x4ab   : > { %v2028_v25 = vsub.f32 %v2021_v43, %v2027_v33  ;;  %v1202_v43 = vld [vmem:[%s5130_s20 + $0x60] sm:$0xff] }
 0x4ac   : > { %v4697_v28 = vpack.c.bf16 %v1203_v18, %v1202_v43  ;;  %v2361_v33 = vld [vmem:[%s5160_s4 + $0x20] sm:$0xff] }
 0x4ad   : > { %v2029_v38 = vmul.f32 1.442695, %v2028_v25  ;;  %v2362_v25 = vld [vmem:[%s5160_s4 + $0x28] sm:$0xff] }
 0x4af   : > { %4975 = vpow2.f32 %v2029_v38 }
 0x4b9   : > { %v4976_v51 = vpop.eup %4975 }
 0x4ba   : > { %4289 = vmatmul.mubr.msk.f32.vlgmr.msra.gmra.mrb[4].mxu0 %vm2024_vm8, %v4976_v51 }
 0x4bb   : > { %4342 = vmatprep.mubr.msk.f32.mxu0 %vm5034_vm0, %v5035_v6  ;;  %4680 = vmatpush3.bf16.msra.mxu0 %v4679_v31  ;;  %v5916_v31 = vld [vmem:[%s1094_s1 + $0x8] sm:$0xff]  ;;  %s6635_s1 = sld [smem:[#allocation12_spill]] }
 0x4bc   : > { %4681 = vmatprep.subr.bf16.mxu0 %v5033_v3 }
 0x4bf   : > { %4683 = vmatpush3.bf16.msra.mxu0 %v4682_v46  ;;  %v2355_v46 = vld [vmem:[%s5150_s8 + $0x78] sm:$0xff] }
 0x4c0   : > { %4684 = vmatprep.subr.bf16.mxu0 %v5033_v3  ;;  %v4724_v48 = vpack.c.bf16 %v2355_v46, %v2354_v63 }
 0x4c3   : > { %4686 = vmatpush3.bf16.msra.mxu0 %v4685_v0 }
 0x4c4   : > { %4687 = vmatprep.subr.bf16.mxu0 %v5033_v3 }
 0x4c7   : > { %4689 = vmatpush3.bf16.msra.mxu0 %v4688_v35  ;;  %v3874_v35 = vld [vmem:[%s6630_s2] ss:$0 sm:$0xff]  ;;  %s6637_s2 = sld [smem:[#allocation13_spill]] }
 0x4c8   : > { %4690 = vmatprep.subr.bf16.mxu0 %v5033_v3 }
 0x4cb   : > { %4692 = vmatpush3.bf16.msra.mxu0 %v4691_v40 }
 0x4cc   : > { %4693 = vmatprep.subr.bf16.mxu0 %v5033_v3 }
 0x4cf   : > { %4695 = vmatpush3.bf16.msra.mxu0 %v4694_v41 }
 0x4d0   : > { %4696 = vmatprep.subr.bf16.mxu0 %v5033_v3 }
 0x4d3   : > { %4698 = vmatpush3.bf16.msra.mxu0 %v4697_v28 }
 0x4d4   : > { %4699 = vmatprep.subr.bf16.mxu0 %v5033_v3 }
 0x4d7   : > { %4701 = vmatpush3.bf16.msra.mxu0 %v4700_v34 }
 0x4d8   : > { %4727 = vmatprep.subr.bf16.mxu0 %v4726_v62 }
 0x58d   : > { %v2100_v49 = vpop.f32.mrb[4].mxu0 }
 0x58e   : > { %4977 = vrcp.f32 %v2100_v49  ;;  %v4290_v57 = vpop.f32.mrb[5].mxu0 }
 0x598   : > { %v4978_v60 = vpop.eup %4977 }
 0x599   : > { %v2105_v52 = vmul.f32 %v4978_v60, %v4976_v51  ;;  %v4734_v51 = vpack.c.bf16 %v2362_v25, %v2361_v33 }
 0x59b   : > { %4308 = vmatmul.mubr.msk.f32.vlgmr.msra.gmra.mrb[4].mxu1 %vm2024_vm8, %v2105_v52 }
 0x59c   : > { %4377 = vmatprep.mubr.msk.f32.mxu1 %vm5034_vm0, %v5035_v6  ;;  %4704 = vmatpush3.bf16.msra.mxu1 %v4703_v19 }
 0x59d   : > { %4705 = vmatprep.subr.bf16.mxu1 %v5033_v3 }
 0x5a0   : > { %4707 = vmatpush3.bf16.msra.mxu1 %v4706_v8 }
 0x5a1   : > { %4708 = vmatprep.subr.bf16.mxu1 %v5033_v3 }
 0x5a4   : > { %4710 = vmatpush3.bf16.msra.mxu1 %v4709_v9 }
 0x5a5   : > { %4711 = vmatprep.subr.bf16.mxu1 %v5033_v3 }
 0x5a8   : > { %4713 = vmatpush3.bf16.msra.mxu1 %v4712_v10 }
 0x5a9   : > { %4714 = vmatprep.subr.bf16.mxu1 %v5033_v3 }
 0x5ac   : > { %4716 = vmatpush3.bf16.msra.mxu1 %v4715_v29 }
 0x5ad   : > { %4717 = vmatprep.subr.bf16.mxu1 %v5033_v3 }
 0x5b0   : > { %4719 = vmatpush3.bf16.msra.mxu1 %v4718_v14 }
 0x5b1   : > { %4720 = vmatprep.subr.bf16.mxu1 %v5033_v3 }
 0x5b4   : > { %4722 = vmatpush3.bf16.msra.mxu1 %v4721_v42 }
 0x5b5   : > { %4723 = vmatprep.subr.bf16.mxu1 %v5033_v3 }
 0x5b8   : > { %4725 = vmatpush3.bf16.msra.mxu1 %v4724_v48  ;;  %v2292_v48 = vld [vmem:[%s6631_s26] sm:$0xff] }
 0x66e   : > { %v2183_v44 = vpop.f32.mrb[4].mxu1 }
 0x66f   : > { %v4309_v38 = vpop.f32.mrb[5].mxu1  ;;  %4343 = vmatmul.mubr.f32.vlgmr.msra.gmra.mrb[6].mxu0 %v2183_v44 }
 0x670   : > { %4729 = vmatpush3.bf16.msra.mxu0 %v4726_v62  ;;  %4396 = vmatprep.mubr.msk.f32.mxu0 %vm2024_vm8, %v1104_v23 }
 0x671   : > { %4731 = vmatprep.subr.bf16.mxu0 %v4730_v22 }
 0x674   : > { %4733 = vmatpush3.bf16.msra.mxu0 %v4730_v22 }
 0x675   : > { %4735 = vmatprep.subr.bf16.mxu0 %v4734_v51 }
 0x678   : > { %4737 = vmatpush3.bf16.msra.mxu0 %v4734_v51 }
 0x679   : > { %4739 = vmatprep.subr.bf16.mxu0 %v4738_v30 }
 0x67c   : > { %4741 = vmatpush3.bf16.msra.mxu0 %v4738_v30 }
 0x67d   : > { %4758 = vmatprep.subr.bf16.mxu0 %v5033_v3 }
 0x67f   : > { %4397 = vmatmul.mubr.msk.f32.vlgmr.msra.gmra.mrb[8].mxu0 %vm2024_vm8, %v5916_v31 }
 0x680   : > { %4450 = vmatprep.mubr.msk.f32.mxu0 %vm5034_vm0, %v5035_v6 }
 0x742   : > { %v2259_v0 = vpop.f32.mrb[6].mxu0 }
 0x743   : > { %v5926_v55 = vadd.f32 %v3870_v56, %v2259_v0  ;;  %v4344_v4 = vpop.f32.mrb[7].mxu0 }
 0x744   : > { %v2293_v4 = vld [vmem:[%s6631_s26 + $0x8] sm:$0xff] }
 0x745   : > { %4378 = vmatmul.mubr.f32.vlgmr.msra.gmra.mrb[6].mxu1 %v5926_v55 }
 0x746   : > { %4415 = vmatprep.mubr.msk.f32.mxu1 %vm2024_vm8, %v1104_v23 }
 0x752   : > { %v4398_v36 = vpop.f32.mrb[8].mxu0 }
 0x753   : > { %v2546_v16 = vpop.f32.mrb[9].mxu0  ;;  %v2552_v5 = vadd.f32 %v4398_v36, %v3874_v35 }
 0x754   : > { %v2547_v40 = vadd.f32 %v3874_v35, %v2546_v16 }
 0x756   : > { %2636 = vxpose.xlu1.b32.start [1/2] (short) %v2547_v40, 128 }
 0x75a   : > { %2637 = vxpose.xlu1.b32.end [2/2] (short) %v2552_v5, 128 }
 0x7d6   : > { %v5931_v17 = vpop.trf.xlu1 }
 0x7d7   : > { %2684 = vrot.lane.b32.xlu0 %v5931_v17, %s5036_s28 }
 0x7da   : > { %v5935_v41 = vpop.trf.xlu1 }
 0x7db   : > { %2732 = vrot.lane.b32.xlu0 %v5931_v17, %s5039_s7  ;;  %2686 = vrot.lane.b32.xlu1 %v5935_v41, %s5036_s28 }
 0x7de   : > { %v5941_v43 = vpop.trf.xlu1 }
 0x7df   : > { %2780 = vrot.lane.b32.xlu0 %v5931_v17, %s5040_s10 }
 0x7e2   : > { %v5945_v18 = vpop.trf.xlu1 }
 0x7e3   : > { %2828 = vrot.lane.b32.xlu0 %v5931_v17, %s5043_s11  ;;  %2882 = vrot.lane.b32.xlu1 %v5945_v18, %s5044_s15 }
 0x7e6   : > { %v5951_v28 = vpop.trf.xlu1 }
 0x7e7   : > { %2876 = vrot.lane.b32.xlu0 %v5931_v17, %s5044_s15  ;;  %2930 = vrot.lane.b32.xlu1 %v5945_v18, %s5045_s16 }
 0x7ea   : > { %v5961_v47 = vpop.trf.xlu1 }
 0x7eb   : > { %2924 = vrot.lane.b32.xlu0 %v5931_v17, %s5045_s16  ;;  %2978 = vrot.lane.b32.xlu1 %v5945_v18, %s5046_s18 }
 0x7ee   : > { %v5983_v50 = vpop.trf.xlu1 }
 0x7ef   : > { %2972 = vrot.lane.b32.xlu0 %v5931_v17, %s5046_s18  ;;  %2694 = vrot.lane.b32.xlu1 %v5961_v47, %s5036_s28 }
 0x7f2   : > { %v5993_v34 = vpop.trf.xlu1 }
 0x7f3   : > { %2734 = vrot.lane.b32.xlu0 %v5935_v41, %s5039_s7  ;;  %2742 = vrot.lane.b32.xlu1 %v5961_v47, %s5039_s7 }
 0x7f6   : > { %v6017_v60 = vpop.trf.xlu1 }
 0x7f7   : > { %2782 = vrot.lane.b32.xlu0 %v5935_v41, %s5040_s10  ;;  %2790 = vrot.lane.b32.xlu1 %v5961_v47, %s5040_s10 }
 0x7fa   : > { %v6027_v52 = vpop.trf.xlu1 }
 0x7fb   : > { %2830 = vrot.lane.b32.xlu0 %v5935_v41, %s5043_s11  ;;  %2838 = vrot.lane.b32.xlu1 %v5961_v47, %s5043_s11 }
 0x7fe   : > { %v6037_v53 = vpop.trf.xlu1 }
 0x7ff   : > { %2878 = vrot.lane.b32.xlu0 %v5935_v41, %s5044_s15  ;;  %2886 = vrot.lane.b32.xlu1 %v5961_v47, %s5044_s15 }
 0x802   : > { %v6047_v54 = vpop.trf.xlu1 }
 0x803   : > { %2926 = vrot.lane.b32.xlu0 %v5935_v41, %s5045_s16  ;;  %2934 = vrot.lane.b32.xlu1 %v5961_v47, %s5045_s16 }
 0x806   : > { %v6053_v62 = vpop.trf.xlu1 }
 0x807   : > { %2974 = vrot.lane.b32.xlu0 %v5935_v41, %s5046_s18  ;;  %2982 = vrot.lane.b32.xlu1 %v5961_v47, %s5046_s18 }
 0x80a   : > { %v6063_v7 = vpop.trf.xlu1 }
 0x80b   : > { %2688 = vrot.lane.b32.xlu0 %v5941_v43, %s5036_s28  ;;  %2698 = vrot.lane.b32.xlu1 %v5993_v34, %s5036_s28 }
 0x80e   : > { %v6069_v12 = vpop.trf.xlu1 }
 0x80f   : > { %2736 = vrot.lane.b32.xlu0 %v5941_v43, %s5039_s7  ;;  %2746 = vrot.lane.b32.xlu1 %v5993_v34, %s5039_s7 }
 0x812   : > { %v6075_v19 = vpop.trf.xlu1 }
 0x813   : > { %2784 = vrot.lane.b32.xlu0 %v5941_v43, %s5040_s10  ;;  %2794 = vrot.lane.b32.xlu1 %v5993_v34, %s5040_s10 }
 0x817   : > { %2832 = vrot.lane.b32.xlu0 %v5941_v43, %s5043_s11  ;;  %2842 = vrot.lane.b32.xlu1 %v5993_v34, %s5043_s11 }
 0x818   : > { %v6011_v49 = vpop.f32.mrb[6].mxu1 }
 0x819   : > { %v4379_v57 = vpop.f32.mrb[7].mxu1 }
 0x81b   : > { %2880 = vrot.lane.b32.xlu0 %v5941_v43, %s5044_s15  ;;  %2890 = vrot.lane.b32.xlu1 %v5993_v34, %s5044_s15 }
 0x81f   : > { %2928 = vrot.lane.b32.xlu0 %v5941_v43, %s5045_s16  ;;  %2938 = vrot.lane.b32.xlu1 %v5993_v34, %s5045_s16 }
 0x823   : > { %2976 = vrot.lane.b32.xlu0 %v5941_v43, %s5046_s18  ;;  %2986 = vrot.lane.b32.xlu1 %v5993_v34, %s5046_s18 }
 0x827   : > { %2690 = vrot.lane.b32.xlu0 %v5945_v18, %s5036_s28  ;;  %2702 = vrot.lane.b32.xlu1 %v6027_v52, %s5036_s28 }
 0x82b   : > { %2738 = vrot.lane.b32.xlu0 %v5945_v18, %s5039_s7  ;;  %2750 = vrot.lane.b32.xlu1 %v6027_v52, %s5039_s7 }
 0x82f   : > { %2786 = vrot.lane.b32.xlu0 %v5945_v18, %s5040_s10  ;;  %2798 = vrot.lane.b32.xlu1 %v6027_v52, %s5040_s10 }
 0x833   : > { %2834 = vrot.lane.b32.xlu0 %v5945_v18, %s5043_s11  ;;  %2846 = vrot.lane.b32.xlu1 %v6027_v52, %s5043_s11 }
 0x837   : > { %2692 = vrot.lane.b32.xlu0 %v5951_v28, %s5036_s28  ;;  %2894 = vrot.lane.b32.xlu1 %v6027_v52, %s5044_s15 }
 0x83b   : > { %2740 = vrot.lane.b32.xlu0 %v5951_v28, %s5039_s7  ;;  %2942 = vrot.lane.b32.xlu1 %v6027_v52, %s5045_s16 }
 0x83f   : > { %2788 = vrot.lane.b32.xlu0 %v5951_v28, %s5040_s10  ;;  %2990 = vrot.lane.b32.xlu1 %v6027_v52, %s5046_s18 }
 0x843   : > { %2836 = vrot.lane.b32.xlu0 %v5951_v28, %s5043_s11  ;;  %2706 = vrot.lane.b32.xlu1 %v6047_v54, %s5036_s28 }
 0x847   : > { %2884 = vrot.lane.b32.xlu0 %v5951_v28, %s5044_s15  ;;  %2754 = vrot.lane.b32.xlu1 %v6047_v54, %s5039_s7 }
 0x849   : > { %v2685_v58 = vpop.permute.xlu0 %2684 }
 0x84a   : > { %v3020_v22 = vsel %vm1836_vm2, %v5931_v17, %v2685_v58 }
 0x84b   : > { %2932 = vrot.lane.b32.xlu0 %v5951_v28, %s5045_s16  ;;  %2802 = vrot.lane.b32.xlu1 %v6047_v54, %s5040_s10 }
 0x84d   : > { %v2733_v61 = vpop.permute.xlu0 %2732  ;;  %v2687_v8 = vpop.permute.xlu1 %2686 }
 0x84e   : > { %v3036_v23 = vsel %vm1870_vm4, %v3020_v22, %v2733_v61  ;;  %v3021_v44 = vsel %vm1836_vm2, %v5935_v41, %v2687_v8 }
 0x84f   : > { %2980 = vrot.lane.b32.xlu0 %v5951_v28, %s5046_s18  ;;  %2850 = vrot.lane.b32.xlu1 %v6047_v54, %s5043_s11 }
 0x851   : > { %v2781_v1 = vpop.permute.xlu0 %2780 }
 0x852   : > { %v3052_v33 = vsel %vm1904_vm6, %v3036_v23, %v2781_v1 }
 0x853   : > { %2696 = vrot.lane.b32.xlu0 %v5983_v50, %s5036_s28  ;;  %2898 = vrot.lane.b32.xlu1 %v6047_v54, %s5044_s15 }
 0x855   : > { %v2829_v37 = vpop.permute.xlu0 %2828  ;;  %v6089_v9 = vpop.permute.xlu1 %2882 }
 0x856   : > { %v3068_v25 = vsel %vm2024_vm8, %v3052_v33, %v2829_v37 }
 0x857   : > { %2744 = vrot.lane.b32.xlu0 %v5983_v50, %s5039_s7  ;;  %2946 = vrot.lane.b32.xlu1 %v6047_v54, %s5045_s16 }
 0x859   : > { %v2877_v45 = vpop.permute.xlu0 %2876  ;;  %v6095_v59 = vpop.permute.xlu1 %2930 }
 0x85a   : > { %v3085_v27 = vsel %vm3084_vm9, %v3068_v25, %v2877_v45 }
 0x85b   : > { %2792 = vrot.lane.b32.xlu0 %v5983_v50, %s5040_s10  ;;  %2994 = vrot.lane.b32.xlu1 %v6047_v54, %s5046_s18 }
 0x85d   : > { %v2925_v10 = vpop.permute.xlu0 %2924  ;;  %v6101_v11 = vpop.permute.xlu1 %2978 }
 0x85e   : > { %v3102_v63 = vsel %vm3101_vm10, %v3085_v27, %v2925_v10 }
 0x85f   : > { %2840 = vrot.lane.b32.xlu0 %v5983_v50, %s5043_s11  ;;  %2710 = vrot.lane.b32.xlu1 %v6063_v7, %s5036_s28 }
 0x861   : > { %v2973_v2 = vpop.permute.xlu0 %2972  ;;  %v6107_v29 = vpop.permute.xlu1 %2694 }
 0x862   : > { %v3119_v56 = vsel %vm3118_vm11, %v3102_v63, %v2973_v2 }
 0x863   : > { %2888 = vrot.lane.b32.xlu0 %v5983_v50, %s5044_s15  ;;  %2758 = vrot.lane.b32.xlu1 %v6063_v7, %s5039_s7  ;;  %v3135_v5 = vmul.f32 %v3119_v56, %v2292_v48 }
 0x865   : > { %v2735_v21 = vpop.permute.xlu0 %2734  ;;  %v6113_v13 = vpop.permute.xlu1 %2742 }
 0x866   : > { %v3037_v38 = vsel %vm1870_vm4, %v3021_v44, %v2735_v21 }
 0x867   : > { %2936 = vrot.lane.b32.xlu0 %v5983_v50, %s5045_s16  ;;  %2806 = vrot.lane.b32.xlu1 %v6063_v7, %s5040_s10 }
 0x869   : > { %v2783_v14 = vpop.permute.xlu0 %2782  ;;  %v6119_v24 = vpop.permute.xlu1 %2790 }
 0x86a   : > { %v3053_v30 = vsel %vm1904_vm6, %v3037_v38, %v2783_v14 }
 0x86b   : > { %2984 = vrot.lane.b32.xlu0 %v5983_v50, %s5046_s18  ;;  %2854 = vrot.lane.b32.xlu1 %v6063_v7, %s5043_s11 }
 0x86d   : > { %v2831_v15 = vpop.permute.xlu0 %2830  ;;  %v6125_v42 = vpop.permute.xlu1 %2838 }
 0x86e   : > { %v3069_v46 = vsel %vm2024_vm8, %v3053_v30, %v2831_v15 }
 0x86f   : > { %2700 = vrot.lane.b32.xlu0 %v6017_v60, %s5036_s28  ;;  %2902 = vrot.lane.b32.xlu1 %v6063_v7, %s5044_s15 }
 0x871   : > { %v2879_v20 = vpop.permute.xlu0 %2878  ;;  %v6131_v39 = vpop.permute.xlu1 %2886 }
 0x872   : > { %v3086_v0 = vsel %vm3084_vm9, %v3069_v46, %v2879_v20 }
 0x873   : > { %2748 = vrot.lane.b32.xlu0 %v6017_v60, %s5039_s7  ;;  %2950 = vrot.lane.b32.xlu1 %v6063_v7, %s5045_s16 }
 0x875   : > { %v2927_v51 = vpop.permute.xlu0 %2926  ;;  %v6145_v26 = vpop.permute.xlu1 %2934 }
 0x876   : > { %v3103_v35 = vsel %vm3101_vm10, %v3086_v0, %v2927_v51 }
 0x877   : > { %2796 = vrot.lane.b32.xlu0 %v6017_v60, %s5040_s10  ;;  %2998 = vrot.lane.b32.xlu1 %v6063_v7, %s5046_s18 }
 0x879   : > { %v2975_v36 = vpop.permute.xlu0 %2974  ;;  %v6160_v16 = vpop.permute.xlu1 %2982 }
 0x87a   : > { %v3120_v40 = vsel %vm3118_vm11, %v3103_v35, %v2975_v36 }
 0x87b   : > { %v3136_v17 = vmul.f32 %v3120_v40, %v2293_v4  ;;  %2844 = vrot.lane.b32.xlu0 %v6017_v60, %s5043_s11  ;;  %2714 = vrot.lane.b32.xlu1 %v6075_v19, %s5036_s28  ;;  %v2294_v4 = vld [vmem:[%s6631_s26 + $0x10] sm:$0xff]  ;;  %v2295_v40 = vld [vmem:[%s6631_s26 + $0x18] sm:$0xff] }
 0x87d   : > { %v4759_v41 = vpack.c.bf16 %v3136_v17, %v3135_v5  ;;  %v2689_v57 = vpop.permute.xlu0 %2688  ;;  %v6167_v58 = vpop.permute.xlu1 %2698 }
 0x87e   : > { %v3022_v44 = vsel %vm1836_vm2, %v5941_v43, %v2689_v57 }
 0x87f   : > { %2892 = vrot.lane.b32.xlu0 %v6017_v60, %s5044_s15  ;;  %2762 = vrot.lane.b32.xlu1 %v6075_v19, %s5039_s7 }
 0x880   : > { %4760 = vmatpush3.bf16.msra.mxu0 %v4759_v41 }
 0x881   : > { %v2737_v61 = vpop.permute.xlu0 %2736  ;;  %4761 = vmatprep.subr.bf16.mxu0 %v5033_v3  ;;  %v6174_v8 = vpop.permute.xlu1 %2746 }
 0x882   : > { %v3038_v38 = vsel %vm1870_vm4, %v3022_v44, %v2737_v61 }
 0x883   : > { %2940 = vrot.lane.b32.xlu0 %v6017_v60, %s5045_s16  ;;  %2810 = vrot.lane.b32.xlu1 %v6075_v19, %s5040_s10 }
 0x885   : > { %v2785_v1 = vpop.permute.xlu0 %2784  ;;  %v6184_v37 = vpop.permute.xlu1 %2794 }
 0x886   : > { %v3054_v51 = vsel %vm1904_vm6, %v3038_v38, %v2785_v1 }
 0x887   : > { %2988 = vrot.lane.b32.xlu0 %v6017_v60, %s5046_s18  ;;  %2858 = vrot.lane.b32.xlu1 %v6075_v19, %s5043_s11 }
 0x889   : > { %v2833_v45 = vpop.permute.xlu0 %2832  ;;  %v6190_v2 = vpop.permute.xlu1 %2842 }
 0x88a   : > { %v3070_v30 = vsel %vm2024_vm8, %v3054_v51, %v2833_v45 }
 0x88b   : > { %2704 = vrot.lane.b32.xlu0 %v6037_v53, %s5036_s28  ;;  %2906 = vrot.lane.b32.xlu1 %v6075_v19, %s5044_s15 }
 0x88d   : > { %v2881_v10 = vpop.permute.xlu0 %2880  ;;  %v6200_v14 = vpop.permute.xlu1 %2890 }
 0x88e   : > { %v3087_v43 = vsel %vm3084_vm9, %v3070_v30, %v2881_v10 }
 0x88f   : > { %2752 = vrot.lane.b32.xlu0 %v6037_v53, %s5039_s7  ;;  %2954 = vrot.lane.b32.xlu1 %v6075_v19, %s5045_s16 }
 0x891   : > { %v2929_v21 = vpop.permute.xlu0 %2928  ;;  %v6204_v22 = vpop.permute.xlu1 %2938 }
 0x892   : > { %v3104_v56 = vsel %vm3101_vm10, %v3087_v43, %v2929_v21 }
 0x893   : > { %2800 = vrot.lane.b32.xlu0 %v6037_v53, %s5040_s10  ;;  %3002 = vrot.lane.b32.xlu1 %v6075_v19, %s5046_s18 }
 0x895   : > { %v2977_v15 = vpop.permute.xlu0 %2976  ;;  %v6212_v33 = vpop.permute.xlu1 %2986 }
 0x896   : > { %v3121_v35 = vsel %vm3118_vm11, %v3104_v56, %v2977_v15 }
 0x897   : > { %2848 = vrot.lane.b32.xlu0 %v6037_v53, %s5043_s11  ;;  %v3137_v57 = vmul.f32 %v3121_v35, %v2294_v4 }
 0x899   : > { %v2691_v20 = vpop.permute.xlu0 %2690 }
 0x89a   : > { %v3023_v27 = vsel %vm1836_vm2, %v5945_v18, %v2691_v20  ;;  %v6228_v18 = vpop.permute.xlu1 %2702 }
 0x89b   : > { %2896 = vrot.lane.b32.xlu0 %v6037_v53, %s5044_s15 }
 0x89d   : > { %v2739_v23 = vpop.permute.xlu0 %2738 }
 0x89e   : > { %v3039_v63 = vsel %vm1870_vm4, %v3023_v27, %v2739_v23  ;;  %v6241_v45 = vpop.permute.xlu1 %2750  ;;  %v3025_v23 = vsel %vm1836_vm2, %v5961_v47, %v6107_v29 }
 0x89f   : > { %2944 = vrot.lane.b32.xlu0 %v6037_v53, %s5045_s16  ;;  %v3041_v44 = vsel %vm1870_vm4, %v3025_v23, %v6113_v13 }
 0x8a1   : > { %v2787_v25 = vpop.permute.xlu0 %2786 }
 0x8a2   : > { %v3055_v46 = vsel %vm1904_vm6, %v3039_v63, %v2787_v25  ;;  %v6246_v10 = vpop.permute.xlu1 %2798  ;;  %v2296_v63 = vld [vmem:[%s6631_s26 + $0x20] sm:$0xff] }
 0x8a3   : > { %2992 = vrot.lane.b32.xlu0 %v6037_v53, %s5046_s18 }
 0x8a5   : > { %v2835_v48 = vpop.permute.xlu0 %2834 }
 0x8a6   : > { %v3071_v0 = vsel %vm2024_vm8, %v3055_v46, %v2835_v48  ;;  %v6257_v15 = vpop.permute.xlu1 %2846 }
 0x8a7   : > { %v3088_v36 = vsel %vm3084_vm9, %v3071_v0, %v6089_v9  ;;  %2708 = vrot.lane.b32.xlu0 %v6053_v62, %s5036_s28 }
 0x8a8   : > { %v3105_v5 = vsel %vm3101_vm10, %v3088_v36, %v6095_v59 }
 0x8a9   : > { %v3122_v17 = vsel %vm3118_vm11, %v3105_v5, %v6101_v11  ;;  %v2693_v41 = vpop.permute.xlu0 %2692  ;;  %v6252_v11 = vadd.f32 %v5822_v32, %v5926_v55  ;;  %v3057_v32 = vsel %vm1904_vm6, %v3041_v44, %v6119_v24  ;;  %v2298_v44 = vld [vmem:[%s6631_s26 + $0x30] sm:$0xff] }
 0x8aa   : > { %v3138_v61 = vmul.f32 %v3122_v17, %v2295_v40  ;;  %v3024_v55 = vsel %vm1836_vm2, %v5951_v28, %v2693_v41  ;;  %v3073_v25 = vsel %vm2024_vm8, %v3057_v32, %v6125_v42  ;;  %v6278_v27 = vpop.permute.xlu1 %2894  ;;  %v2297_v28 = vld [vmem:[%s6631_s26 + $0x28] sm:$0xff]  ;;  %v3027_v41 = vsel %vm1836_vm2, %v5993_v34, %v6167_v58 }
 0x8ab   : > { %2756 = vrot.lane.b32.xlu0 %v6053_v62, %s5039_s7  ;;  %v3090_v47 = vsel %vm3084_vm9, %v3073_v25, %v6131_v39 }
 0x8ac   : > { %v4762_v1 = vpack.c.bf16 %v3138_v61, %v3137_v57  ;;  %v3107_v13 = vsel %vm3101_vm10, %v3090_v47, %v6145_v26  ;;  %v3043_v57 = vsel %vm1870_vm4, %v3027_v41, %v6174_v8 }
 0x8ad   : > { %v2741_v9 = vpop.permute.xlu0 %2740  ;;  %v3124_v42 = vsel %vm3118_vm11, %v3107_v13, %v6160_v16 }
 0x8ae   : > { %4763 = vmatpush3.bf16.msra.mxu0 %v4762_v1  ;;  %v3040_v38 = vsel %vm1870_vm4, %v3024_v55, %v2741_v9  ;;  %v3140_v26 = vmul.f32 %v3124_v42, %v2297_v28  ;;  %v2943_v56 = vpop.permute.xlu1 %2942  ;;  %v3059_v1 = vsel %vm1904_vm6, %v3043_v57, %v6184_v37 }
 0x8af   : > { %2804 = vrot.lane.b32.xlu0 %v6053_v62, %s5040_s10  ;;  %4764 = vmatprep.subr.bf16.mxu0 %v5033_v3 }
 0x8b1   : > { %v2789_v59 = vpop.permute.xlu0 %2788 }
 0x8b2   : > { %v3056_v29 = vsel %vm1904_vm6, %v3040_v38, %v2789_v59  ;;  %v2991_v35 = vpop.permute.xlu1 %2990  ;;  %v3075_v59 = vsel %vm2024_vm8, %v3059_v1, %v6190_v2 }
 0x8b3   : > { %2852 = vrot.lane.b32.xlu0 %v6053_v62, %s5043_s11  ;;  %v3092_v8 = vsel %vm3084_vm9, %v3075_v59, %v6200_v14 }
 0x8b5   : > { %v2837_v21 = vpop.permute.xlu0 %2836 }
 0x8b6   : > { %v3072_v24 = vsel %vm2024_vm8, %v3056_v29, %v2837_v21  ;;  %v6299_v40 = vpop.permute.xlu1 %2706 }
 0x8b7   : > { %2900 = vrot.lane.b32.xlu0 %v6053_v62, %s5044_s15  ;;  %2266 = vadd.xlane.f32.xlu1 %v6252_v11 }
 0x8b9   : > { %v2885_v20 = vpop.permute.xlu0 %2884 }
 0x8ba   : > { %v3089_v30 = vsel %vm3084_vm9, %v3072_v24, %v2885_v20  ;;  %v6308_v61 = vpop.permute.xlu1 %2754  ;;  %v3109_v20 = vsel %vm3101_vm10, %v3092_v8, %v6204_v22 }
 0x8bb   : > { %2948 = vrot.lane.b32.xlu0 %v6053_v62, %s5045_s16  ;;  %v3126_v37 = vsel %vm3118_vm11, %v3109_v20, %v6212_v33 }
 0x8bd   : > { %v2933_v51 = vpop.permute.xlu0 %2932 }
 0x8be   : > { %v3106_v39 = vsel %vm3101_vm10, %v3089_v30, %v2933_v51  ;;  %v2803_v32 = vpop.permute.xlu1 %2802 }
 0x8bf   : > { %2996 = vrot.lane.b32.xlu0 %v6053_v62, %s5046_s18 }
 0x8c1   : > { %v2981_v43 = vpop.permute.xlu0 %2980 }
 0x8c2   : > { %v3123_v46 = vsel %vm3118_vm11, %v3106_v39, %v2981_v43  ;;  %v2851_v29 = vpop.permute.xlu1 %2850 }
 0x8c3   : > { %v3139_v48 = vmul.f32 %v3123_v46, %v2296_v63  ;;  %2712 = vrot.lane.b32.xlu0 %v6069_v12, %s5036_s28  ;;  %v3029_v63 = vsel %vm1836_vm2, %v6027_v52, %v6228_v18  ;;  %s6632_s28 = sld [smem:[#allocation9_spill]] }
 0x8c4   : > { %v3045_v39 = vsel %vm1870_vm4, %v3029_v63, %v6241_v45 }
 0x8c5   : > { %v4765_v0 = vpack.c.bf16 %v3140_v26, %v3139_v48  ;;  %v2697_v4 = vpop.permute.xlu0 %2696  ;;  %v3061_v43 = vsel %vm1904_vm6, %v3045_v39, %v6246_v10  ;;  %v2301_v10 = vld [vmem:[%s6631_s26 + $0x48] sm:$0xff] }
 0x8c6   : > { %v3026_v9 = vsel %vm1836_vm2, %v5983_v50, %v2697_v4  ;;  %v2299_v50 = vld [vmem:[%s6631_s26 + $0x38] sm:$0xff]  ;;  %v2899_v24 = vpop.permute.xlu1 %2898  ;;  %v3077_v26 = vsel %vm2024_vm8, %v3061_v43, %v6257_v15 }
 0x8c7   : > { %2760 = vrot.lane.b32.xlu0 %v6069_v12, %s5039_s7  ;;  %4766 = vmatpush3.bf16.msra.mxu0 %v4765_v0  ;;  %v3142_v38 = vmul.f32 %v3126_v37, %v2299_v50  ;;  %s6633_s7 = sld [smem:[#allocation11_spill]] }
 0x8c8   : > { %4767 = vmatprep.subr.bf16.mxu0 %v5033_v3 }
 0x8c9   : > { %v2745_v16 = vpop.permute.xlu0 %2744 }
 0x8ca   : > { %v3042_v34 = vsel %vm1870_vm4, %v3026_v9, %v2745_v16  ;;  %v2947_v42 = vpop.permute.xlu1 %2946  ;;  %v3094_v16 = vsel %vm3084_vm9, %v3077_v26, %v6278_v27 }
 0x8cb   : > { %2808 = vrot.lane.b32.xlu0 %v6069_v12, %s5040_s10  ;;  %v3111_v18 = vsel %vm3101_vm10, %v3094_v16, %v2943_v56  ;;  %s6634_s10 = sld [smem:[#allocation5_spill]] }
 0x8cd   : > { %v2793_v36 = vpop.permute.xlu0 %2792 }
 0x8ce   : > { %v3058_v21 = vsel %vm1904_vm6, %v3042_v34, %v2793_v36  ;;  %v2995_v48 = vpop.permute.xlu1 %2994  ;;  %v3128_v36 = vsel %vm3118_vm11, %v3111_v18, %v2991_v35 }
 0x8cf   : > { %2856 = vrot.lane.b32.xlu0 %v6069_v12, %s5043_s11  ;;  %v3144_v57 = vmul.f32 %v3128_v36, %v2301_v10  ;;  %s6638_s11 = sld [smem:[#allocation7_spill]] }
 0x8d1   : > { %v2841_v5 = vpop.permute.xlu0 %2840 }
 0x8d2   : > { %v3074_v23 = vsel %vm2024_vm8, %v3058_v21, %v2841_v5  ;;  %v2300_v5 = vld [vmem:[%s6631_s26 + $0x40] sm:$0xff]  ;;  %v2711_v1 = vpop.permute.xlu1 %2710 }
 0x8d3   : > { %2904 = vrot.lane.b32.xlu0 %v6069_v12, %s5044_s15  ;;  %s6639_s15 = sld [smem:[#allocation8_spill]] }
 0x8d5   : > { %v2889_v17 = vpop.permute.xlu0 %2888 }
 0x8d6   : > { %v3091_v2 = vsel %vm3084_vm9, %v3074_v23, %v2889_v17  ;;  %v2759_v56 = vpop.permute.xlu1 %2758  ;;  %v3031_v23 = vsel %vm1836_vm2, %v6047_v54, %v6299_v40 }
 0x8d7   : > { %2952 = vrot.lane.b32.xlu0 %v6069_v12, %s5045_s16  ;;  %v3047_v50 = vsel %vm1870_vm4, %v3031_v23, %v6308_v61  ;;  %v2303_v61 = vld [vmem:[%s6631_s26 + $0x58] sm:$0xff]  ;;  %s6640_s16 = sld [smem:[#allocation14_spill]] }
 0x8d8   : > { %v3063_v37 = vsel %vm1904_vm6, %v3047_v50, %v2803_v32 }
 0x8d9   : > { %v2937_v58 = vpop.permute.xlu0 %2936 }
 0x8da   : > { %v3108_v14 = vsel %vm3101_vm10, %v3091_v2, %v2937_v58  ;;  %v2807_v35 = vpop.permute.xlu1 %2806 }
 0x8db   : > { %3000 = vrot.lane.b32.xlu0 %v6069_v12, %s5046_s18  ;;  %s6641_s18 = sld [smem:[#allocation17_spill]] }
 0x8dd   : > { %v2985_v55 = vpop.permute.xlu0 %2984 }
 0x8de   : > { %v3125_v25 = vsel %vm3118_vm11, %v3108_v14, %v2985_v55  ;;  %v2855_v21 = vpop.permute.xlu1 %2854 }
 0x8df   : > { %v3141_v22 = vmul.f32 %v3125_v25, %v2298_v44  ;;  %v3079_v44 = vsel %vm2024_vm8, %v3063_v37, %v2851_v29 }
 0x8e0   : > { %v3096_v25 = vsel %vm3084_vm9, %v3079_v44, %v2899_v24 }
 0x8e1   : > { %v4768_v51 = vpack.c.bf16 %v3142_v38, %v3141_v22  ;;  %v2701_v47 = vpop.permute.xlu0 %2700  ;;  %v3113_v22 = vsel %vm3101_vm10, %v3096_v25, %v2947_v42 }
 0x8e2   : > { %v3028_v46 = vsel %vm1836_vm2, %v6017_v60, %v2701_v47  ;;  %v2903_v54 = vpop.permute.xlu1 %2902  ;;  %v3130_v32 = vsel %vm3118_vm11, %v3113_v22, %v2995_v48 }
 0x8e3   : > { %4769 = vmatpush3.bf16.msra.mxu0 %v4768_v51 }
 0x8e4   : > { %4770 = vmatprep.subr.bf16.mxu0 %v5033_v3 }
 0x8e5   : > { %v2749_v13 = vpop.permute.xlu0 %2748 }
 0x8e6   : > { %v3044_v0 = vsel %vm1870_vm4, %v3028_v46, %v2749_v13 }
 0x8e9   : > { %v2797_v33 = vpop.permute.xlu0 %2796 }
 0x8ea   : > { %v3060_v52 = vsel %vm1904_vm6, %v3044_v0, %v2797_v33  ;;  %v3146_v33 = vmul.f32 %v3130_v32, %v2303_v61  ;;  %v3033_v0 = vsel %vm1836_vm2, %v6063_v7, %v2711_v1  ;;  %v2304_v1 = vld [vmem:[%s6631_s26 + $0x60] sm:$0xff] }
 0x8ed   : > { %v2845_v28 = vpop.permute.xlu0 %2844 }
 0x8ee   : > { %v3076_v45 = vsel %vm2024_vm8, %v3060_v52, %v2845_v28  ;;  %v2951_v28 = vpop.permute.xlu1 %2950 }
 0x8f1   : > { %v2893_v30 = vpop.permute.xlu0 %2892 }
 0x8f2   : > { %v3093_v60 = vsel %vm3084_vm9, %v3076_v45, %v2893_v30  ;;  %v2999_v39 = vpop.permute.xlu1 %2998 }
 0x8f5   : > { %v2941_v4 = vpop.permute.xlu0 %2940 }
 0x8f6   : > { %v3110_v15 = vsel %vm3101_vm10, %v3093_v60, %v2941_v4  ;;  %v2715_v46 = vpop.permute.xlu1 %2714  ;;  %v3049_v4 = vsel %vm1870_vm4, %v3033_v0, %v2759_v56  ;;  %v2369_v0 = vld [vmem:[%s6633_s7 + $0x18] sm:$0xff] }
 0x8f7   : > { %v3065_v52 = vsel %vm1904_vm6, %v3049_v4, %v2807_v35  ;;  %v3035_v44 = vsel %vm1836_vm2, %v6075_v19, %v2715_v46  ;;  %v2367_v46 = vld [vmem:[%s6633_s7 + $0x8] sm:$0xff] }
 0x8f8   : > { %v3081_v45 = vsel %vm2024_vm8, %v3065_v52, %v2855_v21  ;;  %v2371_v52 = vld [vmem:[%s6633_s7 + $0x28] sm:$0xff] }
 0x8f9   : > { %v2989_v17 = vpop.permute.xlu0 %2988  ;;  %v3098_v60 = vsel %vm3084_vm9, %v3081_v45, %v2903_v54  ;;  %v2373_v45 = vld [vmem:[%s6633_s7 + $0x38] sm:$0xff] }
 0x8fa   : > { %v3127_v41 = vsel %vm3118_vm11, %v3110_v15, %v2989_v17  ;;  %v2763_v16 = vpop.permute.xlu1 %2762  ;;  %v3115_v15 = vsel %vm3101_vm10, %v3098_v60, %v2951_v28  ;;  %v2305_v17 = vld [vmem:[%s6631_s26 + $0x68] sm:$0xff] }
 0x8fb   : > { %v3143_v27 = vmul.f32 %v3127_v41, %v2300_v5  ;;  %v3132_v41 = vsel %vm3118_vm11, %v3115_v15, %v2999_v39  ;;  %v2325_v60 = vld [vmem:[%s6634_s10 + $0x8] sm:$0xff]  ;;  %v2326_v15 = vld [vmem:[%s6634_s10 + $0x10] sm:$0xff] }
 0x8fc   : > { %v3148_v56 = vmul.f32 %v3132_v41, %v2305_v17  ;;  %v2328_v41 = vld [vmem:[%s6634_s10 + $0x20] sm:$0xff] }
 0x8fd   : > { %v4771_v9 = vpack.c.bf16 %v3144_v57, %v3143_v27  ;;  %v2705_v59 = vpop.permute.xlu0 %2704 }
 0x8fe   : > { %v3030_v2 = vsel %vm1836_vm2, %v6037_v53, %v2705_v59  ;;  %v2302_v53 = vld [vmem:[%s6631_s26 + $0x50] sm:$0xff] }
 0x8ff   : > { %4772 = vmatpush3.bf16.msra.mxu0 %v4771_v9 }
 0x900   : > { %4773 = vmatprep.subr.bf16.mxu0 %v5033_v3 }
 0x901   : > { %v2753_v34 = vpop.permute.xlu0 %2752 }
 0x902   : > { %v3046_v14 = vsel %vm1870_vm4, %v3030_v2, %v2753_v34 }
 0x905   : > { %v2801_v58 = vpop.permute.xlu0 %2800 }
 0x906   : > { %v3062_v38 = vsel %vm1904_vm6, %v3046_v14, %v2801_v58  ;;  %v3051_v14 = vsel %vm1870_vm4, %v3035_v44, %v2763_v16  ;;  %v2370_v16 = vld [vmem:[%s6633_s7 + $0x20] sm:$0xff] }
 0x909   : > { %v2849_v8 = vpop.permute.xlu0 %2848 }
 0x90a   : > { %v3078_v40 = vsel %vm2024_vm8, %v3062_v38, %v2849_v8 }
 0x90d   : > { %v2897_v20 = vpop.permute.xlu0 %2896 }
 0x90e   : > { %v3095_v51 = vsel %vm3084_vm9, %v3078_v40, %v2897_v20 }
 0x911   : > { %v2945_v55 = vpop.permute.xlu0 %2944 }
 0x912   : > { %v3112_v47 = vsel %vm3101_vm10, %v3095_v51, %v2945_v55 }
 0x915   : > { %v2993_v29 = vpop.permute.xlu0 %2992 }
 0x916   : > { %v3129_v13 = vsel %vm3118_vm11, %v3112_v47, %v2993_v29  ;;  %v2306_v29 = vld [vmem:[%s6631_s26 + $0x70] sm:$0xff] }
 0x917   : > { %v3145_v24 = vmul.f32 %v3129_v13, %v2302_v53  ;;  %v2307_v53 = vld [vmem:[%s6631_s26 + $0x78] sm:$0xff] }
 0x919   : > { %v4774_v30 = vpack.c.bf16 %v3146_v33, %v3145_v24  ;;  %v2709_v63 = vpop.permute.xlu0 %2708 }
 0x91a   : > { %v3032_v18 = vsel %vm1836_vm2, %v6053_v62, %v2709_v63  ;;  %v2811_v62 = vpop.permute.xlu1 %2810  ;;  %v3873_v63 = vld [vmem:[%s6632_s28] ss:$0 sm:$0xff]  ;;  %s6642_s28 = sld [smem:[#allocation19_spill]] }
 0x91b   : > { %4775 = vmatpush3.bf16.msra.mxu0 %v4774_v30  ;;  %v3067_v55 = vsel %vm1904_vm6, %v3051_v14, %v2811_v62  ;;  %v2465_v39 = vadd.f32 %v3873_v63, %v6011_v49  ;;  %v4750_v49 = vpack.c.bf16 %v2371_v52, %v2370_v16  ;;  %v2330_v62 = vld [vmem:[%s6634_s10 + $0x30] sm:$0xff]  ;;  %v2321_v16 = vld [vmem:[%s6636_s23 + $0x68] sm:$0xff] }
 0x91c   : > { %4776 = vmatprep.subr.bf16.mxu0 %v5033_v3  ;;  %v2338_v14 = vld [vmem:[%s6634_s10 + $0x70] sm:$0xff] }
 0x91d   : > { %v2757_v42 = vpop.permute.xlu0 %2756 }
 0x91e   : > { %v3048_v10 = vsel %vm1870_vm4, %v3032_v18, %v2757_v42  ;;  %v2859_v8 = vpop.permute.xlu1 %2858  ;;  %v2372_v18 = vld [vmem:[%s6633_s7 + $0x30] sm:$0xff] }
 0x91f   : > { %v3083_v38 = vsel %vm2024_vm8, %v3067_v55, %v2859_v8  ;;  %v2332_v8 = vld [vmem:[%s6634_s10 + $0x40] sm:$0xff]  ;;  %v2339_v55 = vld [vmem:[%s6634_s10 + $0x78] sm:$0xff] }
 0x921   : > { %v2805_v43 = vpop.permute.xlu0 %2804 }
 0x922   : > { %v3064_v5 = vsel %vm1904_vm6, %v3048_v10, %v2805_v43  ;;  %v2907_v20 = vpop.permute.xlu1 %2906  ;;  %v2366_v43 = vld [vmem:[%s6633_s7] sm:$0xff]  ;;  %v4754_v10 = vpack.c.bf16 %v2373_v45, %v2372_v18 }
 0x923   : > { %v3100_v61 = vsel %vm3084_vm9, %v3083_v38, %v2907_v20  ;;  %v3877_v38 = vld [vmem:[%s6635_s1] ss:$0 sm:$0xff]  ;;  %s6643_s1 = sld [smem:[#allocation15_spill]] }
 0x925   : > { %v2853_v26 = vpop.permute.xlu0 %2852 }
 0x926   : > { %v3080_v7 = vsel %vm2024_vm8, %v3064_v5, %v2853_v26  ;;  %v2955_v37 = vpop.permute.xlu1 %2954  ;;  %v2368_v26 = vld [vmem:[%s6633_s7 + $0x10] sm:$0xff] }
 0x927   : > { %v3117_v19 = vsel %vm3101_vm10, %v3100_v61, %v2955_v37  ;;  %v4746_v4 = vpack.c.bf16 %v2369_v0, %v2368_v26  ;;  %v2336_v37 = vld [vmem:[%s6634_s10 + $0x60] sm:$0xff] }
 0x929   : > { %v2901_v48 = vpop.permute.xlu0 %2900 }
 0x92a   : > { %v3097_v57 = vsel %vm3084_vm9, %v3080_v7, %v2901_v48  ;;  %v3003_v22 = vpop.permute.xlu1 %3002  ;;  %v4742_v48 = vpack.c.bf16 %v2367_v46, %v2366_v43  ;;  %v2327_v7 = vld [vmem:[%s6634_s10 + $0x18] sm:$0xff] }
 0x92b   : > { %v3134_v47 = vsel %vm3118_vm11, %v3117_v19, %v3003_v22  ;;  %v4786_v17 = vpack.c.bf16 %v2327_v7, %v2326_v15  ;;  %v2308_v22 = vld [vmem:[%s6636_s23] sm:$0xff]  ;;  %v2313_v19 = vld [vmem:[%s6636_s23 + $0x28] sm:$0xff] }
 0x92c   : > { %v3150_v28 = vmul.f32 %v3134_v47, %v2307_v53  ;;  %4743 = vmatprep.subr.bf16.mxu1 %v4742_v48 }
 0x92d   : > { %v2949_v36 = vpop.permute.xlu0 %2948  ;;  %4745 = vmatpush3.bf16.msra.mxu1 %v4742_v48 }
 0x92e   : > { %v3114_v27 = vsel %vm3101_vm10, %v3097_v57, %v2949_v36  ;;  %4747 = vmatprep.subr.bf16.mxu1 %v4746_v4  ;;  %v2324_v36 = vld [vmem:[%s6634_s10] sm:$0xff]  ;;  %v2329_v57 = vld [vmem:[%s6634_s10 + $0x28] sm:$0xff] }
 0x92f   : > { %v4783_v5 = vpack.c.bf16 %v2325_v60, %v2324_v36  ;;  %v2323_v36 = vld [vmem:[%s6636_s23 + $0x78] sm:$0xff] }
 0x931   : > { %v2997_v9 = vpop.permute.xlu0 %2996  ;;  %4749 = vmatpush3.bf16.msra.mxu1 %v4746_v4  ;;  %v2320_v4 = vld [vmem:[%s6636_s23 + $0x60] sm:$0xff] }
 0x932   : > { %v3131_v59 = vsel %vm3118_vm11, %v3114_v27, %v2997_v9  ;;  %4751 = vmatprep.subr.bf16.mxu1 %v4750_v49  ;;  %v2331_v27 = vld [vmem:[%s6634_s10 + $0x38] sm:$0xff] }
 0x933   : > { %v3147_v34 = vmul.f32 %v3131_v59, %v2304_v1  ;;  %v4789_v1 = vpack.c.bf16 %v2329_v57, %v2328_v41  ;;  %v4792_v9 = vpack.c.bf16 %v2331_v27, %v2330_v62 }
 0x935   : > { %v4777_v58 = vpack.c.bf16 %v3148_v56, %v3147_v34  ;;  %v2713_v35 = vpop.permute.xlu0 %2712  ;;  %4753 = vmatpush3.bf16.msra.mxu1 %v4750_v49 }
 0x936   : > { %v3034_v25 = vsel %vm1836_vm2, %v6069_v12, %v2713_v35  ;;  %4755 = vmatprep.subr.bf16.mxu1 %v4754_v10 }
 0x937   : > { %4778 = vmatpush3.bf16.msra.mxu0 %v4777_v58 }
 0x938   : > { %4779 = vmatprep.subr.bf16.mxu0 %v5033_v3 }
 0x939   : > { %v2761_v21 = vpop.permute.xlu0 %2760  ;;  %4757 = vmatpush3.bf16.msra.mxu1 %v4754_v10  ;;  %v2322_v10 = vld [vmem:[%s6636_s23 + $0x70] sm:$0xff] }
 0x93a   : > { %v3050_v54 = vsel %vm1870_vm4, %v3034_v25, %v2761_v21  ;;  %4782 = vmatprep.subr.bf16.mxu1 %v5033_v3  ;;  %v2333_v21 = vld [vmem:[%s6634_s10 + $0x48] sm:$0xff]  ;;  %v4804_v25 = vpack.c.bf16 %v2339_v55, %v2338_v14  ;;  %v2381_v14 = vld [vmem:[%s6637_s2 + $0x30] sm:$0xff]  ;;  %v2382_v55 = vld [vmem:[%s6637_s2 + $0x38] sm:$0xff] }
 0x93b   : > { %v4795_v20 = vpack.c.bf16 %v2333_v21, %v2332_v8  ;;  %v2375_v21 = vld [vmem:[%s6637_s2] sm:$0xff] }
 0x93c   : > { %4416 = vmatmul.mubr.msk.f32.vlgmr.msra.gmra.mrb[8].mxu1 %vm2024_vm8, %v5916_v31 }
 0x93d   : > { %v2809_v23 = vpop.permute.xlu0 %2808  ;;  %4784 = vmatpush3.bf16.msra.mxu1 %v4783_v5  ;;  %4485 = vmatprep.mubr.msk.f32.mxu1 %vm5034_vm0, %v5035_v6 }
 0x93e   : > { %v3066_v32 = vsel %vm1904_vm6, %v3050_v54, %v2809_v23  ;;  %4785 = vmatprep.subr.bf16.mxu1 %v5033_v3  ;;  %v2335_v23 = vld [vmem:[%s6634_s10 + $0x58] sm:$0xff]  ;;  %v2309_v54 = vld [vmem:[%s6636_s23 + $0x8] sm:$0xff] }
 0x941   : > { %v2857_v50 = vpop.permute.xlu0 %2856  ;;  %4787 = vmatpush3.bf16.msra.mxu1 %v4786_v17 }
 0x942   : > { %v3082_v51 = vsel %vm2024_vm8, %v3066_v32, %v2857_v50  ;;  %4788 = vmatprep.subr.bf16.mxu1 %v5033_v3  ;;  %v2311_v32 = vld [vmem:[%s6636_s23 + $0x18] sm:$0xff] }
 0x944   : > { %v2267_v31 = vpop.xlane.xlu1 %2266 }
 0x945   : > { %v2905_v2 = vpop.permute.xlu0 %2904  ;;  %4790 = vmatpush3.bf16.msra.mxu1 %v4789_v1  ;;  %v2269_v59 = vmul.f32 0.0078125, %v2267_v31 }
 0x946   : > { %v3099_v12 = vsel %vm3084_vm9, %v3082_v51, %v2905_v2  ;;  %4791 = vmatprep.subr.bf16.mxu1 %v5033_v3  ;;  %v2337_v2 = vld [vmem:[%s6634_s10 + $0x68] sm:$0xff]  ;;  %v2315_v51 = vld [vmem:[%s6636_s23 + $0x38] sm:$0xff] }
 0x947   : > { %v6448_v56 = vsub.f32 %v6252_v11, %v2269_v59  ;;  %v2334_v11 = vld [vmem:[%s6634_s10 + $0x50] sm:$0xff]  ;;  %v4801_v44 = vpack.c.bf16 %v2337_v2, %v2336_v37  ;;  %v2379_v37 = vld [vmem:[%s6637_s2 + $0x20] sm:$0xff]  ;;  %v2380_v2 = vld [vmem:[%s6637_s2 + $0x28] sm:$0xff] }
 0x948   : > { %v4798_v50 = vpack.c.bf16 %v2335_v23, %v2334_v11  ;;  %v2377_v11 = vld [vmem:[%s6637_s2 + $0x10] sm:$0xff] }
 0x949   : > { %v2953_v40 = vpop.permute.xlu0 %2952  ;;  %4793 = vmatpush3.bf16.msra.mxu1 %v4792_v9  ;;  %v2271_v35 = vmul.f32 %v6448_v56, %v6448_v56 }
 0x94a   : > { %v3116_v13 = vsel %vm3101_vm10, %v3099_v12, %v2953_v40  ;;  %4794 = vmatprep.subr.bf16.mxu1 %v5033_v3  ;;  %v2310_v40 = vld [vmem:[%s6636_s23 + $0x10] sm:$0xff]  ;;  %v2312_v12 = vld [vmem:[%s6636_s23 + $0x20] sm:$0xff] }
 0x94d   : > { %v3001_v33 = vpop.permute.xlu0 %3000  ;;  %4796 = vmatpush3.bf16.msra.mxu1 %v4795_v20  ;;  %v2376_v20 = vld [vmem:[%s6637_s2 + $0x8] sm:$0xff] }
 0x94e   : > { %v3133_v24 = vsel %vm3118_vm11, %v3116_v13, %v3001_v33  ;;  %4797 = vmatprep.subr.bf16.mxu1 %v5033_v3  ;;  %v2316_v13 = vld [vmem:[%s6636_s23 + $0x40] sm:$0xff]  ;;  %v4831_v23 = vpack.c.bf16 %v2376_v20, %v2375_v21 }
 0x94f   : > { %v3149_v30 = vmul.f32 %v3133_v24, %v2306_v29  ;;  %v2314_v29 = vld [vmem:[%s6636_s23 + $0x30] sm:$0xff]  ;;  %v2317_v24 = vld [vmem:[%s6636_s23 + $0x48] sm:$0xff] }
 0x951   : > { %v4780_v42 = vpack.c.bf16 %v3150_v28, %v3149_v30  ;;  %4799 = vmatpush3.bf16.msra.mxu1 %v4798_v50  ;;  %v2318_v28 = vld [vmem:[%s6636_s23 + $0x50] sm:$0xff]  ;;  %v2319_v30 = vld [vmem:[%s6636_s23 + $0x58] sm:$0xff] }
 0x952   : > { %4800 = vmatprep.subr.bf16.mxu1 %v5033_v3  ;;  %v2378_v50 = vld [vmem:[%s6637_s2 + $0x18] sm:$0xff] }
 0x953   : > { %4781 = vmatpush3.bf16.msra.mxu0 %v4780_v42 }
 0x954   : > { %4806 = vmatprep.subr.bf16.mxu0 %v5033_v3 }
 0x955   : > { %4802 = vmatpush3.bf16.msra.mxu1 %v4801_v44  ;;  %v4837_v44 = vpack.c.bf16 %v2380_v2, %v2379_v37  ;;  %v3502_v37 = vld [vmem:[%s6641_s18 + $0x70] sm:$0xff] }
 0x956   : > { %4451 = vmatmul.mubr.f32.vlgmr.msra.gmra.mrb[10].mxu0 %v2465_v39  ;;  %4803 = vmatprep.subr.bf16.mxu1 %v5033_v3 }
 0x957   : > { %4520 = vmatprep.mubr.msk.f32.mxu0 %vm5034_vm0, %v5035_v6 }
 0x959   : > { %4805 = vmatpush3.bf16.msra.mxu1 %v4804_v25  ;;  %v4840_v25 = vpack.c.bf16 %v2382_v55, %v2381_v14  ;;  %v3507_v14 = vld [vmem:[%s6641_s18 + $0x98] sm:$0xff] }
 0x95a   : > { %4830 = vmatprep.subr.bf16.mxu1 %v5033_v3 }
 0xa0f   : > { %v4417_v61 = vpop.f32.mrb[8].mxu1 }
 0xa10   : > { %v2633_v53 = vadd.f32 %v4417_v61, %v3877_v38  ;;  %v2627_v47 = vpop.f32.mrb[9].mxu1  ;;  %v2386_v61 = vld [vmem:[%s6637_s2 + $0x58] sm:$0xff] }
 0xa11   : > { %v2628_v33 = vadd.f32 %v3877_v38, %v2627_v47  ;;  %v2383_v38 = vld [vmem:[%s6637_s2 + $0x40] sm:$0xff]  ;;  %v2389_v47 = vld [vmem:[%s6637_s2 + $0x70] sm:$0xff] }
 0xa12   : > { %v3299_v63 = vmul.f32 %v2633_v53, %v2309_v54  ;;  %v3301_v42 = vmul.f32 %v2633_v53, %v2311_v32  ;;  %v3303_v39 = vmul.f32 %v2633_v53, %v2313_v19  ;;  %v3305_v43 = vmul.f32 %v2633_v53, %v2315_v51  ;;  %v2387_v19 = vld [vmem:[%s6637_s2 + $0x60] sm:$0xff]  ;;  %v2388_v51 = vld [vmem:[%s6637_s2 + $0x68] sm:$0xff] }
 0xa13   : > { %v3298_v46 = vmul.f32 %v2628_v33, %v2308_v22  ;;  %v3300_v26 = vmul.f32 %v2628_v33, %v2310_v40  ;;  %v3302_v48 = vmul.f32 %v2628_v33, %v2312_v12  ;;  %v3304_v0 = vmul.f32 %v2628_v33, %v2314_v29  ;;  %v2384_v22 = vld [vmem:[%s6637_s2 + $0x48] sm:$0xff]  ;;  %v2385_v40 = vld [vmem:[%s6637_s2 + $0x50] sm:$0xff]  ;;  %v2390_v12 = vld [vmem:[%s6637_s2 + $0x78] sm:$0xff] }
 0xa14   : > { %v3306_v52 = vmul.f32 %v2628_v33, %v2316_v13  ;;  %v3307_v49 = vmul.f32 %v2633_v53, %v2317_v24  ;;  %v3308_v18 = vmul.f32 %v2628_v33, %v2318_v28  ;;  %v3309_v45 = vmul.f32 %v2633_v53, %v2319_v30 }
 0xa15   : > { %v4807_v60 = vpack.c.bf16 %v3299_v63, %v3298_v46  ;;  %v4810_v5 = vpack.c.bf16 %v3301_v42, %v3300_v26  ;;  %v4813_v15 = vpack.c.bf16 %v3303_v39, %v3302_v48  ;;  %v4816_v7 = vpack.c.bf16 %v3305_v43, %v3304_v0  ;;  %v3871_v26 = vld [vmem:[%s6638_s11] ss:$0 sm:$0xff]  ;;  %s6644_s11 = sld [smem:[#allocation16_spill]] }
 0xa16   : > { %v4819_v17 = vpack.c.bf16 %v3307_v49, %v3306_v52  ;;  %v4822_v41 = vpack.c.bf16 %v3309_v45, %v3308_v18  ;;  %v3310_v57 = vmul.f32 %v2628_v33, %v2320_v4  ;;  %v3311_v1 = vmul.f32 %v2633_v53, %v2321_v16  ;;  %v3872_v0 = vld [vmem:[%s6639_s15] ss:$0 sm:$0xff]  ;;  %v3489_v45 = vld [vmem:[%s6641_s18 + $0x8] sm:$0xff]  ;;  %s6645_s15 = sld [smem:[#allocation18_spill]] }
 0xa17   : > { %4808 = vmatpush3.bf16.msra.mxu0 %v4807_v60  ;;  %v3312_v62 = vmul.f32 %v2628_v33, %v2322_v10  ;;  %v3313_v27 = vmul.f32 %v2633_v53, %v2323_v36  ;;  %v4843_v54 = vpack.c.bf16 %v2384_v22, %v2383_v38  ;;  %v4846_v32 = vpack.c.bf16 %v2386_v61, %v2385_v40  ;;  %v3491_v10 = vld [vmem:[%s6641_s18 + $0x18] sm:$0xff]  ;;  %v3488_v36 = vld [vmem:[%s6641_s18] sm:$0xff]  ;;  %v3490_v60 = vld [vmem:[%s6641_s18 + $0x10] sm:$0xff] }
 0xa18   : > { %4809 = vmatprep.subr.bf16.mxu0 %v5033_v3  ;;  %v4825_v9 = vpack.c.bf16 %v3311_v1, %v3310_v57  ;;  %v4849_v53 = vpack.c.bf16 %v2388_v51, %v2387_v19  ;;  %v4852_v29 = vpack.c.bf16 %v2390_v12, %v2389_v47  ;;  %v3494_v57 = vld [vmem:[%s6641_s18 + $0x30] sm:$0xff]  ;;  %v3497_v1 = vld [vmem:[%s6641_s18 + $0x48] sm:$0xff]  ;;  %v3511_v40 = vld [vmem:[%s6641_s18 + $0xb8] sm:$0xff] }
 0xa19   : > { %v4828_v31 = vpack.c.bf16 %v3313_v27, %v3312_v62  ;;  %v3499_v62 = vld [vmem:[%s6641_s18 + $0x58] sm:$0xff]  ;;  %v3506_v38 = vld [vmem:[%s6641_s18 + $0x90] sm:$0xff]  ;;  %v3509_v22 = vld [vmem:[%s6641_s18 + $0xa8] sm:$0xff] }
 0xa1a   : > { %v3508_v61 = vld [vmem:[%s6641_s18 + $0xa0] sm:$0xff]  ;;  %v4874_v19 = vpack.c.bf16 %v3511_v40, %v3509_v22  ;;  %v3513_v51 = vld [vmem:[%s6641_s18 + $0xc8] sm:$0xff] }
 0xa1b   : > { %4811 = vmatpush3.bf16.msra.mxu0 %v4810_v5  ;;  %v3493_v5 = vld [vmem:[%s6641_s18 + $0x28] sm:$0xff] }
 0xa1c   : > { %4812 = vmatprep.subr.bf16.mxu0 %v5033_v3 }
 0xa1f   : > { %4814 = vmatpush3.bf16.msra.mxu0 %v4813_v15  ;;  %v3495_v15 = vld [vmem:[%s6641_s18 + $0x38] sm:$0xff] }
 0xa20   : > { %4815 = vmatprep.subr.bf16.mxu0 %v5033_v3 }
 0xa23   : > { %4817 = vmatpush3.bf16.msra.mxu0 %v4816_v7  ;;  %v4856_v7 = vpack.c.bf16 %v3490_v60, %v3488_v36  ;;  %v3610_v60 = vld [vmem:[%s6642_s28 + $0x28] sm:$0xff] }
 0xa24   : > { %4818 = vmatprep.subr.bf16.mxu0 %v5033_v3 }
 0xa27   : > { %4820 = vmatpush3.bf16.msra.mxu0 %v4819_v17  ;;  %v4858_v17 = vpack.c.bf16 %v3495_v15, %v3493_v5  ;;  %v3627_v5 = vld [vmem:[%s6642_s28 + $0xb0] sm:$0xff]  ;;  %v3628_v15 = vld [vmem:[%s6642_s28 + $0xb8] sm:$0xff] }
 0xa28   : > { %4821 = vmatprep.subr.bf16.mxu0 %v5033_v3 }
 0xa29   : > { %v6450_v34 = vpop.f32.mrb[10].mxu0 }
 0xa2a   : > { %3221 = vmax.xlane.f32.xlu0 %v6450_v34  ;;  %v4452_v58 = vpop.f32.mrb[11].mxu0 }
 0xa2b   : > { %4823 = vmatpush3.bf16.msra.mxu0 %v4822_v41  ;;  %v3492_v41 = vld [vmem:[%s6641_s18 + $0x20] sm:$0xff] }
 0xa2c   : > { %4824 = vmatprep.subr.bf16.mxu0 %v5033_v3  ;;  %v4860_v27 = vpack.c.bf16 %v3494_v57, %v3492_v41  ;;  %v3611_v41 = vld [vmem:[%s6642_s28 + $0x30] sm:$0xff]  ;;  %v3612_v57 = vld [vmem:[%s6642_s28 + $0x38] sm:$0xff] }
 0xa2e   : > { %2272 = vadd.xlane.f32.xlu0 %v2271_v35 }
 0xa2f   : > { %4826 = vmatpush3.bf16.msra.mxu0 %v4825_v9  ;;  %v4862_v9 = vpack.c.bf16 %v3499_v62, %v3497_v1  ;;  %v3629_v1 = vld [vmem:[%s6642_s28 + $0xc0] sm:$0xff]  ;;  %v3630_v62 = vld [vmem:[%s6642_s28 + $0xc8] sm:$0xff] }
 0xa30   : > { %4827 = vmatprep.subr.bf16.mxu0 %v5033_v3 }
 0xa33   : > { %4829 = vmatpush3.bf16.msra.mxu0 %v4828_v31  ;;  %v3496_v31 = vld [vmem:[%s6641_s18 + $0x40] sm:$0xff] }
 0xab7   : > { %v3222_v59 = vpop.xlane.xlu0 %3221 }
 0xab8   : > { %v3223_v58 = vsub.f32 %v6450_v34, %v3222_v59  ;;  %v4834_v34 = vpack.c.bf16 %v2378_v50, %v2377_v11  ;;  %v3498_v59 = vld [vmem:[%s6641_s18 + $0x50] sm:$0xff]  ;;  %v3501_v11 = vld [vmem:[%s6641_s18 + $0x68] sm:$0xff] }
 0xaba   : > { %v3224_v35 = vmul.f32 1.442695, %v3223_v58  ;;  %v4864_v58 = vpack.c.bf16 %v3498_v59, %v3496_v31  ;;  %v3613_v31 = vld [vmem:[%s6642_s28 + $0x40] sm:$0xff]  ;;  %v3614_v59 = vld [vmem:[%s6642_s28 + $0x48] sm:$0xff] }
 0xabb   : > { %v2273_v42 = vpop.xlane.xlu0 %2272 }
 0xabc   : > { %4979 = vpow2.f32 %v3224_v35  ;;  %v2274_v39 = vmul.f32 0.0078125, %v2273_v42  ;;  %v3518_v42 = vld [vmem:[%s6641_s18 + $0xf0] sm:$0xff] }
 0xac6   : > { %v4980_v8 = vpop.eup %4979 }
 0xac7   : > { %4486 = vmatmul.mubr.f32.vlgmr.msra.gmra.mrb[10].mxu1 %v4980_v8 }
 0xac8   : > { %4555 = vmatprep.mubr.msk.f32.mxu1 %vm5034_vm0, %v5035_v6  ;;  %4832 = vmatpush3.bf16.msra.mxu1 %v4831_v23  ;;  %v3503_v23 = vld [vmem:[%s6641_s18 + $0x78] sm:$0xff] }
 0xac9   : > { %4833 = vmatprep.subr.bf16.mxu1 %v5033_v3  ;;  %v4866_v50 = vpack.c.bf16 %v3503_v23, %v3501_v11  ;;  %v3615_v11 = vld [vmem:[%s6642_s28 + $0x50] sm:$0xff]  ;;  %v3616_v23 = vld [vmem:[%s6642_s28 + $0x58] sm:$0xff] }
 0xacc   : > { %4835 = vmatpush3.bf16.msra.mxu1 %v4834_v34  ;;  %v3500_v34 = vld [vmem:[%s6641_s18 + $0x60] sm:$0xff] }
 0xacd   : > { %4836 = vmatprep.subr.bf16.mxu1 %v5033_v3  ;;  %v4868_v2 = vpack.c.bf16 %v3502_v37, %v3500_v34  ;;  %v3634_v34 = vld [vmem:[%s6642_s28 + $0xe8] sm:$0xff]  ;;  %v4908_v37 = vpack.c.bf16 %v3616_v23, %v3615_v11 }
 0xad0   : > { %4838 = vmatpush3.bf16.msra.mxu1 %v4837_v44  ;;  %v3505_v44 = vld [vmem:[%s6641_s18 + $0x88] sm:$0xff] }
 0xad1   : > { %4839 = vmatprep.subr.bf16.mxu1 %v5033_v3  ;;  %v4870_v55 = vpack.c.bf16 %v3507_v14, %v3505_v44 }
 0xad4   : > { %4841 = vmatpush3.bf16.msra.mxu1 %v4840_v25  ;;  %v3504_v25 = vld [vmem:[%s6641_s18 + $0x80] sm:$0xff] }
 0xad5   : > { %4842 = vmatprep.subr.bf16.mxu1 %v5033_v3 }
 0xad8   : > { %4844 = vmatpush3.bf16.msra.mxu1 %v4843_v54  ;;  %v4872_v54 = vpack.c.bf16 %v3506_v38, %v3504_v25  ;;  %v3881_v38 = vld [vmem:[%s6643_s1] ss:$0 sm:$0xff] }
 0xad9   : > { %4845 = vmatprep.subr.bf16.mxu1 %v5033_v3 }
 0xadc   : > { %4847 = vmatpush3.bf16.msra.mxu1 %v4846_v32  ;;  %v3510_v32 = vld [vmem:[%s6641_s18 + $0xb0] sm:$0xff] }
 0xadd   : > { %4848 = vmatprep.subr.bf16.mxu1 %v5033_v3  ;;  %v4876_v47 = vpack.c.bf16 %v3510_v32, %v3508_v61  ;;  %v3617_v32 = vld [vmem:[%s6642_s28 + $0x60] sm:$0xff] }
 0xae0   : > { %4850 = vmatpush3.bf16.msra.mxu1 %v4849_v53  ;;  %v3515_v53 = vld [vmem:[%s6641_s18 + $0xd8] sm:$0xff] }
 0xae1   : > { %4851 = vmatprep.subr.bf16.mxu1 %v5033_v3  ;;  %v2275_v3 = vadd.f32 1e-05, %v2274_v39  ;;  %v4878_v12 = vpack.c.bf16 %v3515_v53, %v3513_v51  ;;  %v3635_v53 = vld [vmem:[%s6642_s28 + $0xf0] sm:$0xff] }
 0xae4   : > { %4853 = vmatpush3.bf16.msra.mxu1 %v4852_v29  ;;  %v3512_v29 = vld [vmem:[%s6641_s18 + $0xc0] sm:$0xff] }
 0xb9a   : > { %v3292_v13 = vpop.f32.mrb[10].mxu1 }
 0xb9b   : > { %4981 = vrcp.f32 %v3292_v13  ;;  %v4487_v33 = vpop.f32.mrb[11].mxu1  ;;  %v3514_v13 = vld [vmem:[%s6641_s18 + $0xd0] sm:$0xff] }
 0xb9c   : > { %4983 = vrsqrt.f32 %v2275_v3  ;;  %v3517_v33 = vld [vmem:[%s6641_s18 + $0xe8] sm:$0xff]  ;;  %v3621_v3 = vld [vmem:[%s6642_s28 + $0x80] sm:$0xff] }
 0xba5   : > { %v4982_v24 = vpop.eup %4981 }
 0xba6   : > { %v3297_v28 = vmul.f32 %v4982_v24, %v4980_v8  ;;  %v4984_v43 = vpop.eup %4983  ;;  %v3519_v24 = vld [vmem:[%s6641_s18 + $0xf8] sm:$0xff] }
 0xba7   : > { %v2277_v46 = vmul.f32 %v4984_v43, %v6448_v56  ;;  %v4854_v56 = vpack.c.bf16 %v3491_v10, %v3489_v45  ;;  %v3622_v43 = vld [vmem:[%s6642_s28 + $0x88] sm:$0xff] }
 0xba8   : > { %4521 = vmatmul.mubr.f32.vlgmr.msra.gmra.mrb[12].mxu0 %v3297_v28  ;;  %v4880_v28 = vpack.c.bf16 %v3514_v13, %v3512_v29  ;;  %v3626_v45 = vld [vmem:[%s6642_s28 + $0xa8] sm:$0xff]  ;;  %v3619_v29 = vld [vmem:[%s6642_s28 + $0x70] sm:$0xff]  ;;  %v3620_v13 = vld [vmem:[%s6642_s28 + $0x78] sm:$0xff] }
 0xba9   : > { %3596 = vmatprep.mubr.f32.mxu0 %v5035_v6  ;;  %v2284_v48 = vmul.f32 %v3871_v26, %v2277_v46  ;;  %v3880_v6 = vld [vmem:[%s6640_s16] ss:$0 sm:$0xff]  ;;  %4855 = vmatprep.subr.bf16.mxu0 %v4854_v56  ;;  %v4886_v26 = vpack.c.bf16 %v3622_v43, %v3621_v3  ;;  %s1102_s16 = scalar_lea.vmem %s5230_s27, %s5275_s0 }
 0xbaa   : > { %4857 = vmatpush1.bf16.msra.mxu0 %v4856_v7  ;;  %v3605_v46 = vld [vmem:[%s6642_s28] sm:$0xff] }
 0xbab   : > { %v2291_v16 = vadd.f32 %v3872_v0, %v2284_v48  ;;  %4859 = vmatprep.subr.bf16.mxu0 %v4858_v17  ;;  %v3606_v48 = vld [vmem:[%s6642_s28 + $0x8] sm:$0xff]  ;;  %v3623_v0 = vld [vmem:[%s6642_s28 + $0x90] sm:$0xff]  ;;  %4887 = vmatprep.subr.bf16.mxu1 %v4886_v26  ;;  %v3609_v56 = vld [vmem:[%s6642_s28 + $0x20] sm:$0xff]  ;;  %v4898_v17 = vpack.c.bf16 %v3628_v15, %v3627_v5 }
 0xbac   : > { %v4896_v7 = vpack.c.bf16 %v3610_v60, %v3609_v56 }
 0xbae   : > { %4861 = vmatpush1.bf16.msra.mxu0 %v4860_v27  ;;  %v4900_v27 = vpack.c.bf16 %v3612_v57, %v3611_v41  ;;  %v3885_v57 = vld [vmem:[%s5225_s3] ss:$0 sm:$0xff] }
 0xbaf   : > { %4863 = vmatprep.subr.bf16.mxu0 %v4862_v9  ;;  %v4902_v9 = vpack.c.bf16 %v3630_v62, %v3629_v1 }
 0xbb2   : > { %4865 = vmatpush1.bf16.msra.mxu0 %v4864_v58  ;;  %v3631_v58 = vld [vmem:[%s6642_s28 + $0xd0] sm:$0xff] }
 0xbb3   : > { %4867 = vmatprep.subr.bf16.mxu0 %v4866_v50  ;;  %v3633_v50 = vld [vmem:[%s6642_s28 + $0xe0] sm:$0xff] }
 0xbb6   : > { %4869 = vmatpush1.bf16.msra.mxu0 %v4868_v2  ;;  %v4910_v2 = vpack.c.bf16 %v3634_v34, %v3633_v50 }
 0xbb7   : > { %4871 = vmatprep.subr.bf16.mxu0 %v4870_v55 }
 0xbba   : > { %4873 = vmatpush1.bf16.msra.mxu0 %v4872_v54  ;;  %v3882_v54 = vld [vmem:[%s6644_s11] ss:$0 sm:$0xff] }
 0xbbb   : > { %4875 = vmatprep.subr.bf16.mxu0 %v4874_v19  ;;  %v3618_v19 = vld [vmem:[%s6642_s28 + $0x68] sm:$0xff] }
 0xbbc   : > { %v4912_v51 = vpack.c.bf16 %v3618_v19, %v3617_v32 }
 0xbbe   : > { %4877 = vmatpush1.bf16.msra.mxu0 %v4876_v47  ;;  %v3636_v47 = vld [vmem:[%s6642_s28 + $0xf8] sm:$0xff] }
 0xbbf   : > { %4879 = vmatprep.subr.bf16.mxu0 %v4878_v12  ;;  %v4914_v12 = vpack.c.bf16 %v3636_v47, %v3635_v53 }
 0xbc2   : > { %4881 = vmatpush1.bf16.msra.mxu0 %v4880_v28 }
 0xc7b   : > { %v3380_v30 = vpop.f32.mrb[12].mxu0 }
 0xc7c   : > { %v4522_v63 = vpop.f32.mrb[13].mxu0  ;;  %4556 = vmatmul.mubr.f32.vlgmr.msra.gmra.mrb[12].mxu1 %v3380_v30  ;;  %v4882_v30 = vpack.c.bf16 %v3519_v24, %v3517_v33  ;;  %v4916_v33 = vpack.c.bf16 %v3620_v13, %v3619_v29  ;;  %v3522_v24 = vlaneseq }
 0xc7d   : > { %v3516_v63 = vld [vmem:[%s6641_s18 + $0xe0] sm:$0xff] }
 0xc7e   : > { %v4884_v39 = vpack.c.bf16 %v3518_v42, %v3516_v63  ;;  %4883 = vmatprep.subr.bf16.mxu0 %v4882_v30  ;;  %v3520_v30 = vld [vmem:[%s6645_s15] sm:$0x3] }
 0xc80   : > { %4885 = vmatpush1.bf16.msra.mxu0 %v4884_v39 }
 0xd4f   : > { %v3456_v4 = vpop.f32.mrb[12].mxu1 }
 0xd50   : > { %v3457_v52 = vadd.f32 %v3880_v6, %v3456_v4  ;;  %v4557_v49 = vpop.f32.mrb[13].mxu1  ;;  %v3624_v6 = vld [vmem:[%s6642_s28 + $0x98] sm:$0xff]  ;;  %v4888_v4 = vpack.c.bf16 %v3606_v48, %v3605_v46 }
 0xd51   : > { %v3608_v49 = vld [vmem:[%s6642_s28 + $0x18] sm:$0xff] }
 0xd52   : > { %v3460_v18 = vadd.f32 %v3457_v52, %v2291_v16  ;;  %v4890_v16 = vpack.c.bf16 %v3624_v6, %v3623_v0  ;;  %v3607_v52 = vld [vmem:[%s6642_s28 + $0x10] sm:$0xff]  ;;  %4889 = vmatpush3.bf16.msra.mxu1 %v4888_v4  ;;  %v3883_v4 = vld [vmem:[%s5215_s29] ss:$0 sm:$0xff] }
 0xd53   : > { %v4892_v10 = vpack.c.bf16 %v3608_v49, %v3607_v52 }
 0xd54   : > { %3463 = vadd.xlane.f32.xlu0 %v3460_v18  ;;  %4891 = vmatprep.subr.bf16.mxu1 %v4890_v16 }
 0xd56   : > { %4893 = vmatpush3.bf16.msra.mxu1 %v4892_v10 }
 0xde1   : > { %v3464_v35 = vpop.xlane.xlu0 %3463 }
 0xde2   : > { %v3465_v8 = vmul.f32 0.0078125, %v3464_v35  ;;  %v3632_v35 = vld [vmem:[%s6642_s28 + $0xd8] sm:$0xff] }
 0xde4   : > { %v6534_v21 = vsub.f32 %v3460_v18, %v3465_v8  ;;  %v3625_v18 = vld [vmem:[%s6642_s28 + $0xa0] sm:$0xff]  ;;  %v4904_v8 = vpack.c.bf16 %v3614_v59, %v3613_v31 }
 0xde5   : > { %v4894_v36 = vpack.c.bf16 %v3626_v45, %v3625_v18 }
 0xde6   : > { %v3467_v20 = vmul.f32 %v6534_v21, %v6534_v21 }
 0xde7   : > { %4895 = vmatprep.subr.bf16.mxu1 %v4894_v36 }
 0xde8   : > { %3468 = vadd.xlane.f32.xlu1 %v3467_v20  ;;  %4897 = vmatpush3.bf16.msra.mxu1 %v4896_v7  ;;  %v4906_v20 = vpack.c.bf16 %v3632_v35, %v3631_v58 }
 0xde9   : > { %4899 = vmatprep.subr.bf16.mxu1 %v4898_v17  ;;  %v3884_v17 = vld [vmem:[%s5220_s9] ss:$0 sm:$0xff] }
 0xdec   : > { %4901 = vmatpush3.bf16.msra.mxu1 %v4900_v27 }
 0xded   : > { %4903 = vmatprep.subr.bf16.mxu1 %v4902_v9 }
 0xdf0   : > { %4905 = vmatpush3.bf16.msra.mxu1 %v4904_v8 }
 0xdf1   : > { %4907 = vmatprep.subr.bf16.mxu1 %v4906_v20 }
 0xdf4   : > { %4909 = vmatpush3.bf16.msra.mxu1 %v4908_v37 }
 0xdf5   : > { %4911 = vmatprep.subr.bf16.mxu1 %v4910_v2 }
 0xdf8   : > { %4913 = vmatpush3.bf16.msra.mxu1 %v4912_v51 }
 0xdf9   : > { %4915 = vmatprep.subr.bf16.mxu1 %v4914_v12 }
 0xdfc   : > { %4917 = vmatpush3.bf16.msra.mxu1 %v4916_v33 }
 0xe75   : > { %v3469_v44 = vpop.xlane.xlu1 %3468 }
 0xe76   : > { %v3470_v14 = vmul.f32 0.0078125, %v3469_v44 }
 0xe78   : > { %v3471_v55 = vadd.f32 1e-05, %v3470_v14 }
 0xe7a   : > { %4985 = vrsqrt.f32 %v3471_v55 }
 0xe84   : > { %v4986_v25 = vpop.eup %4985 }
 0xe85   : > { %v3473_v22 = vmul.f32 %v4986_v25, %v6534_v21  ;;  %v3523_v21 = vshrl.u32 %v3522_v24, 7 }
 0xe87   : > { %v3480_v40 = vmul.f32 %v3881_v38, %v3473_v22  ;;  %v3524_v28 = vsub.s32 0, %v3523_v21  ;;  %v3528_v63 = vsub.s32 1, %v3523_v21 }
 0xe89   : > { %v3487_v61 = vadd.f32 %v3882_v54, %v3480_v40  ;;  %v3525_v42 = vrot.slane %v3520_v30, %v3524_v28  ;;  %v3529_v39 = vrot.slane %v3520_v30, %v3528_v63 }
 0xe8b   : > { %3597 = vmatmul.mubr.f32.vlgmr.msra.gmra.mrb[14].mxu0 %v3487_v61 }
 0xf5e   : > { %v3598_v3 = vpop.f32.mrb[14].mxu0 }
 0xf5f   : > { %v3599_v43 = vadd.f32 %v3598_v3, %v3525_v42  ;;  %v3600_v46 = vpop.f32.mrb[15].mxu0 }
 0xf60   : > { %v3601_v26 = vadd.f32 %v3600_v46, %v3529_v39 }
 0xf61   : > { %v3603_v0 = vmax.f32 %v3599_v43, 0.0 }
 0xf62   : > { %v3604_v48 = vmax.f32 %v3601_v26, 0.0 }
 0xf64   : > { %3708 = vmatprep.mubr.f32.mxu1 %v3604_v48 }
 0xf65   : > { %3709 = vmatmul.mubr.f32.vlgmr.msra.gmra.mrb[14].mxu1 %v3603_v0 }
0x1038   : > { %v4129_v6 = vpop.f32.mrb[14].mxu1 }
0x1039   : > { %v4130_v16 = vpop.f32.mrb[15].mxu1 }
0x103a   : > { %v4131_v52 = vadd.f32 %v4130_v16, %v4129_v6 }
0x103c   : > { %v3711_v49 = vadd.f32 %v4131_v52, %v3883_v4 }
0x103e   : > { %v3714_v18 = vadd.f32 %v3711_v49, %v3487_v61 }
0x1040   : > { %3717 = vadd.xlane.f32.xlu0 %v3714_v18 }
0x10cd   : > { %v3718_v45 = vpop.xlane.xlu0 %3717 }
0x10ce   : > { %v3719_v10 = vmul.f32 0.0078125, %v3718_v45 }
0x10d0   : > { %v3720_v36 = vsub.f32 %v3714_v18, %v3719_v10 }
0x10d2   : > { %v3721_v56 = vmul.f32 %v3720_v36, %v3720_v36 }
0x10d4   : > { %3722 = vadd.xlane.f32.xlu1 %v3721_v56 }
0x1161   : > { %v3723_v60 = vpop.xlane.xlu1 %3722 }
0x1162   : > { %v3724_v5 = vmul.f32 0.0078125, %v3723_v60 }
0x1164   : > { %v3725_v15 = vadd.f32 1e-05, %v3724_v5 }
0x1166   : > { %4987 = vrsqrt.f32 %v3725_v15 }
0x1170   : > { %v4988_v7 = vpop.eup %4987 }
0x1171   : > { %v3727_v41 = vmul.f32 %v4988_v7, %v3720_v36 }
0x1173   : > { %v3734_v1 = vmul.f32 %v3884_v17, %v3727_v41 }
0x1175   : > { %v3741_v62 = vadd.f32 %v3885_v57, %v3734_v1 }
0x1177   : > { %3742 = vst [vmem:[%s1102_s16] sm:$0xff] %v3741_v62 }
0x1178 PF: > { %s81_s22 = sadd.s32 1, %s4996_s22  }
0x1179   : > { %p78_p4 = scmp.ge.s32.totalorder %s81_s22, 4  }
0x117b   :  { %80 = sbr.rel (!%p78_p4) target bundleno = 62 (0x3e), region = 231 }

</bundles_post_ra>
